<compile_context>
chip_gen: v7x
topology: tpu7x:2x2x1
jax: 0.10.0
libtpu: 0.0.40
codegen_flags: <defaults>
</compile_context>

<pallas_src>
import functools

import jax
import jax.numpy as jnp
from jax.experimental import pallas as pl
from jax.experimental.pallas import tpu as pltpu


def _vq_kernel(x_ref, e_ref, esq_ref, q_ref, idx_ref, stats_ref, *,
               tile_rows, n_valid, needs_mask):
    """Quantize one (TN, D) tile of flattened inputs against the full codebook.

    x_ref    : (TN, D)  flattened NHWC inputs tile (f32)
    e_ref    : (K, D)   codebook (used for both GEMMs; no transposed copy)
    esq_ref  : (1, K)   precomputed ||e_k||^2
    q_ref    : (TN, D)  quantized (straight-through forward value)
    idx_ref  : (TN, 1)  int32 nearest-code indices (compact encodings)
    stats_ref: (8, K)   per-tile partials: row 0 = per-code counts,
                        row 1 = sum((q - x)^2) broadcast across lanes
    """
    x = x_ref[...]                                              # (TN, D) f32
    e = e_ref[...]                                              # (K, D)  f32

    # Squared distances: one MXU GEMM contracting D of both operands (A @ B^T,
    # no in-kernel or wrapper transpose of the codebook), exact-precision so
    # argmin matches torch.
    xe = jax.lax.dot_general(
        x, e, (((1,), (1,)), ((), ())),
        preferred_element_type=jnp.float32,
        precision=jax.lax.Precision.HIGHEST)                    # (TN, K)
    x_sq = jnp.sum(x * x, axis=1, keepdims=True)                # (TN, 1)
    dist = (x_sq - 2.0 * xe) + esq_ref[...]                     # (TN, K)

    # First-minimum one-hot (same tie-break as torch.argmin), built with lane
    # reductions + compares only (no argmin / gather lowering needed).
    k = dist.shape[1]
    kf = jax.lax.broadcasted_iota(jnp.int32, dist.shape, 1).astype(jnp.float32)
    dmin = jnp.min(dist, axis=1, keepdims=True)                 # (TN, 1)
    idx_f = jnp.min(jnp.where(dist == dmin, kf, float(k)),
                    axis=1, keepdims=True)                      # (TN, 1)
    enc = (kf == idx_f).astype(jnp.float32)                     # (TN, K)

    # quantized = one_hot @ codebook (row "gather" as a second MXU GEMM).
    q = jnp.dot(enc, e, preferred_element_type=jnp.float32,
                precision=jax.lax.Precision.HIGHEST)            # (TN, D)
    diff = q - x

    q_ref[...] = q.astype(q_ref.dtype)      # straight-through forward value
    idx_ref[...] = idx_f.astype(jnp.int32)  # compact encodings (tiny HBM write)

    # Per-tile partial statistics packed into one lane-dense (8, K) block.
    # Padded rows (only present when N does not divide the tile grid) are
    # masked out of the statistics; their q/idx rows are sliced off outside.
    if needs_mask:
        base = pl.program_id(0) * tile_rows
        rows = base + jax.lax.broadcasted_iota(jnp.int32, (tile_rows, 1), 0)
        valid = (rows < n_valid).astype(jnp.float32)            # (TN, 1)
        enc_stat = enc * valid
        err_rows = jnp.sum(diff * diff, axis=1, keepdims=True) * valid
    else:
        enc_stat = enc
        err_rows = jnp.sum(diff * diff, axis=1, keepdims=True)

    row = jax.lax.broadcasted_iota(jnp.int32, (8, k), 0)
    cnt = jnp.sum(enc_stat, axis=0, keepdims=True)              # (1, K)
    err = jnp.sum(err_rows, axis=0, keepdims=True)              # (1, 1)
    stats_ref[...] = jnp.where(row == 0, cnt,
                               jnp.where(row == 1, err, 0.0))


_TILE_CANDIDATES = (4096, 2048, 1024, 512, 256, 128, 64, 32, 16, 8)


def _vmem_capacity_bytes():
    try:
        return int(pltpu.get_tpu_info().vmem_capacity_bytes)
    except Exception:
        return 64 << 20  # conservative (v7x per-TensorCore physical VMEM)


def _tile_footprint_bytes(tn, d, k):
    """Rough VMEM footprint for one pipelined step at row-tile tn (f32)."""
    io = 2 * (2 * tn * d + tn + 8 * k)       # double-buffered x/q/idx/stats
    const = 2 * (k * d + k)                  # grid-invariant codebook + ||e||^2
    tmp = 3 * tn * k + 2 * tn * d            # dist/enc/xe + live x/q copies
    return 4 * (io + const + tmp)


def _pick_tile(n, d, k, vmem_budget):
    """Largest row tile fitting the VMEM budget with >= 2 grid steps."""
    for t in _TILE_CANDIDATES:
        if _tile_footprint_bytes(t, d, k) <= vmem_budget and pl.cdiv(n, t) >= 2:
            return t
    return _TILE_CANDIDATES[-1]


def vq_ema_forward_nhwc(x_nhwc, codebook, commitment_cost,
                        return_onehot_encodings=True):
    """Eval-mode VectorQuantizerEMA forward on NHWC activations.

    Preferred entry point: skips the two full-tensor NCHW<->NHWC HBM
    transposes that the NCHW interface requires.
    """
    # TODO(synk): training-mode EMA updates (_ema_cluster_size / _ema_w /
    # embedding.weight reassignment) are in-place nn.Parameter/buffer
    # mutations with no functional Pallas equivalent here; the per-code
    # counts needed for them are exported in the kernel's stats output.
    D = x_nhwc.shape[-1]
    K, D_e = codebook.shape
    assert D == D_e, "input channel dim must equal embedding_dim"

    flat = x_nhwc.reshape(-1, D).astype(jnp.float32)            # (N, D)
    N = flat.shape[0]

    vmem_cap = _vmem_capacity_bytes()
    vmem_limit = min(int(vmem_cap * 0.8), 100 << 20)            # scoped limit
    TN = _pick_tile(N, D, K, vmem_limit // 2)                   # headroom
    G = max(2, pl.cdiv(N, TN))      # >= 2 grid steps so both v7x TCs get work
    N_pad = G * TN
    needs_mask = (N_pad != N)
    flat_p = jnp.pad(flat, ((0, N_pad - N), (0, 0))) if needs_mask else flat

    e = codebook.astype(jnp.float32)                            # (K, D)
    e_sq = jnp.sum(e * e, axis=1)[None, :]                      # (1, K)

    kernel = functools.partial(_vq_kernel, tile_rows=TN, n_valid=N,
                               needs_mask=needs_mask)

    cost = pl.CostEstimate(
        flops=4 * N_pad * K * D,                                # two GEMMs
        transcendentals=0,
        bytes_accessed=4 * (2 * N_pad * D + N_pad + G * 8 * K + K * D + K))

    q_flat, idx, partials = pl.pallas_call(
        kernel,
        out_shape=(
            jax.ShapeDtypeStruct((N_pad, D), jnp.float32),      # quantized
            jax.ShapeDtypeStruct((N_pad, 1), jnp.int32),        # code indices
            jax.ShapeDtypeStruct((G, 8, K), jnp.float32),       # per-tile stats
        ),
        grid_spec=pltpu.PrefetchScalarGridSpec(
            num_scalar_prefetch=0,
            grid=(G,),
            in_specs=[
                pl.BlockSpec((TN, D), lambda t: (t, 0)),
                pl.BlockSpec((K, D), lambda t: (0, 0)),
                pl.BlockSpec((1, K), lambda t: (0, 0)),
            ],
            out_specs=(
                pl.BlockSpec((TN, D), lambda t: (t, 0)),
                pl.BlockSpec((TN, 1), lambda t: (t, 0)),
                pl.BlockSpec((None, 8, K), lambda t: (t, 0, 0)),
            ),
        ),
        compiler_params=pltpu.CompilerParams(
            dimension_semantics=("parallel",),
            vmem_limit_bytes=vmem_limit),
        cost_estimate=cost,
    )(flat_p, e, e_sq)

    # Tiny epilogue: combine the G per-tile partial sums (G*K scalars).
    enc_sum = jnp.sum(partials[:, 0, :], axis=0)       # == sum(one_hot, 0)
    sq_err = jnp.sum(partials[:, 1, 0])                # sum((q - x)^2)
    e_latent_loss = sq_err / (N * D)
    loss = commitment_cost * e_latent_loss
    avg_probs = enc_sum / N
    perplexity = jnp.exp(-jnp.sum(avg_probs * jnp.log(avg_probs + 1e-10)))

    quantized_nhwc = q_flat[:N].reshape(x_nhwc.shape)
    indices = idx[:N, 0]
    if return_onehot_encodings:
        # Materialize the (N, K) one-hot only because the module returns it.
        encodings = jax.nn.one_hot(indices, K, dtype=jnp.float32)
    else:
        encodings = indices
    return loss, quantized_nhwc, perplexity, encodings


def vq_ema_forward(x_nchw, codebook, commitment_cost,
                   return_onehot_encodings=True):
    """NCHW interface matching the PyTorch module's eval forward.

    x_nchw  : (B, C, H, W) with C == embedding_dim
    codebook: (num_embeddings, embedding_dim)  (== self._embedding.weight)
    returns : (loss, quantized_nchw, perplexity, encodings)
    """
    B, C, H, W = x_nchw.shape
    x_nhwc = jnp.transpose(x_nchw, (0, 2, 3, 1))
    loss, q_nhwc, perplexity, encodings = vq_ema_forward_nhwc(
        x_nhwc, codebook, commitment_cost, return_onehot_encodings)
    quantized = jnp.transpose(q_nhwc, (0, 3, 1, 2))
    return loss, quantized, perplexity, encodings


def _reference(x_nchw, codebook, commitment_cost):
    """Pure-JAX reference matching the PyTorch module's eval forward."""
    hi = jax.lax.Precision.HIGHEST
    x = jnp.transpose(x_nchw, (0, 2, 3, 1))
    input_shape = x.shape
    flat = x.reshape(-1, codebook.shape[1])
    distances = (jnp.sum(flat ** 2, axis=1, keepdims=True)
                 + jnp.sum(codebook ** 2, axis=1)
                 - 2.0 * jnp.dot(flat, codebook.T, precision=hi))
    idx = jnp.argmin(distances, axis=1)
    enc = jax.nn.one_hot(idx, codebook.shape[0], dtype=jnp.float32)
    quantized = jnp.dot(enc, codebook, precision=hi).reshape(input_shape)
    e_latent_loss = jnp.mean((quantized - x) ** 2)
    loss = commitment_cost * e_latent_loss
    quantized_st = x + (quantized - x)                 # straight-through value
    avg_probs = jnp.mean(enc, axis=0)
    perplexity = jnp.exp(-jnp.sum(avg_probs * jnp.log(avg_probs + 1e-10)))
    return loss, jnp.transpose(quantized_st, (0, 3, 1, 2)), perplexity, enc


if __name__ == "__main__":
    # Module config: num_embeddings=128, embedding_dim=64 (lane-dense K),
    # commitment_cost=0.25.  Input: B=2, C=64, H=W=16  ->  N = 512 rows.
    B, D, H, W = 2, 64, 16, 16
    K = 128
    commitment_cost = 0.25

    key = jax.random.PRNGKey(0)
    kx, ke = jax.random.split(key)
    # Inputs/codebook snapped to multiples of 1/8 so the distance math has no
    # near-ties -> kernel and reference pick identical nearest codes.
    x = jnp.round(jax.random.normal(kx, (B, D, H, W), jnp.float32) * 8.0) / 8.0
    codebook = jnp.round(jax.random.normal(ke, (K, D), jnp.float32) * 8.0) / 8.0

    loss, quantized, perplexity, encodings = vq_ema_forward(
        x, codebook, commitment_cost)
    quantized = jax.block_until_ready(quantized)

    l_ref, q_ref, p_ref, enc_ref = _reference(x, codebook, commitment_cost)
    assert quantized.shape == q_ref.shape
    assert encodings.shape == enc_ref.shape
    assert jnp.allclose(quantized, q_ref, atol=1e-5, rtol=1e-5), "quantized mismatch"
    assert jnp.allclose(encodings, enc_ref, atol=1e-6), "encodings mismatch"
    assert jnp.allclose(loss, l_ref, atol=1e-5, rtol=1e-4), "loss mismatch"
    assert jnp.allclose(perplexity, p_ref, atol=1e-4, rtol=1e-4), "perplexity mismatch"
    print("KERNEL_OK")
</pallas_src>

<mosaic_0001>
module attributes {stable_mosaic.version = 11 : i64} {
  func.func @_vq_kernel(%arg0: i32, %arg1: memref<256x64xf32, #tpu.memory_space<vmem>>, %arg2: memref<128x64xf32, #tpu.memory_space<vmem>>, %arg3: memref<1x128xf32, #tpu.memory_space<vmem>>, %arg4: memref<256x64xf32, #tpu.memory_space<vmem>>, %arg5: memref<256x1xi32, #tpu.memory_space<vmem>>, %arg6: memref<1x8x128xf32, #tpu.memory_space<vmem>>) attributes {dimension_semantics = [#tpu.dimension_semantics<parallel>], iteration_bounds = array<i64: 2>, scalar_prefetch = 0 : i64, scratch_operands = 0 : i64, tpu.core_type = #tpu.core_type<tc>, window_params = [{transform_indices = @transform_0, window_bounds = array<i64: 256, 64>}, {pipeline_mode = #tpu.pipeline_mode<synchronous>, transform_indices = @transform_1, window_bounds = array<i64: 128, 64>}, {pipeline_mode = #tpu.pipeline_mode<synchronous>, transform_indices = @transform_2, window_bounds = array<i64: 1, 128>}, {transform_indices = @transform_3, window_bounds = array<i64: 256, 64>}, {transform_indices = @transform_4, window_bounds = array<i64: 256, 1>}, {transform_indices = @transform_5, window_bounds = array<i64: 1, 8, 128>}]} {
    %c0 = arith.constant 0 : index
    %c0_0 = arith.constant 0 : index
    %0 = vector.load %arg1[%c0, %c0_0] : memref<256x64xf32, #tpu.memory_space<vmem>>, vector<256x64xf32>
    %c0_1 = arith.constant 0 : index
    %c0_2 = arith.constant 0 : index
    %1 = vector.load %arg2[%c0_1, %c0_2] : memref<128x64xf32, #tpu.memory_space<vmem>>, vector<128x64xf32>
    %cst = arith.constant dense<0.000000e+00> : vector<256x128xf32>
    %2 = tpu.matmul %0, %1, %cst {dimension_numbers = #tpu.dot_dimension_numbers<[1], [1], [0], [0], [0, 0, 1, 0], [], []>, precision = #tpu.contract_precision<fp32>} : vector<256x64xf32>, vector<128x64xf32>, vector<256x128xf32> -> vector<256x128xf32>
    %3 = arith.mulf %0, %0 : vector<256x64xf32>
    %cst_3 = arith.constant dense<0.000000e+00> : vector<256xf32>
    %4 = vector.multi_reduction <add>, %3, %cst_3 [1] : vector<256x64xf32> to vector<256xf32>
    %5 = vector.shape_cast %4 : vector<256xf32> to vector<256x1xf32>
    %cst_4 = arith.constant 2.000000e+00 : f32
    %6 = vector.broadcast %cst_4 : f32 to vector<256x128xf32>
    %7 = arith.mulf %6, %2 : vector<256x128xf32>
    %8 = vector.broadcast %5 : vector<256x1xf32> to vector<256x128xf32>
    %9 = arith.subf %8, %7 : vector<256x128xf32>
    %c0_5 = arith.constant 0 : index
    %c0_6 = arith.constant 0 : index
    %10 = vector.load %arg3[%c0_5, %c0_6] : memref<1x128xf32, #tpu.memory_space<vmem>>, vector<1x128xf32>
    %11 = vector.broadcast %10 : vector<1x128xf32> to vector<256x128xf32>
    %12 = arith.addf %9, %11 : vector<256x128xf32>
    %13 = tpu.iota {dimensions = array<i32: 1>} : vector<256x128xi32>
    %14 = arith.sitofp %13 : vector<256x128xi32> to vector<256x128xf32>
    %cst_7 = arith.constant dense<0x7F800000> : vector<256xf32>
    %15 = vector.multi_reduction <minimumf>, %12, %cst_7 [1] : vector<256x128xf32> to vector<256xf32>
    %16 = vector.shape_cast %15 : vector<256xf32> to vector<256x1xf32>
    %17 = vector.broadcast %16 : vector<256x1xf32> to vector<256x128xf32>
    %18 = arith.cmpf oeq, %12, %17 : vector<256x128xf32>
    %cst_8 = arith.constant 1.280000e+02 : f32
    %19 = vector.broadcast %cst_8 : f32 to vector<256x128xf32>
    %20 = arith.select %18, %14, %19 : vector<256x128xi1>, vector<256x128xf32>
    %cst_9 = arith.constant dense<0x7F800000> : vector<256xf32>
    %21 = vector.multi_reduction <minimumf>, %20, %cst_9 [1] : vector<256x128xf32> to vector<256xf32>
    %22 = vector.shape_cast %21 : vector<256xf32> to vector<256x1xf32>
    %23 = vector.broadcast %22 : vector<256x1xf32> to vector<256x128xf32>
    %24 = arith.cmpf oeq, %14, %23 : vector<256x128xf32>
    %25 = arith.extui %24 : vector<256x128xi1> to vector<256x128xi32>
    %26 = arith.sitofp %25 : vector<256x128xi32> to vector<256x128xf32>
    %cst_10 = arith.constant dense<0.000000e+00> : vector<256x64xf32>
    %27 = tpu.matmul %26, %1, %cst_10 {dimension_numbers = #tpu.dot_dimension_numbers<[1], [0], [0], [1], [0, 0, 1, 1], [], []>, precision = #tpu.contract_precision<fp32>} : vector<256x128xf32>, vector<128x64xf32>, vector<256x64xf32> -> vector<256x64xf32>
    %28 = arith.subf %27, %0 : vector<256x64xf32>
    %c0_11 = arith.constant 0 : index
    %c0_12 = arith.constant 0 : index
    %29 = vector.load %arg4[%c0_11, %c0_12] : memref<256x64xf32, #tpu.memory_space<vmem>>, vector<256x64xf32>
    tpu.vector_store %arg4[%c0_11, %c0_12], %27 {strides = array<i32>} : memref<256x64xf32, #tpu.memory_space<vmem>>, vector<256x64xf32>,
    %30 = arith.fptosi %22 : vector<256x1xf32> to vector<256x1xi32>
    %c0_13 = arith.constant 0 : index
    %c0_14 = arith.constant 0 : index
    %31 = vector.load %arg5[%c0_13, %c0_14] : memref<256x1xi32, #tpu.memory_space<vmem>>, vector<256x1xi32>
    tpu.vector_store %arg5[%c0_13, %c0_14], %30 {strides = array<i32>} : memref<256x1xi32, #tpu.memory_space<vmem>>, vector<256x1xi32>,
    %32 = arith.mulf %28, %28 : vector<256x64xf32>
    %cst_15 = arith.constant dense<0.000000e+00> : vector<256xf32>
    %33 = vector.multi_reduction <add>, %32, %cst_15 [1] : vector<256x64xf32> to vector<256xf32>
    %34 = vector.shape_cast %33 : vector<256xf32> to vector<256x1xf32>
    %35 = tpu.iota {dimensions = array<i32: 0>} : vector<8x128xi32>
    %cst_16 = arith.constant dense<0.000000e+00> : vector<128xf32>
    %36 = vector.multi_reduction <add>, %26, %cst_16 [0] : vector<256x128xf32> to vector<128xf32>
    %37 = vector.shape_cast %36 : vector<128xf32> to vector<1x128xf32>
    %cst_17 = arith.constant dense<0.000000e+00> : vector<1xf32>
    %38 = vector.multi_reduction <add>, %34, %cst_17 [0] : vector<256x1xf32> to vector<1xf32>
    %39 = vector.shape_cast %38 : vector<1xf32> to vector<1x1xf32>
    %c0_i32 = arith.constant 0 : i32
    %40 = vector.broadcast %c0_i32 : i32 to vector<8x128xi32>
    %41 = arith.cmpi eq, %35, %40 : vector<8x128xi32>
    %c1_i32 = arith.constant 1 : i32
    %42 = vector.broadcast %c1_i32 : i32 to vector<8x128xi32>
    %43 = arith.cmpi eq, %35, %42 : vector<8x128xi32>
    %cst_18 = arith.constant 0.000000e+00 : f32
    %44 = vector.shape_cast %39 : vector<1x1xf32> to vector<1x1xf32>
    %45 = vector.broadcast %44 : vector<1x1xf32> to vector<8x128xf32>
    %46 = vector.broadcast %cst_18 : f32 to vector<8x128xf32>
    %47 = arith.select %43, %45, %46 : vector<8x128xi1>, vector<8x128xf32>
    %48 = vector.shape_cast %37 : vector<1x128xf32> to vector<1x128xf32>
    %49 = vector.broadcast %48 : vector<1x128xf32> to vector<8x128xf32>
    %50 = arith.select %41, %49, %47 : vector<8x128xi1>, vector<8x128xf32>
    %c0_19 = arith.constant 0 : index
    %c0_20 = arith.constant 0 : index
    %c0_21 = arith.constant 0 : index
    %51 = vector.load %arg6[%c0_19, %c0_20, %c0_21] : memref<1x8x128xf32, #tpu.memory_space<vmem>>, vector<1x8x128xf32>
    %52 = vector.shape_cast %51 : vector<1x8x128xf32> to vector<8x128xf32>
    %53 = vector.shape_cast %50 : vector<8x128xf32> to vector<1x8x128xf32>
    tpu.vector_store %arg6[%c0_19, %c0_20, %c0_21], %53 {strides = array<i32>} : memref<1x8x128xf32, #tpu.memory_space<vmem>>, vector<1x8x128xf32>,
    return
  }
  func.func @transform_0(%arg0: i32) -> (i32, i32) {
    %c0_i32 = arith.constant 0 : i32
    %c0_i32_0 = arith.constant 0 : i32
    return %arg0, %c0_i32 : i32, i32
  }
  func.func @transform_1(%arg0: i32) -> (i32, i32) {
    %c0_i32 = arith.constant 0 : i32
    %c0_i32_0 = arith.constant 0 : i32
    %c0_i32_1 = arith.constant 0 : i32
    return %c0_i32, %c0_i32_0 : i32, i32
  }
  func.func @transform_2(%arg0: i32) -> (i32, i32) {
    %c0_i32 = arith.constant 0 : i32
    %c0_i32_0 = arith.constant 0 : i32
    %c0_i32_1 = arith.constant 0 : i32
    return %c0_i32, %c0_i32_0 : i32, i32
  }
  func.func @transform_3(%arg0: i32) -> (i32, i32) {
    %c0_i32 = arith.constant 0 : i32
    %c0_i32_0 = arith.constant 0 : i32
    return %arg0, %c0_i32 : i32, i32
  }
  func.func @transform_4(%arg0: i32) -> (i32, i32) {
    %c0_i32 = arith.constant 0 : i32
    %c0_i32_0 = arith.constant 0 : i32
    return %arg0, %c0_i32 : i32, i32
  }
  func.func @transform_5(%arg0: i32) -> (i32, i32, i32) {
    %c0_i32 = arith.constant 0 : i32
    %c0_i32_0 = arith.constant 0 : i32
    %c0_i32_1 = arith.constant 0 : i32
    return %arg0, %c0_i32, %c0_i32_0 : i32, i32, i32
  }
}

</mosaic_0001>

<bundles_post_ra>
// kernel: tpu_custom_call.1
= control target key start
LH: loop header
LB: loop body
LE: loop exit
PB: predicated region body
PF: predicated region fallthrough
CT: control target
= control target key end

     0   :  { %11 = vsyncpa [#allocation3], 0  ;;  %s11119_s0 = inlined_call_operand.vmem [shape: f32[512,64], index: 0, kind: input, shape index: {}]   ;;  %s11120_s1 = inlined_call_operand.vmem [shape: f32[128,64], index: 1, kind: input, shape index: {}]   ;;  %s11121_s2 = inlined_call_operand.vmem [shape: f32[1,128], index: 2, kind: input, shape index: {}]   ;;  %s11122_s3 = inlined_call_operand.vmem [shape: f32[512,64], index: 3, kind: output, shape index: {0}]   ;;  %s11123_s4 = inlined_call_operand.vmem [shape: s32[512,1], index: 4, kind: output, shape index: {1}]   ;;  %s11124_s5 = inlined_call_operand.hbm [shape: f32[2,8,128], index: 5, kind: output, shape index: {2}]  }
   0x1   :  { %13 = vsyncpa [#allocation3 + $0x1], 0  ;;  %s8031_s18 = smov 0   ;;  %s8033_s19 = smov 0  }
   0x2   :  { %s8035_s20 = smov 0   ;;  %s8037_s21 = smov 0  }
   0x3 LB: > { %s8052_s22 = sadd.s32 4294967295, %s7996_s21   ;;  %s5394_s23 = sadd.s32 4294967294, %s7996_s21   ;;  %s7996_s21 = sphi %s8037_s21, %s12109_s21   ;;  %s7992_s20 = sphi %s8035_s20, %s12108_s20   ;;  %s7988_s19 = sphi %s8033_s19, %s12107_s19   ;;  %s7984_s18 = sphi %s8031_s18, %s12106_s18  }
   0x4   : > { %s8056_s24 = sadd.s32 1, %s7996_s21   ;;  %s146_s25 = sadd.s32 1, %s7992_s20 }
   0x5   : > { %s143_s26 = ssub.s32 %s7996_s21, %s8056_s24  ;;  %p156_p0 = scmp.ne.s32.totalorder %s7992_s20, %s7988_s19 }
   0x6   : > { %p144_p1 = scmp.eq.s32.totalorder %s143_s26, 0  ;;  %p157_p2 = scmp.eq.s32.totalorder %s8052_s22, 1 }
   0x7   : > { %p162_p3 = scmp.ne.s32.totalorder %s7988_s19, %s7984_s18  ;;  %p163_p4 = scmp.eq.s32.totalorder %s5394_s23, 1 }
   0x8   : > { %s8067_s27 = scalar_select %p144_p1, %s7992_s20, %s146_s25  }
   0x9   : > { %p8069_p5 = por %p157_p2, %p156_p0  ;;  %p8073_p6 = por %p163_p4, %p162_p3 }
   0xa   : > { %p5397_p7 = scmp.ge.s32.totalorder %s7996_s21, 1  ;;  %p196_p8 = scmp.lt.s32.totalorder %s7996_s21, 3 }
   0xc   : > { %p197_p9 = pnand %p5397_p7, %p196_p8 }
   0xe   : > { %200 = sbr.rel (%p197_p9) target bundleno = 1712 (0x6b0), region = 32 }
  0x15   : > { %v284_v0 = vld [vmem:[%s11120_s1] sm:$0xff]  ;;  %v285_v1 = vld [vmem:[%s11120_s1 + $0x8] sm:$0xff]  ;;  %vm11336_vm0 = vcmask 523264   ;;  %v286_v2 = vld [vmem:[%s11120_s1 + $0x10] sm:$0xff]  ;;  %s5399_s17 = sshll.u32 %s8052_s22, 5  ;;  %s5535_s10 = sshll.u32 %s8052_s22, 7 }
  0x16   : > { %v8089_v3 = vsel %vm11336_vm0, %v284_v0, 0  ;;  %v8092_v4 = vsel %vm11336_vm0, %v285_v1, 0  ;;  %v287_v5 = vld [vmem:[%s11120_s1 + $0x18] sm:$0xff]  ;;  %v8098_v6 = vsel %vm11336_vm0, %v286_v2, 0  ;;  %v288_v11 = vld [vmem:[%s11120_s1 + $0x20] sm:$0xff]  ;;  %v289_v12 = vld [vmem:[%s11120_s1 + $0x28] sm:$0xff]  ;;  %s11077_s15 = scalar_lea.hbm %s11124_s5, %s5535_s10 }
  0x17   : > { %v446_v7 = vand.u32 4294901760, %v8089_v3  ;;  %v449_v8 = vand.u32 4294901760, %v8092_v4  ;;  %v8103_v9 = vsel %vm11336_vm0, %v287_v5, 0  ;;  %v452_v10 = vand.u32 4294901760, %v8098_v6  ;;  %p235_p10 = scmp.lt.s32.totalorder %s5399_s17, 63  ;;  %v290_v20 = vld [vmem:[%s11120_s1 + $0x30] sm:$0xff] }
  0x18   : > { %v455_v13 = vand.u32 4294901760, %v8103_v9  ;;  %v8127_v16 = vsel %vm11336_vm0, %v288_v11, 0  ;;  %v8130_v17 = vsel %vm11336_vm0, %v289_v12, 0  ;;  %v291_v21 = vld [vmem:[%s11120_s1 + $0x38] sm:$0xff]  ;;  %v8159_v24 = vsel %vm11336_vm0, %v290_v20, 0  ;;  %v292_v31 = vld [vmem:[%s11120_s1 + $0x40] sm:$0xff] }
  0x19   : > { %v8118_v14 = vpack.c.bf16 %v449_v8, %v446_v7  ;;  %v458_v18 = vand.u32 4294901760, %v8127_v16  ;;  %v461_v19 = vand.u32 4294901760, %v8130_v17  ;;  %s12111_s17 = smov (!%p235_p10, %s5399_s17), 63  ;;  %v8162_v25 = vsel %vm11336_vm0, %v291_v21, 0  ;;  %v293_v32 = vld [vmem:[%s11120_s1 + $0x48] sm:$0xff]  ;;  %v294_v41 = vld [vmem:[%s11120_s1 + $0x50] sm:$0xff] }
  0x1a   : > { %v8124_v15 = vpack.c.bf16 %v455_v13, %v452_v10  ;;  %s8143_s6 = sshll.u32 %s12111_s17, 3  ;;  %v11138_v28 = vand.u32 4294901760, %v8159_v24  ;;  %v11137_v29 = vand.u32 4294901760, %v8162_v25  ;;  %v8191_v36 = vsel %vm11336_vm0, %v292_v31, 0  ;;  %v295_v42 = vld [vmem:[%s11120_s1 + $0x58] sm:$0xff]  ;;  %v296_v48 = vld [vmem:[%s11120_s1 + $0x60] sm:$0xff] }
  0x1b   : > { %11496 = vst [vmem:[#allocation5_spill] sm:$0xff] %v8118_v14  ;;  %7075 = vmatprep.subr.bf16.mxu0 %v8118_v14  ;;  %s8149_s9 = scalar_lea.vmem %s11119_s0, %s8143_s6  ;;  %v8155_v22 = vpack.c.bf16 %v461_v19, %v458_v18  ;;  %v8194_v37 = vsel %vm11336_vm0, %v293_v32, 0  ;;  %v11135_v39 = vand.u32 4294901760, %v8191_v36  ;;  %v8213_v44 = vsel %vm11336_vm0, %v294_v41, 0  ;;  %v297_v49 = vld [vmem:[%s11120_s1 + $0x68] sm:$0xff]  ;;  %v298_v57 = vld [vmem:[%s11120_s1 + $0x70] sm:$0xff]  ;;  %s9809_s26 = scalar_lea.vmem %s11123_s4, %s8143_s6 }
  0x1c   : > { %11497 = vst [vmem:[#allocation6_spill] sm:$0xff] %v8124_v15  ;;  %7077 = vmatpush3.bf16.xpose.msra.mxu0 %v8118_v14  ;;  %v252_v23 = vld [vmem:[%s8149_s9] sm:$0xff]  ;;  %v8185_v34 = vpack.c.bf16 %v11137_v29, %v11138_v28  ;;  %v11134_v40 = vand.u32 4294901760, %v8194_v37  ;;  %v8216_v45 = vsel %vm11336_vm0, %v295_v42, 0  ;;  %v11133_v46 = vand.u32 4294901760, %v8213_v44  ;;  %v253_v53 = vld [vmem:[%s8149_s9 + $0x8] sm:$0xff]  ;;  %s10939_s8 = scalar_lea.vmem %s11122_s3, %s8143_s6 }
  0x1d   : > { %7079 = vmatprep.subr.bf16.mxu0 %v8124_v15  ;;  %11498 = vst [vmem:[#allocation7_spill] sm:$0xff] %v8155_v22  ;;  %v302_v26 = vsel %vm11336_vm0, %v252_v23, 0  ;;  %v11132_v47 = vand.u32 4294901760, %v8216_v45  ;;  %v8235_v51 = vsel %vm11336_vm0, %v296_v48, 0  ;;  %v8238_v52 = vsel %vm11336_vm0, %v297_v49, 0  ;;  %v254_v54 = vld [vmem:[%s8149_s9 + $0x10] sm:$0xff] }
  0x1e   : > { %v8165_v27 = vand.u32 4294901760, %v302_v26  ;;  %11500 = vst [vmem:[#allocation9_spill] sm:$0xff] %v8185_v34  ;;  %v8210_v43 = vpack.c.bf16 %v11134_v40, %v11135_v39  ;;  %v11131_v55 = vand.u32 4294901760, %v8235_v51  ;;  %v11130_v56 = vand.u32 4294901760, %v8238_v52  ;;  %v299_v58 = vld [vmem:[%s11120_s1 + $0x78] sm:$0xff]  ;;  %v8292_v20 = vld [vmem:[%s8149_s9 + $0x28] sm:$0xff] }
  0x1f   : > { %v8232_v50 = vpack.c.bf16 %v11132_v47, %v11133_v46  ;;  %v305_v59 = vsel %vm11336_vm0, %v253_v53, 0  ;;  %v8256_v60 = vsub.f32 %v8089_v3, %v446_v7  ;;  %v8261_v61 = vsub.f32 %v8092_v4, %v449_v8  ;;  %v8283_v7 = vld [vmem:[%s8149_s9 + $0x18] sm:$0xff]  ;;  %v8286_v8 = vld [vmem:[%s8149_s9 + $0x20] sm:$0xff]  ;;  %11508 = vst [vmem:[#allocation17_spill] sm:$0xff] %v8292_v20  ;;  %v8306_v32 = vld [vmem:[%s8149_s9 + $0x30] sm:$0xff]  ;;  %s231_s6 = sand.u32 1, %s7988_s19  }
  0x20   : > { %v8172_v30 = vsub.f32 %v302_v26, %v8165_v27  ;;  %11501 = vst [vmem:[#allocation10_spill] sm:$0xff] %v8210_v43  ;;  %v308_v62 = vsel %vm11336_vm0, %v254_v54, 0  ;;  %v8268_v63 = vpack.c.bf16 %v11130_v56, %v11131_v55  ;;  %v8271_v0 = vsel %vm11336_vm0, %v298_v57, 0  ;;  %11506 = vst [vmem:[#allocation15_spill] sm:$0xff] %v8283_v7  ;;  %v8393_v40 = vld [vmem:[%s8149_s9 + $0x50] sm:$0xff]  ;;  %v8404_v29 = vld [vmem:[%s8149_s9 + $0x58] sm:$0xff] }
  0x21   : > { %11502 = vst [vmem:[#allocation11_spill] sm:$0xff] %v8232_v50  ;;  %11503 = vst [vmem:[#allocation12_spill] sm:$0xff] %v8256_v60  ;;  %v8274_v1 = vsel %vm11336_vm0, %v299_v58, 0  ;;  %v8276_v2 = vand.u32 4294901760, %v305_v59  ;;  %v8278_v3 = vand.u32 4294901760, %v308_v62  ;;  %v11127_v4 = vand.u32 4294901760, %v8256_v60 }
  0x22   : > { %11499 = vst [vmem:[#allocation8_spill] sm:$0xff] %v8172_v30  ;;  %v11125_v33 = vand.u32 4294901760, %v8172_v30  ;;  %11504 = vst [vmem:[#allocation13_spill] sm:$0xff] %v8261_v61  ;;  %v11126_v5 = vand.u32 4294901760, %v8261_v61  ;;  %v11129_v11 = vand.u32 4294901760, %v8271_v0  ;;  %v11128_v12 = vand.u32 4294901760, %v8274_v1 }
  0x23   : > { %11505 = vst [vmem:[#allocation14_spill] sm:$0xff] %v8268_v63  ;;  %11507 = vst [vmem:[#allocation16_spill] sm:$0xff] %v8286_v8  ;;  %v8296_v21 = vsub.f32 %v305_v59, %v8276_v2  ;;  %v8299_v23 = vsub.f32 %v308_v62, %v8278_v3  ;;  %v311_v26 = vsel %vm11336_vm0, %v8283_v7, 0  ;;  %v314_v31 = vsel %vm11336_vm0, %v8286_v8, 0  ;;  %v8347_v59 = vld [vmem:[%s8149_s9 + $0x48] sm:$0xff]  ;;  %s5264_s16 = scalar_lea.sflag [#allocation3], %s231_s6 }
  0x24   : > { %7081 = vmatpush3.bf16.xpose.msra.mxu0 %v8124_v15  ;;  %v529_v35 = vsub.f32 %v8172_v30, %v11125_v33  ;;  %11511 = vst [vmem:[#allocation20_spill] sm:$0xff] %v8306_v32  ;;  %v857_v41 = vsub.f32 %v8261_v61, %v11126_v5  ;;  %v317_v42 = vsel %vm11336_vm0, %v8292_v20, 0  ;;  %v8322_v48 = vsub.f32 %v8098_v6, %v452_v10  ;;  %v8344_v10 = vld [vmem:[%s8149_s9 + $0x40] sm:$0xff]  ;;  %v8803_v14 = vld [vmem:[%s8149_s9 + $0xe8] sm:$0xff]  ;;  %s8000_s17 = smov [#allocation2]  }
  0x25   : > { %7083 = vmatprep.subr.bf16.mxu0 %v8155_v22  ;;  %11509 = vst [vmem:[#allocation18_spill] sm:$0xff] %v8296_v21  ;;  %11510 = vst [vmem:[#allocation19_spill] sm:$0xff] %v8299_v23  ;;  %v8328_v49 = vpack.c.bf16 %v11128_v12, %v11129_v11  ;;  %v8333_v53 = vsub.f32 %v8103_v9, %v455_v13  ;;  %v8335_v54 = vand.u32 4294901760, %v311_v26  ;;  %v8337_v57 = vand.u32 4294901760, %v314_v31  ;;  %s7938_s23 = sshll.u32 %s8000_s17, 4  ;;  %s7939_s23 = int_to_ptr.vmem [resolvable:$false] %s7938_s23 }
  0x26   : > { %v530_v38 = vand.u32 4294901760, %v529_v35  ;;  %v8309_v35 = vld [vmem:[%s8149_s9 + $0x38] sm:$0xff]  ;;  %11513 = vst [vmem:[#allocation22_spill] sm:$0xff] %v8322_v48  ;;  %v320_v58 = vsel %vm11336_vm0, %v8306_v32, 0  ;;  %11516 = vst [vmem:[#allocation25_spill] sm:$0xff] %v8344_v10  ;;  %v11136_v62 = vand.u32 4294901760, %v8296_v21  ;;  %v8356_v13 = vsub.f32 %v8127_v16, %v458_v18 }
  0x27   : > { %11512 = vst [vmem:[#allocation21_spill] sm:$0xff] %v8309_v35  ;;  %11514 = vst [vmem:[#allocation23_spill] sm:$0xff] %v8328_v49  ;;  %v323_v6 = vsel %vm11336_vm0, %v8309_v35, 0  ;;  %v11139_v33 = vand.u32 4294901760, %v8299_v23  ;;  %v8351_v9 = vand.u32 4294901760, %v317_v42  ;;  %v11140_v12 = vand.u32 4294901760, %v8322_v48 }
  0x28   : > { %6146 = vmatprep.mubr.f32.mxu0 %v530_v38  ;;  %v850_v38 = vsub.f32 %v8256_v60, %v11127_v4  ;;  %11515 = vst [vmem:[#allocation24_spill] sm:$0xff] %v8333_v53  ;;  %11517 = vst [vmem:[#allocation26_spill] sm:$0xff] %v8347_v59  ;;  %v858_v4 = vand.u32 4294901760, %v857_v41  ;;  %v8362_v11 = vsub.f32 %v8130_v17, %v461_v19  ;;  %v8365_v56 = vand.u32 4294901760, %v320_v58  ;;  %s7940_s25 = scalar_lea.vmem %s7939_s23, 256 }
  0x29   : > { %11518 = vst [vmem:[#allocation27_spill] sm:$0xff] %v8356_v13  ;;  %v8367_v55 = vand.u32 4294901760, %v323_v6  ;;  %v326_v16 = vsel %vm11336_vm0, %v8344_v10, 0  ;;  %v329_v18 = vsel %vm11336_vm0, %v8347_v59, 0  ;;  %v8378_v17 = vsub.f32 %v314_v31, %v8337_v57  ;;  %11523 = vst [vmem:[#allocation32_spill] sm:$0xff] %v8393_v40 }
  0x2a   : > { %v851_v5 = vand.u32 4294901760, %v850_v38  ;;  %11519 = vst [vmem:[#allocation28_spill] sm:$0xff] %v8362_v11  ;;  %v8375_v38 = vsub.f32 %v311_v26, %v8335_v54  ;;  %v539_v41 = vsub.f32 %v8296_v21, %v11136_v62  ;;  %v8387_v47 = vsub.f32 %v8299_v23, %v11139_v33  ;;  %11524 = vst [vmem:[#allocation33_spill] sm:$0xff] %v8404_v29 }
  0x2b   : > { %11521 = vst [vmem:[#allocation30_spill] sm:$0xff] %v8378_v17  ;;  %v8390_v46 = vsub.f32 %v317_v42, %v8351_v9  ;;  %v864_v26 = vsub.f32 %v8322_v48, %v11140_v12  ;;  %v8398_v31 = vand.u32 4294901760, %v326_v16  ;;  %v8400_v39 = vand.u32 4294901760, %v329_v18  ;;  %11622 = vst [vmem:[#allocation92_spill] sm:$0xff] %v8803_v14 }
  0x2c   : > { %7085 = vmatpush3.bf16.xpose.msra.mxu0 %v8155_v22  ;;  %11520 = vst [vmem:[#allocation29_spill] sm:$0xff] %v8375_v38  ;;  %v7106_v28 = vpack.c.bf16 %v858_v4, %v851_v5  ;;  %v8407_v33 = vsub.f32 %v320_v58, %v8365_v56  ;;  %v8410_v42 = vsub.f32 %v323_v6, %v8367_v55  ;;  %v11527_v59 = vand.u32 4294901760, %v8333_v53  ;;  %v8477_v22 = vld [vmem:[%s8149_s9 + $0x70] sm:$0xff] }
  0x2d   : > { %7087 = vmatprep.subr.bf16.mxu0 %v8185_v34  ;;  %11522 = vst [vmem:[#allocation31_spill] sm:$0xff] %v8390_v46  ;;  %v332_v4 = vsel %vm11336_vm0, %v8393_v40, 0  ;;  %v540_v5 = vand.u32 4294901760, %v539_v41  ;;  %v550_v58 = vand.u32 4294901760, %v8387_v47  ;;  %v335_v19 = vsel %vm11336_vm0, %v8404_v29, 0  ;;  %v8434_v40 = vld [vmem:[%s8149_s9 + $0x60] sm:$0xff] }
  0x2e   : > { %11525 = vst [vmem:[#allocation34_spill] sm:$0xff] %v8407_v33  ;;  %11526 = vst [vmem:[#allocation35_spill] sm:$0xff] %v8410_v42  ;;  %v871_v62 = vsub.f32 %v8333_v53, %v11527_v59  ;;  %v865_v32 = vand.u32 4294901760, %v864_v26  ;;  %v8425_v12 = vsub.f32 %v326_v16, %v8398_v31  ;;  %v8428_v10 = vsub.f32 %v329_v18, %v8400_v39  ;;  %v8445_v18 = vld [vmem:[%s8149_s9 + $0x68] sm:$0xff] }
  0x2f   : > { %v11530_v59 = vand.u32 4294901760, %v8356_v13  ;;  %11531 = vst [vmem:[#allocation38_spill] sm:$0xff] %v8434_v40  ;;  %v11532_v26 = vand.u32 4294901760, %v8362_v11  ;;  %v8442_v6 = vand.u32 4294901760, %v332_v4  ;;  %11533 = vst [vmem:[#allocation39_spill] sm:$0xff] %v8445_v18  ;;  %v11535_v8 = vand.u32 4294901760, %v8378_v17 }
  0x30   : > { %11528 = vst [vmem:[#allocation36_spill] sm:$0xff] %v8425_v12  ;;  %11529 = vst [vmem:[#allocation37_spill] sm:$0xff] %v8428_v10  ;;  %v872_v20 = vand.u32 4294901760, %v871_v62  ;;  %v8453_v41 = vand.u32 4294901760, %v335_v19  ;;  %v11536_v7 = vand.u32 4294901760, %v8390_v46 }
  0x31   : > { %v878_v35 = vsub.f32 %v8356_v13, %v11530_v59  ;;  %v885_v16 = vsub.f32 %v8362_v11, %v11532_v26  ;;  %v11534_v59 = vand.u32 4294901760, %v8375_v38  ;;  %v569_v47 = vsub.f32 %v8378_v17, %v11535_v8  ;;  %11541 = vst [vmem:[#allocation42_spill] sm:$0xff] %v8477_v22 }
  0x32   : > { %v8458_v26 = vsub.f32 %v8390_v46, %v11536_v7  ;;  %v341_v7 = vsel %vm11336_vm0, %v8445_v18, 0  ;;  %v8491_v62 = vsub.f32 %v335_v19, %v8453_v41 }
  0x33   : > { %v559_v29 = vsub.f32 %v8375_v38, %v11534_v59  ;;  %v11539_v59 = vand.u32 4294901760, %v8162_v25  ;;  %v8495_v17 = vand.u32 4294901760, %v341_v7 }
  0x34   : > { %7089 = vmatpush3.bf16.xpose.msra.mxu0 %v8185_v34  ;;  %v879_v34 = vand.u32 4294901760, %v878_v35  ;;  %11545 = vst [vmem:[#allocation44_spill] sm:$0xff] %v8491_v62 }
  0x35   : > { %7091 = vmatprep.subr.bf16.mxu0 %v8210_v43  ;;  %v8470_v8 = vsub.f32 %v8162_v25, %v11539_v59  ;;  %v886_v25 = vand.u32 4294901760, %v885_v16  ;;  %v8488_v59 = vsub.f32 %v332_v4, %v8442_v6  ;;  %v560_v35 = vand.u32 4294901760, %v559_v29 }
  0x36   : > { %v570_v16 = vand.u32 4294901760, %v569_v47  ;;  %v580_v4 = vand.u32 4294901760, %v8458_v26  ;;  %v11546_v29 = vand.u32 4294901760, %v8425_v12  ;;  %v11557_v26 = vand.u32 4294901760, %v8194_v37 }
  0x37   : > { %11540 = vst [vmem:[#allocation41_spill] sm:$0xff] %v8470_v8  ;;  %11544 = vst [vmem:[#allocation43_spill] sm:$0xff] %v8488_v59  ;;  %v8516_v47 = vpack.c.bf16 %v886_v25, %v879_v34  ;;  %v8541_v25 = vld [vmem:[%s8149_s9 + $0x80] sm:$0xff] }
  0x38   : > { %11554 = vst [vmem:[#allocation49_spill] sm:$0xff] %v8541_v25 }
  0x3c   : > { %7093 = vmatpush3.bf16.xpose.msra.mxu0 %v8210_v43  ;;  %v7110_v43 = vpack.c.bf16 %v872_v20, %v865_v32  ;;  %v8505_v20 = vsub.f32 %v8425_v12, %v11546_v29  ;;  %v11547_v32 = vand.u32 4294901760, %v8428_v10  ;;  %v11555_v29 = vand.u32 4294901760, %v8191_v36  ;;  %v8634_v12 = vld [vmem:[%s8149_s9 + $0x98] sm:$0xff] }
  0x3d   : > { %7095 = vmatprep.subr.bf16.mxu0 %v8232_v50  ;;  %11576 = vst [vmem:[#allocation62_spill] sm:$0xff] %v8634_v12 }
  0x3e   : > { %v8510_v19 = vsub.f32 %v8428_v10, %v11547_v32  ;;  %v8527_v10 = vpack.c.bf16 %v8261_v61, %v8256_v60  ;;  %v11559_v61 = vand.u32 4294901760, %v8213_v44 }
  0x44   : > { %7097 = vmatpush3.bf16.xpose.msra.mxu0 %v8232_v50 }
  0x45   : > { %7099 = vmatprep.subr.bf16.mxu0 %v8268_v63 }
  0x4c   : > { %7101 = vmatpush3.bf16.xpose.msra.mxu0 %v8268_v63  ;;  %v11537_v63 = vand.u32 4294901760, %v8159_v24 }
  0x4d   : > { %7103 = vmatprep.subr.bf16.mxu0 %v8328_v49 }
  0x4e   : > { %v8465_v50 = vsub.f32 %v8159_v24, %v11537_v63  ;;  %v11543_v63 = vand.u32 4294901760, %v8410_v42 }
  0x50   : > { %11538 = vst [vmem:[#allocation40_spill] sm:$0xff] %v8465_v50  ;;  %v8485_v46 = vsub.f32 %v8410_v42, %v11543_v63  ;;  %v344_v63 = vsel %vm11336_vm0, %v8477_v22, 0  ;;  %v11552_v34 = vand.u32 4294901760, %v8465_v50 }
  0x51   : > { %v8523_v32 = vand.u32 4294901760, %v344_v63 }
  0x53   : > { %11550 = vst [vmem:[#allocation47_spill] sm:$0xff] %v8523_v32  ;;  %v8627_v60 = vsub.f32 %v344_v63, %v8523_v32  ;;  %v620_v63 = vand.u32 4294901760, %v8510_v19  ;;  %v359_v19 = vsel %vm11336_vm0, %v8634_v12, 0 }
  0x54   : > { %7105 = vmatpush3.bf16.xpose.msra.mxu0 %v8328_v49  ;;  %v338_v49 = vsel %vm11336_vm0, %v8434_v40, 0  ;;  %v11542_v40 = vand.u32 4294901760, %v8407_v33  ;;  %v8683_v21 = vand.u32 4294901760, %v359_v19 }
  0x55   : > { %7107 = vmatprep.subr.bf16.mxu0 %v7106_v28  ;;  %v8493_v18 = vand.u32 4294901760, %v338_v49  ;;  %11574 = vst [vmem:[#allocation60_spill] sm:$0xff] %v8627_v60 }
  0x56   : > { %v589_v24 = vsub.f32 %v8407_v33, %v11542_v40  ;;  %v8513_v40 = vld [vmem:[%s8149_s9 + $0x78] sm:$0xff]  ;;  %11589 = vst [vmem:[#allocation70_spill] sm:$0xff] %v8683_v21 }
  0x57   : > { %11548 = vst [vmem:[#allocation45_spill] sm:$0xff] %v8513_v40  ;;  %v8521_v22 = vsub.f32 %v338_v49, %v8493_v18  ;;  %v347_v49 = vsel %vm11336_vm0, %v8513_v40, 0  ;;  %v8560_v40 = vpack.c.bf16 %v8333_v53, %v8322_v48  ;;  %v8584_v53 = vld [vmem:[%s8149_s9 + $0x88] sm:$0xff] }
  0x58   : > { %v590_v33 = vand.u32 4294901760, %v589_v24  ;;  %11567 = vst [vmem:[#allocation56_spill] sm:$0xff] %v8584_v53 }
  0x59   : > { %11549 = vst [vmem:[#allocation46_spill] sm:$0xff] %v8521_v22 }
  0x5b   : > { %6147 = vmatmul.mubr.f32.vlgmr.msra.gmra.mrb[0].mxu0 %v540_v5  ;;  %v600_v5 = vand.u32 4294901760, %v8485_v46  ;;  %v892_v46 = vsub.f32 %v8465_v50, %v11552_v34  ;;  %v8551_v34 = vsub.f32 %v8194_v37, %v11557_v26  ;;  %v11565_v26 = vand.u32 4294901760, %v8238_v52 }
  0x5c   : > { %7109 = vmatpush3.bf16.xpose.msra.mxu0 %v7106_v28  ;;  %6149 = vmatprep.mubr.f32.mxu0 %v550_v58  ;;  %v8530_v28 = vsub.f32 %v341_v7, %v8495_v17  ;;  %v11553_v58 = vand.u32 4294901760, %v8470_v8  ;;  %v8546_v7 = vsub.f32 %v8191_v36, %v11555_v29  ;;  %v11563_v29 = vand.u32 4294901760, %v8235_v51 }
  0x5d   : > { %7111 = vmatprep.subr.bf16.mxu0 %v7110_v43  ;;  %11558 = vst [vmem:[#allocation51_spill] sm:$0xff] %v8551_v34  ;;  %v893_v48 = vand.u32 4294901760, %v892_v46  ;;  %v11578_v46 = vand.u32 4294901760, %v8491_v62 }
  0x5e   : > { %11551 = vst [vmem:[#allocation48_spill] sm:$0xff] %v8530_v28  ;;  %v899_v24 = vsub.f32 %v8470_v8, %v11553_v58  ;;  %11556 = vst [vmem:[#allocation50_spill] sm:$0xff] %v8546_v7  ;;  %v8556_v58 = vsub.f32 %v8213_v44, %v11559_v61  ;;  %v8570_v37 = vsub.f32 %v8235_v51, %v11563_v29  ;;  %v11569_v51 = vand.u32 4294901760, %v8274_v1 }
  0x5f   : > { %6150 = vmatmul.mubr.f32.gmra.mrb[2].mxu0 %v560_v35  ;;  %v11561_v35 = vand.u32 4294901760, %v8216_v45  ;;  %v8575_v44 = vsub.f32 %v8238_v52, %v11565_v26  ;;  %v8579_v61 = vpack.c.bf16 %v8362_v11, %v8356_v13  ;;  %v8598_v52 = vpack.c.bf16 %v8470_v8, %v8465_v50 }
  0x60   : > { %11560 = vst [vmem:[#allocation52_spill] sm:$0xff] %v8556_v58  ;;  %6152 = vmatprep.mubr.f32.mxu0 %v570_v16  ;;  %11564 = vst [vmem:[#allocation54_spill] sm:$0xff] %v8570_v37  ;;  %v350_v16 = vsel %vm11336_vm0, %v8541_v25, 0  ;;  %v8594_v29 = vsub.f32 %v8274_v1, %v11569_v51  ;;  %v8600_v26 = vand.u32 4294901760, %v347_v49  ;;  %v8603_v25 = vld [vmem:[%s8149_s9 + $0x90] sm:$0xff]  ;;  %v8607_v11 = vpack.c.bf16 %v8551_v34, %v8546_v7 }
  0x61   : > { %v8565_v36 = vsub.f32 %v8216_v45, %v11561_v35  ;;  %11566 = vst [vmem:[#allocation55_spill] sm:$0xff] %v8575_v44  ;;  %v11568_v45 = vand.u32 4294901760, %v8271_v0  ;;  %11571 = vst [vmem:[#allocation58_spill] sm:$0xff] %v8603_v25  ;;  %v8615_v1 = vpack.c.bf16 %v8575_v44, %v8570_v37  ;;  %v11572_v51 = vand.u32 4294901760, %v8488_v59 }
  0x62   : > { %11570 = vst [vmem:[#allocation57_spill] sm:$0xff] %v8600_v26  ;;  %v11580_v50 = vand.u32 4294901760, %v8521_v22 }
  0x63   : > { %11562 = vst [vmem:[#allocation53_spill] sm:$0xff] %v8565_v36  ;;  %v8589_v35 = vsub.f32 %v8271_v0, %v11568_v45  ;;  %v8611_v0 = vpack.c.bf16 %v8565_v36, %v8556_v58  ;;  %6153 = vmatmul.mubr.f32.gmra.mrb[4].mxu0 %v580_v4  ;;  %v610_v45 = vand.u32 4294901760, %v8505_v20  ;;  %v629_v8 = vsub.f32 %v8488_v59, %v11572_v51 }
  0x64   : > { %7113 = vmatpush3.bf16.xpose.msra.mxu0 %v7110_v43  ;;  %6155 = vmatprep.mubr.f32.mxu0 %v590_v33  ;;  %v8629_v4 = vand.u32 4294901760, %v350_v16  ;;  %v353_v20 = vsel %vm11336_vm0, %v8584_v53, 0  ;;  %v900_v51 = vand.u32 4294901760, %v899_v24  ;;  %v356_v33 = vsel %vm11336_vm0, %v8603_v25, 0  ;;  %v8642_v43 = vld [vmem:[%s8149_s9 + $0xa0] sm:$0xff] }
  0x65   : > { %v8624_v13 = vpack.c.bf16 %v8594_v29, %v8589_v35  ;;  %7115 = vmatprep.subr.bf16.mxu0 %v8516_v47  ;;  %11577 = vst [vmem:[#allocation63_spill] sm:$0xff] %v8642_v43  ;;  %v639_v53 = vsub.f32 %v8491_v62, %v11578_v46  ;;  %v8650_v24 = vsub.f32 %v347_v49, %v8600_v26  ;;  %v630_v59 = vand.u32 4294901760, %v629_v8  ;;  %v8671_v49 = vld [vmem:[%s8149_s9 + $0xb0] sm:$0xff] }
  0x66   : > { %11575 = vst [vmem:[#allocation61_spill] sm:$0xff] %v8629_v4  ;;  %v649_v25 = vsub.f32 %v8521_v22, %v11580_v50  ;;  %v8655_v38 = vand.u32 4294901760, %v353_v20  ;;  %v8661_v46 = vsub.f32 %v350_v16, %v8629_v4  ;;  %v8663_v42 = vand.u32 4294901760, %v356_v33  ;;  %11585 = vst [vmem:[#allocation69_spill] sm:$0xff] %v8671_v49 }
  0x67   : > { %11573 = vst [vmem:[#allocation59_spill] sm:$0xff] %v8624_v13  ;;  %11579 = vst [vmem:[#allocation64_spill] sm:$0xff] %v8650_v24  ;;  %6156 = vmatmul.mubr.f32.gmra.mrb[6].mxu0 %v600_v5  ;;  %v362_v8 = vsel %vm11336_vm0, %v8642_v43, 0  ;;  %v8668_v5 = vld [vmem:[%s8149_s9 + $0xa8] sm:$0xff]  ;;  %v7118_v50 = vpack.c.bf16 %v900_v51, %v893_v48  ;;  %v11586_v22 = vand.u32 4294901760, %v8546_v7  ;;  %v640_v16 = vand.u32 4294901760, %v639_v53 }
  0x68   : > { %11581 = vst [vmem:[#allocation65_spill] sm:$0xff] %v8655_v38  ;;  %6158 = vmatprep.mubr.f32.mxu0 %v610_v45  ;;  %11582 = vst [vmem:[#allocation66_spill] sm:$0xff] %v8661_v46  ;;  %v11587_v45 = vand.u32 4294901760, %v8551_v34  ;;  %v11588_v62 = vand.u32 4294901760, %v8530_v28  ;;  %v8686_v48 = vsub.f32 %v353_v20, %v8655_v38  ;;  %v365_v51 = vsel %vm11336_vm0, %v8668_v5, 0 }
  0x69   : > { %11583 = vst [vmem:[#allocation67_spill] sm:$0xff] %v8663_v42  ;;  %11584 = vst [vmem:[#allocation68_spill] sm:$0xff] %v8668_v5  ;;  %v906_v12 = vsub.f32 %v8546_v7, %v11586_v22  ;;  %v8688_v22 = vand.u32 4294901760, %v362_v8  ;;  %v368_v53 = vsel %vm11336_vm0, %v8671_v49, 0  ;;  %v8700_v43 = vsub.f32 %v356_v33, %v8663_v42 }
  0x6a   : > { %v913_v15 = vsub.f32 %v8551_v34, %v11587_v45  ;;  %v659_v23 = vsub.f32 %v8530_v28, %v11588_v62  ;;  %11590 = vst [vmem:[#allocation71_spill] sm:$0xff] %v8686_v48  ;;  %v650_v62 = vand.u32 4294901760, %v649_v25  ;;  %v11592_v45 = vand.u32 4294901760, %v8627_v60  ;;  %v8703_v34 = vld [vmem:[%s8149_s9 + $0xb8] sm:$0xff] }
  0x6b   : > { %6159 = vmatmul.mubr.f32.gmra.mrb[8].mxu0 %v620_v63  ;;  %11591 = vst [vmem:[#allocation72_spill] sm:$0xff] %v8688_v22  ;;  %11593 = vst [vmem:[#allocation73_spill] sm:$0xff] %v8700_v43  ;;  %v907_v5 = vand.u32 4294901760, %v906_v12  ;;  %v8711_v28 = vsub.f32 %v359_v19, %v8683_v21  ;;  %v8715_v33 = vand.u32 4294901760, %v368_v53  ;;  %v11599_v20 = vand.u32 4294901760, %v8650_v24 }
  0x6c   : > { %7117 = vmatpush3.bf16.xpose.msra.mxu0 %v8516_v47  ;;  %6161 = vmatprep.mubr.f32.mxu0 %v630_v59  ;;  %v669_v63 = vsub.f32 %v8627_v60, %v11592_v45  ;;  %11594 = vst [vmem:[#allocation74_spill] sm:$0xff] %v8703_v34  ;;  %v914_v7 = vand.u32 4294901760, %v913_v15  ;;  %v8708_v59 = vld [vmem:[%s8149_s9 + $0xc0] sm:$0xff]  ;;  %v660_v25 = vand.u32 4294901760, %v659_v23  ;;  %v8713_v45 = vand.u32 4294901760, %v365_v51 }
  0x6d   : > { %7119 = vmatprep.subr.bf16.mxu0 %v7118_v50  ;;  %11595 = vst [vmem:[#allocation75_spill] sm:$0xff] %v8708_v59  ;;  %11596 = vst [vmem:[#allocation76_spill] sm:$0xff] %v8711_v28  ;;  %v679_v15 = vsub.f32 %v8650_v24, %v11599_v20  ;;  %v8722_v47 = vsub.f32 %v362_v8, %v8688_v22  ;;  %v371_v23 = vsel %vm11336_vm0, %v8703_v34, 0  ;;  %v11601_v49 = vand.u32 4294901760, %v8661_v46 }
  0x6e   : > { %11597 = vst [vmem:[#allocation77_spill] sm:$0xff] %v8713_v45  ;;  %11598 = vst [vmem:[#allocation78_spill] sm:$0xff] %v8715_v33  ;;  %v670_v19 = vand.u32 4294901760, %v669_v63  ;;  %v374_v20 = vsel %vm11336_vm0, %v8708_v59, 0  ;;  %v7122_v24 = vpack.c.bf16 %v914_v7, %v907_v5  ;;  %v11602_v12 = vand.u32 4294901760, %v8556_v58  ;;  %v8751_v7 = vld [vmem:[%s8149_s9 + $0xd0] sm:$0xff] }
  0x6f   : > { %6162 = vmatmul.mubr.f32.gmra.mrb[10].mxu0 %v640_v16  ;;  %11600 = vst [vmem:[#allocation79_spill] sm:$0xff] %v8722_v47  ;;  %v689_v60 = vsub.f32 %v8661_v46, %v11601_v49  ;;  %v11603_v30 = vand.u32 4294901760, %v8565_v36  ;;  %v8743_v49 = vsub.f32 %v365_v51, %v8713_v45  ;;  %v8746_v16 = vsub.f32 %v368_v53, %v8715_v33 }
  0x70   : > { %6164 = vmatprep.mubr.f32.mxu0 %v650_v62  ;;  %v920_v8 = vsub.f32 %v8556_v58, %v11602_v12  ;;  %v8739_v62 = vld [vmem:[%s8149_s9 + $0xc8] sm:$0xff]  ;;  %v8748_v59 = vand.u32 4294901760, %v371_v23  ;;  %11608 = vst [vmem:[#allocation84_spill] sm:$0xff] %v8751_v7  ;;  %v680_v5 = vand.u32 4294901760, %v679_v15  ;;  %v11609_v12 = vand.u32 4294901760, %v8686_v48 }
  0x71   : > { %v927_v34 = vsub.f32 %v8565_v36, %v11603_v30  ;;  %11604 = vst [vmem:[#allocation80_spill] sm:$0xff] %v8739_v62  ;;  %11605 = vst [vmem:[#allocation81_spill] sm:$0xff] %v8743_v49  ;;  %v8757_v63 = vand.u32 4294901760, %v374_v20  ;;  %v690_v51 = vand.u32 4294901760, %v689_v60  ;;  %v11611_v53 = vand.u32 4294901760, %v8700_v43 }
  0x72   : > { %11606 = vst [vmem:[#allocation82_spill] sm:$0xff] %v8746_v16  ;;  %11607 = vst [vmem:[#allocation83_spill] sm:$0xff] %v8748_v59  ;;  %v699_v30 = vsub.f32 %v8686_v48, %v11609_v12  ;;  %v921_v46 = vand.u32 4294901760, %v920_v8  ;;  %v8769_v48 = vld [vmem:[%s8149_s9 + $0xd8] sm:$0xff]  ;;  %v11613_v60 = vand.u32 4294901760, %v8711_v28  ;;  %v8777_v15 = vsub.f32 %v371_v23, %v8748_v59 }
  0x73   : > { %6165 = vmatmul.mubr.f32.gmra.mrb[12].mxu0 %v660_v25  ;;  %11610 = vst [vmem:[#allocation85_spill] sm:$0xff] %v8757_v63  ;;  %v709_v58 = vsub.f32 %v8700_v43, %v11611_v53  ;;  %v377_v25 = vsel %vm11336_vm0, %v8739_v62, 0  ;;  %v928_v12 = vand.u32 4294901760, %v927_v34  ;;  %11612 = vst [vmem:[#allocation86_spill] sm:$0xff] %v8769_v48  ;;  %v8780_v34 = vld [vmem:[%s8149_s9 + $0xe0] sm:$0xff]  ;;  %v11616_v36 = vand.u32 4294901760, %v8722_v47 }
  0x74   : > { %7121 = vmatpush3.bf16.xpose.msra.mxu0 %v7118_v50  ;;  %6167 = vmatprep.mubr.f32.mxu0 %v670_v19  ;;  %v380_v50 = vsel %vm11336_vm0, %v8751_v7, 0  ;;  %v719_v19 = vsub.f32 %v8711_v28, %v11613_v60  ;;  %11614 = vst [vmem:[#allocation87_spill] sm:$0xff] %v8777_v15  ;;  %11615 = vst [vmem:[#allocation88_spill] sm:$0xff] %v8780_v34  ;;  %v700_v8 = vand.u32 4294901760, %v699_v30  ;;  %v8788_v60 = vand.u32 4294901760, %v377_v25 }
  0x75   : > { %7123 = vmatprep.subr.bf16.mxu0 %v7122_v24  ;;  %v729_v7 = vsub.f32 %v8722_v47, %v11616_v36  ;;  %v8786_v43 = vsub.f32 %v374_v20, %v8757_v63  ;;  %v710_v62 = vand.u32 4294901760, %v709_v58  ;;  %v11619_v53 = vand.u32 4294901760, %v8570_v37 }
  0x76   : > { %11618 = vst [vmem:[#allocation90_spill] sm:$0xff] %v8788_v60  ;;  %v8793_v28 = vand.u32 4294901760, %v380_v50  ;;  %v7126_v30 = vpack.c.bf16 %v928_v12, %v921_v46  ;;  %v11621_v36 = vand.u32 4294901760, %v8575_v44  ;;  %v386_v20 = vsel %vm11336_vm0, %v8780_v34, 0  ;;  %v8813_v12 = vld [vmem:[%s8149_s9 + $0xf0] sm:$0xff] }
  0x77   : > { %6168 = vmatmul.mubr.f32.gmra.mrb[14].mxu0 %v680_v5  ;;  %11617 = vst [vmem:[#allocation89_spill] sm:$0xff] %v8786_v43  ;;  %v934_v23 = vsub.f32 %v8570_v37, %v11619_v53  ;;  %v383_v5 = vsel %vm11336_vm0, %v8769_v48, 0  ;;  %v720_v58 = vand.u32 4294901760, %v719_v19  ;;  %v11624_v37 = vand.u32 4294901760, %v8746_v16  ;;  %11625 = vst [vmem:[#allocation93_spill] sm:$0xff] %v8813_v12 }
  0x78   : > { %6170 = vmatprep.mubr.f32.mxu0 %v690_v51  ;;  %11620 = vst [vmem:[#allocation91_spill] sm:$0xff] %v8793_v28  ;;  %v941_v47 = vsub.f32 %v8575_v44, %v11621_v36  ;;  %v11623_v51 = vand.u32 4294901760, %v8743_v49  ;;  %v730_v36 = vand.u32 4294901760, %v729_v7  ;;  %v8817_v48 = vsub.f32 %v377_v25, %v8788_v60 }
  0x79   : > { %v749_v13 = vsub.f32 %v8746_v16, %v11624_v37  ;;  %v8819_v19 = vand.u32 4294901760, %v383_v5  ;;  %v8822_v44 = vsub.f32 %v380_v50, %v8793_v28  ;;  %v8824_v37 = vand.u32 4294901760, %v386_v20 }
  0x7a   : > { %v739_v53 = vsub.f32 %v8743_v49, %v11623_v51  ;;  %v935_v51 = vand.u32 4294901760, %v934_v23  ;;  %v942_v7 = vand.u32 4294901760, %v941_v47  ;;  %v392_v46 = vsel %vm11336_vm0, %v8813_v12, 0 }
  0x7b   : > { %6171 = vmatmul.mubr.f32.gmra.mrb[16].mxu0 %v700_v8  ;;  %11626 = vst [vmem:[#allocation94_spill] sm:$0xff] %v8819_v19  ;;  %11627 = vst [vmem:[#allocation95_spill] sm:$0xff] %v8824_v37  ;;  %v389_v8 = vsel %vm11336_vm0, %v8803_v14, 0  ;;  %v750_v23 = vand.u32 4294901760, %v749_v13  ;;  %v11629_v50 = vand.u32 4294901760, %v8777_v15  ;;  %v11630_v14 = vand.u32 4294901760, %v8786_v43 }
  0x7c   : > { %7125 = vmatpush3.bf16.xpose.msra.mxu0 %v7122_v24  ;;  %6173 = vmatprep.mubr.f32.mxu0 %v710_v62  ;;  %v8833_v24 = vld [vmem:[%s8149_s9 + $0xf8] sm:$0xff]  ;;  %v740_v62 = vand.u32 4294901760, %v739_v53  ;;  %v8843_v25 = vsub.f32 %v383_v5, %v8819_v19  ;;  %v8845_v49 = vand.u32 4294901760, %v389_v8  ;;  %v8849_v13 = vsub.f32 %v386_v20, %v8824_v37 }
  0x7d   : > { %7127 = vmatprep.subr.bf16.mxu0 %v7126_v30  ;;  %11628 = vst [vmem:[#allocation96_spill] sm:$0xff] %v8833_v24  ;;  %v759_v16 = vsub.f32 %v8777_v15, %v11629_v50  ;;  %v769_v47 = vsub.f32 %v8786_v43, %v11630_v14  ;;  %v8851_v12 = vand.u32 4294901760, %v392_v46  ;;  %v7130_v50 = vpack.c.bf16 %v942_v7, %v935_v51 }
  0x7e   : > { %11631 = vst [vmem:[#allocation97_spill] sm:$0xff] %v8845_v49  ;;  %v11633_v14 = vand.u32 4294901760, %v8589_v35  ;;  %v11634_v5 = vand.u32 4294901760, %v8594_v29  ;;  %v11635_v53 = vand.u32 4294901760, %v8817_v48  ;;  %v8866_v37 = vsub.f32 %v389_v8, %v8845_v49 }
  0x7f   : > { %6174 = vmatmul.mubr.f32.gmra.mrb[18].mxu0 %v720_v58  ;;  %11632 = vst [vmem:[#allocation98_spill] sm:$0xff] %v8851_v12  ;;  %v395_v58 = vsel %vm11336_vm0, %v8833_v24, 0  ;;  %v770_v7 = vand.u32 4294901760, %v769_v47  ;;  %v11638_v24 = vand.u32 4294901760, %v8843_v25 }
  0x80   : > { %6176 = vmatprep.mubr.f32.mxu0 %v730_v36  ;;  %v948_v34 = vsub.f32 %v8589_v35, %v11633_v14  ;;  %v955_v43 = vsub.f32 %v8594_v29, %v11634_v5  ;;  %v760_v36 = vand.u32 4294901760, %v759_v16  ;;  %v779_v20 = vsub.f32 %v8817_v48, %v11635_v53 }
  0x81   : > { %v8868_v51 = vand.u32 4294901760, %v395_v58  ;;  %v11637_v14 = vand.u32 4294901760, %v8822_v44  ;;  %v11256_v16 = vand.u32 4294901760, %v8849_v13 }
  0x82   : > { %v949_v53 = vand.u32 4294901760, %v948_v34  ;;  %v956_v15 = vand.u32 4294901760, %v955_v43  ;;  %v780_v8 = vand.u32 4294901760, %v779_v20 }
  0x83   : > { %6177 = vmatmul.mubr.f32.gmra.mrb[20].mxu0 %v740_v62  ;;  %11636 = vst [vmem:[#allocation99_spill] sm:$0xff] %v8868_v51  ;;  %v789_v5 = vsub.f32 %v8822_v44, %v11637_v14  ;;  %v8875_v62 = vsub.f32 %v392_v46, %v8851_v12  ;;  %v8882_v47 = vsub.f32 %v395_v58, %v8868_v51 }
  0x84   : > { %7129 = vmatpush3.bf16.xpose.msra.mxu0 %v7126_v30  ;;  %6179 = vmatprep.mubr.f32.mxu0 %v750_v23  ;;  %v799_v30 = vsub.f32 %v8843_v25, %v11638_v24  ;;  %v11255_v23 = vand.u32 4294901760, %v8866_v37  ;;  %v809_v46 = vsub.f32 %v8849_v13, %v11256_v16  ;;  %v7134_v43 = vpack.c.bf16 %v956_v15, %v949_v53  ;;  %v11663_v16 = vld [vmem:[#allocation71_spill] sm:$0xff] }
  0x85   : > { %7131 = vmatprep.subr.bf16.mxu0 %v7130_v50  ;;  %v790_v14 = vand.u32 4294901760, %v789_v5  ;;  %v11254_v34 = vand.u32 4294901760, %v8875_v62  ;;  %v11253_v20 = vand.u32 4294901760, %v8882_v47 }
  0x86   : > { %v819_v24 = vsub.f32 %v8866_v37, %v11255_v23  ;;  %v810_v58 = vand.u32 4294901760, %v809_v46  ;;  %v11649_v46 = vld [vmem:[#allocation34_spill] sm:$0xff] }
  0x87   : > { %6180 = vmatmul.mubr.f32.gmra.mrb[22].mxu0 %v760_v36  ;;  %v800_v36 = vand.u32 4294901760, %v799_v30  ;;  %v839_v15 = vsub.f32 %v8882_v47, %v11253_v20  ;;  %v11647_v30 = vld [vmem:[#allocation30_spill] sm:$0xff] }
  0x88   : > { %6182 = vmatprep.mubr.f32.mxu0 %v770_v7  ;;  %v829_v7 = vsub.f32 %v8875_v62, %v11254_v34  ;;  %v820_v5 = vand.u32 4294901760, %v819_v24  ;;  %v11652_v24 = vld [vmem:[#allocation36_spill] sm:$0xff]  ;;  %v11660_v20 = vld [vmem:[#allocation10_spill] sm:$0xff] }
  0x89   : > { %v11661_v34 = vld [vmem:[#allocation64_spill] sm:$0xff]  ;;  %v11662_v23 = vld [vmem:[#allocation66_spill] sm:$0xff] }
  0x8a   : > { %v830_v53 = vand.u32 4294901760, %v829_v7  ;;  %v11654_v7 = vld [vmem:[#allocation43_spill] sm:$0xff] }
  0x8b   : > { %6183 = vmatmul.mubr.f32.gmra.mrb[24].mxu0 %v780_v8  ;;  %v840_v8 = vand.u32 4294901760, %v839_v15  ;;  %v11656_v15 = vld [vmem:[#allocation44_spill] sm:$0xff] }
  0x8c   : > { %7133 = vmatpush3.bf16.xpose.msra.mxu0 %v7130_v50  ;;  %6185 = vmatprep.mubr.f32.mxu0 %v790_v14  ;;  %v11646_v50 = vld [vmem:[#allocation29_spill] sm:$0xff]  ;;  %v11648_v14 = vld [vmem:[#allocation31_spill] sm:$0xff] }
  0x8d   : > { %7135 = vmatprep.subr.bf16.mxu0 %v7134_v43 }
  0x8f   : > { %6186 = vmatmul.mubr.f32.gmra.mrb[26].mxu0 %v800_v36  ;;  %v11651_v36 = vld [vmem:[#allocation35_spill] sm:$0xff] }
  0x90   : > { %6188 = vmatprep.mubr.f32.mxu0 %v810_v58  ;;  %v11653_v58 = vld [vmem:[#allocation37_spill] sm:$0xff] }
  0x93   : > { %6189 = vmatmul.mubr.f32.gmra.mrb[28].mxu0 %v820_v5  ;;  %v11655_v5 = vld [vmem:[#allocation9_spill] sm:$0xff] }
  0x94   : > { %7137 = vmatpush3.bf16.xpose.msra.mxu0 %v7134_v43  ;;  %6191 = vmatprep.mubr.f32.mxu0 %v830_v53  ;;  %v11650_v43 = vld [vmem:[#allocation7_spill] sm:$0xff]  ;;  %v11657_v53 = vld [vmem:[#allocation46_spill] sm:$0xff] }
  0x95   : > { %7139 = vmatprep.subr.bf16.mxu0 %v8527_v10 }
  0x97   : > { %6192 = vmatmul.mubr.f32.gmra.mrb[30].mxu0 %v840_v8  ;;  %v11658_v8 = vld [vmem:[#allocation48_spill] sm:$0xff] }
  0x98   : > { %6226 = vmatprep.mubr.f32.mxu0 %v8165_v27 }
  0x9b   : > { %6227 = vmatmul.mubr.f32.vlgmr.msra.gmra.mrb[0].mxu0 %v8276_v2 }
  0x9c   : > { %7141 = vmatpush3.bf16.xpose.msra.mxu0 %v8527_v10  ;;  %6229 = vmatprep.mubr.f32.mxu0 %v8278_v3  ;;  %v11640_v10 = vld [vmem:[#allocation95_spill] sm:$0xff] }
  0x9d   : > { %7143 = vmatprep.subr.bf16.mxu0 %v8560_v40 }
  0x9f   : > { %6230 = vmatmul.mubr.f32.gmra.mrb[2].mxu0 %v8335_v54 }
  0xa0   : > { %6232 = vmatprep.mubr.f32.mxu0 %v8337_v57 }
  0xa3   : > { %6233 = vmatmul.mubr.f32.gmra.mrb[4].mxu0 %v8351_v9 }
  0xa4   : > { %7145 = vmatpush3.bf16.xpose.msra.mxu0 %v8560_v40  ;;  %6235 = vmatprep.mubr.f32.mxu0 %v8365_v56  ;;  %v11641_v40 = vld [vmem:[#allocation5_spill] sm:$0xff] }
  0xa5   : > { %7147 = vmatprep.subr.bf16.mxu0 %v8579_v61 }
  0xa7   : > { %6236 = vmatmul.mubr.f32.gmra.mrb[6].mxu0 %v8367_v55 }
  0xa8   : > { %6238 = vmatprep.mubr.f32.mxu0 %v8398_v31 }
  0xab   : > { %6239 = vmatmul.mubr.f32.gmra.mrb[8].mxu0 %v8400_v39 }
  0xac   : > { %7149 = vmatpush3.bf16.xpose.msra.mxu0 %v8579_v61  ;;  %6241 = vmatprep.mubr.f32.mxu0 %v8442_v6  ;;  %v11642_v61 = vld [vmem:[#allocation8_spill] sm:$0xff] }
  0xad   : > { %7151 = vmatprep.subr.bf16.mxu0 %v8598_v52 }
  0xaf   : > { %6242 = vmatmul.mubr.f32.gmra.mrb[10].mxu0 %v8453_v41 }
  0xb0   : > { %6244 = vmatprep.mubr.f32.mxu0 %v8493_v18 }
  0xb3   : > { %6245 = vmatmul.mubr.f32.gmra.mrb[12].mxu0 %v8495_v17 }
  0xb4   : > { %7153 = vmatpush3.bf16.xpose.msra.mxu0 %v8598_v52  ;;  %6247 = vmatprep.mubr.f32.mxu0 %v8523_v32  ;;  %v11643_v52 = vld [vmem:[#allocation18_spill] sm:$0xff] }
  0xb5   : > { %7155 = vmatprep.subr.bf16.mxu0 %v8607_v11 }
  0xb7   : > { %6248 = vmatmul.mubr.f32.gmra.mrb[14].mxu0 %v8600_v26  ;;  %v11681_v26 = vld [vmem:[#allocation24_spill] sm:$0xff] }
  0xb8   : > { %6250 = vmatprep.mubr.f32.mxu0 %v8629_v4 }
  0xbb   : > { %6251 = vmatmul.mubr.f32.gmra.mrb[16].mxu0 %v8655_v38  ;;  %v11679_v38 = vld [vmem:[#allocation22_spill] sm:$0xff] }
  0xbc   : > { %7157 = vmatpush3.bf16.xpose.msra.mxu0 %v8607_v11  ;;  %6253 = vmatprep.mubr.f32.mxu0 %v8663_v42  ;;  %v11639_v11 = vld [vmem:[#allocation59_spill] sm:$0xff]  ;;  %v11680_v4 = vand.u32 4294901760, %v11679_v38  ;;  %v11689_v38 = vld [vmem:[#allocation28_spill] sm:$0xff] }
  0xbd   : > { %7159 = vmatprep.subr.bf16.mxu0 %v8611_v0  ;;  %v11690_v32 = vand.u32 4294901760, %v11689_v38 }
  0xbf   : > { %6254 = vmatmul.mubr.f32.gmra.mrb[18].mxu0 %v8683_v21  ;;  %v11676_v21 = vld [vmem:[#allocation13_spill] sm:$0xff] }
  0xc0   : > { %6256 = vmatprep.mubr.f32.mxu0 %v8688_v22 }
  0xc3   : > { %6257 = vmatmul.mubr.f32.gmra.mrb[20].mxu0 %v8713_v45  ;;  %v11674_v45 = vld [vmem:[#allocation12_spill] sm:$0xff] }
  0xc4   : > { %7161 = vmatpush3.bf16.xpose.msra.mxu0 %v8611_v0  ;;  %6259 = vmatprep.mubr.f32.mxu0 %v8715_v33  ;;  %v11644_v0 = vld [vmem:[#allocation19_spill] sm:$0xff]  ;;  %v11675_v22 = vand.u32 4294901760, %v11674_v45 }
  0xc5   : > { %7163 = vmatprep.subr.bf16.mxu0 %v8615_v1  ;;  %v11673_v33 = vld [vmem:[#allocation23_spill] sm:$0xff] }
  0xc7   : > { %6260 = vmatmul.mubr.f32.gmra.mrb[22].mxu0 %v8748_v59  ;;  %v11672_v59 = vld [vmem:[#allocation89_spill] sm:$0xff] }
  0xc8   : > { %6262 = vmatprep.mubr.f32.mxu0 %v8757_v63  ;;  %v11671_v63 = vld [vmem:[#allocation87_spill] sm:$0xff] }
  0xcb   : > { %6263 = vmatmul.mubr.f32.gmra.mrb[24].mxu0 %v8788_v60  ;;  %v11670_v60 = vld [vmem:[#allocation14_spill] sm:$0xff] }
  0xcc   : > { %7165 = vmatpush3.bf16.xpose.msra.mxu0 %v8615_v1  ;;  %6265 = vmatprep.mubr.f32.mxu0 %v8793_v28  ;;  %v11645_v1 = vld [vmem:[#allocation6_spill] sm:$0xff] }
  0xcd   : > { %7167 = vmatprep.subr.bf16.mxu0 %v11639_v11  ;;  %v11669_v28 = vld [vmem:[#allocation82_spill] sm:$0xff] }
  0xcf   : > { %6266 = vmatmul.mubr.f32.gmra.mrb[26].mxu0 %v8819_v19  ;;  %v11668_v19 = vld [vmem:[#allocation81_spill] sm:$0xff] }
  0xd0   : > { %6268 = vmatprep.mubr.f32.mxu0 %v11640_v10  ;;  %v11667_v10 = vld [vmem:[#allocation79_spill] sm:$0xff] }
  0xd3   : > { %6269 = vmatmul.mubr.f32.gmra.mrb[28].mxu0 %v8845_v49  ;;  %v11666_v49 = vld [vmem:[#allocation76_spill] sm:$0xff] }
  0xd4   : > { %7169 = vmatpush3.bf16.xpose.msra.mxu0 %v11639_v11  ;;  %6271 = vmatprep.mubr.f32.mxu0 %v8851_v12  ;;  %v11659_v11 = vld [vmem:[#allocation60_spill] sm:$0xff]  ;;  %v11665_v12 = vld [vmem:[#allocation11_spill] sm:$0xff] }
  0xd5   : > { %7171 = vmatprep.subr.bf16.mxu0 %v11641_v40 }
  0xd7   : > { %6272 = vmatmul.mubr.f32.gmra.mrb[30].mxu0 %v8868_v51  ;;  %v11664_v51 = vld [vmem:[#allocation73_spill] sm:$0xff] }
  0xd8   : > { %6306 = vmatprep.mubr.f32.mxu0 %v11642_v61 }
  0xdb   : > { %6307 = vmatmul.mubr.f32.vlgmr.msra.gmra.mrb[0].mxu0 %v11643_v52 }
  0xdc   : > { %7173 = vmatpush3.bf16.xpose.msra.mxu0 %v11641_v40  ;;  %6309 = vmatprep.mubr.f32.mxu0 %v11644_v0 }
  0xdd   : > { %7175 = vmatprep.subr.bf16.mxu0 %v11645_v1 }
  0xdf   : > { %6310 = vmatmul.mubr.f32.gmra.mrb[2].mxu0 %v11646_v50 }
  0xe0   : > { %6312 = vmatprep.mubr.f32.mxu0 %v11647_v30 }
  0xe3   : > { %6313 = vmatmul.mubr.f32.gmra.mrb[4].mxu0 %v11648_v14 }
  0xe4   : > { %7177 = vmatpush3.bf16.xpose.msra.mxu0 %v11645_v1  ;;  %6315 = vmatprep.mubr.f32.mxu0 %v11649_v46 }
  0xe5   : > { %7179 = vmatprep.subr.bf16.mxu0 %v11650_v43 }
  0xe7   : > { %6316 = vmatmul.mubr.f32.gmra.mrb[6].mxu0 %v11651_v36 }
  0xe8   : > { %6318 = vmatprep.mubr.f32.mxu0 %v11652_v24 }
  0xeb   : > { %6319 = vmatmul.mubr.f32.gmra.mrb[8].mxu0 %v11653_v58 }
  0xec   : > { %7181 = vmatpush3.bf16.xpose.msra.mxu0 %v11650_v43  ;;  %6321 = vmatprep.mubr.f32.mxu0 %v11654_v7 }
  0xed   : > { %7183 = vmatprep.subr.bf16.mxu0 %v11655_v5 }
  0xef   : > { %6322 = vmatmul.mubr.f32.gmra.mrb[10].mxu0 %v11656_v15 }
  0xf0   : > { %6324 = vmatprep.mubr.f32.mxu0 %v11657_v53 }
  0xf3   : > { %6325 = vmatmul.mubr.f32.gmra.mrb[12].mxu0 %v11658_v8 }
  0xf4   : > { %7185 = vmatpush3.bf16.xpose.msra.mxu0 %v11655_v5  ;;  %6327 = vmatprep.mubr.f32.mxu0 %v11659_v11 }
  0xf5   : > { %7187 = vmatprep.subr.bf16.mxu0 %v11660_v20 }
  0xf7   : > { %6328 = vmatmul.mubr.f32.gmra.mrb[14].mxu0 %v11661_v34 }
  0xf8   : > { %6330 = vmatprep.mubr.f32.mxu0 %v11662_v23 }
  0xfb   : > { %6331 = vmatmul.mubr.f32.gmra.mrb[16].mxu0 %v11663_v16 }
  0xfc   : > { %7189 = vmatpush3.bf16.xpose.msra.mxu0 %v11660_v20  ;;  %6333 = vmatprep.mubr.f32.mxu0 %v11664_v51  ;;  %v11682_v20 = vand.u32 4294901760, %v11681_v26 }
  0xfd   : > { %7191 = vmatprep.subr.bf16.mxu0 %v11665_v12 }
  0xfe   : > { %v7206_v45 = vpack.c.bf16 %v11682_v20, %v11680_v4  ;;  %v11691_v4 = vand.u32 4294901760, %v11648_v14  ;;  %v11693_v20 = vand.u32 4294901760, %v11651_v36  ;;  %v11700_v14 = vand.u32 4294901760, %v11654_v7 }
  0xff   : > { %6334 = vmatmul.mubr.f32.gmra.mrb[18].mxu0 %v11666_v49  ;;  %v11702_v36 = vand.u32 4294901760, %v11657_v53  ;;  %v11709_v7 = vand.u32 4294901760, %v11661_v34  ;;  %v11711_v53 = vld [vmem:[#allocation52_spill] sm:$0xff]  ;;  %v11718_v34 = vand.u32 4294901760, %v11667_v10 }
 0x100   : > { %6336 = vmatprep.mubr.f32.mxu0 %v11667_v10  ;;  %v11712_v38 = vand.u32 4294901760, %v11711_v53  ;;  %v11727_v10 = vand.u32 4294901760, %v8589_v35  ;;  %v11733_v35 = vand.u32 4294901760, %v8866_v37  ;;  %v11739_v53 = vld [vmem:[#allocation21_spill] sm:$0xff] }
 0x103   : > { %6337 = vmatmul.mubr.f32.gmra.mrb[20].mxu0 %v11668_v19 }
 0x104   : > { %7193 = vmatpush3.bf16.xpose.msra.mxu0 %v11665_v12  ;;  %6339 = vmatprep.mubr.f32.mxu0 %v11669_v28  ;;  %v11677_v12 = vand.u32 4294901760, %v11676_v21  ;;  %v11683_v21 = vand.u32 4294901760, %v11643_v52  ;;  %v11694_v52 = vand.u32 4294901760, %v11652_v24  ;;  %v11703_v24 = vld [vmem:[#allocation50_spill] sm:$0xff] }
 0x105   : > { %7195 = vmatprep.subr.bf16.mxu0 %v11670_v60 }
 0x106   : > { %v7202_v42 = vpack.c.bf16 %v11677_v12, %v11675_v22  ;;  %v11684_v22 = vand.u32 4294901760, %v11644_v0  ;;  %v11685_v12 = vand.u32 4294901760, %v11646_v50  ;;  %v11697_v50 = vld [vmem:[#allocation41_spill] sm:$0xff] }
 0x107   : > { %6340 = vmatmul.mubr.f32.gmra.mrb[22].mxu0 %v11671_v63 }
 0x108   : > { %6342 = vmatprep.mubr.f32.mxu0 %v11672_v59 }
 0x10b   : > { %6343 = vmatmul.mubr.f32.gmra.mrb[24].mxu0 %v8817_v48 }
 0x10c   : > { %7197 = vmatpush3.bf16.xpose.msra.mxu0 %v11670_v60  ;;  %6345 = vmatprep.mubr.f32.mxu0 %v8822_v44  ;;  %v11678_v60 = vand.u32 4294901760, %v11642_v61 }
 0x10d   : > { %7199 = vmatprep.subr.bf16.mxu0 %v11673_v33 }
 0x10f   : > { %6346 = vmatmul.mubr.f32.gmra.mrb[26].mxu0 %v8843_v25 }
 0x110   : > { %6348 = vmatprep.mubr.f32.mxu0 %v8849_v13 }
 0x113   : > { %6349 = vmatmul.mubr.f32.gmra.mrb[28].mxu0 %v8866_v37 }
 0x114   : > { %7201 = vmatpush3.bf16.xpose.msra.mxu0 %v11673_v33  ;;  %6351 = vmatprep.mubr.f32.mxu0 %v8875_v62  ;;  %v11686_v33 = vand.u32 4294901760, %v11647_v30  ;;  %v11698_v30 = vand.u32 4294901760, %v11697_v50 }
 0x115   : > { %7203 = vmatprep.subr.bf16.mxu0 %v7202_v42 }
 0x117   : > { %6352 = vmatmul.mubr.f32.gmra.mrb[30].mxu0 %v8882_v47 }
 0x118   : > { %6386 = vmatprep.mubr.f32.mxu0 %v11678_v60  ;;  %v11687_v60 = vld [vmem:[#allocation27_spill] sm:$0xff] }
 0x119   : > { %v11688_v61 = vand.u32 4294901760, %v11687_v60 }
 0x11b   : > { %6387 = vmatmul.mubr.f32.vlgmr.msra.gmra.mrb[0].mxu0 %v11683_v21  ;;  %v7210_v26 = vpack.c.bf16 %v11690_v32, %v11688_v61  ;;  %v11699_v32 = vand.u32 4294901760, %v11653_v58  ;;  %v11707_v61 = vand.u32 4294901760, %v11658_v8  ;;  %v11708_v58 = vand.u32 4294901760, %v11659_v11 }
 0x11c   : > { %7205 = vmatpush3.bf16.xpose.msra.mxu0 %v7202_v42  ;;  %6389 = vmatprep.mubr.f32.mxu0 %v11684_v22  ;;  %v11692_v42 = vand.u32 4294901760, %v11649_v46  ;;  %v11701_v46 = vand.u32 4294901760, %v11656_v15  ;;  %v11705_v22 = vld [vmem:[#allocation51_spill] sm:$0xff]  ;;  %v11710_v15 = vand.u32 4294901760, %v11662_v23  ;;  %v11716_v8 = vand.u32 4294901760, %v11664_v51  ;;  %v11719_v23 = vld [vmem:[#allocation54_spill] sm:$0xff] }
 0x11d   : > { %7207 = vmatprep.subr.bf16.mxu0 %v7206_v45  ;;  %v11717_v11 = vand.u32 4294901760, %v11666_v49  ;;  %v11725_v49 = vand.u32 4294901760, %v11671_v63  ;;  %v11726_v51 = vand.u32 4294901760, %v11672_v59  ;;  %v11731_v63 = vand.u32 4294901760, %v8843_v25 }
 0x11e   : > { %v11732_v59 = vand.u32 4294901760, %v8849_v13  ;;  %v11736_v13 = vld [vmem:[#allocation15_spill] sm:$0xff] }
 0x11f   : > { %6390 = vmatmul.mubr.f32.gmra.mrb[2].mxu0 %v11685_v12  ;;  %v11706_v12 = vand.u32 4294901760, %v11705_v22 }
 0x120   : > { %6392 = vmatprep.mubr.f32.mxu0 %v11686_v33  ;;  %v11695_v33 = vld [vmem:[#allocation40_spill] sm:$0xff] }
 0x121   : > { %v11696_v0 = vand.u32 4294901760, %v11695_v33  ;;  %v11721_v33 = vld [vmem:[#allocation55_spill] sm:$0xff] }
 0x123   : > { %6393 = vmatmul.mubr.f32.gmra.mrb[4].mxu0 %v11691_v4  ;;  %v7214_v21 = vpack.c.bf16 %v11698_v30, %v11696_v0  ;;  %v11722_v0 = vand.u32 4294901760, %v11721_v33  ;;  %v11723_v30 = vand.u32 4294901760, %v11668_v19  ;;  %v11729_v19 = vand.u32 4294901760, %v8817_v48  ;;  %v11743_v33 = vld [vmem:[#allocation33_spill] sm:$0xff] }
 0x124   : > { %7209 = vmatpush3.bf16.xpose.msra.mxu0 %v7206_v45  ;;  %6395 = vmatprep.mubr.f32.mxu0 %v11692_v42  ;;  %v11704_v45 = vand.u32 4294901760, %v11703_v24  ;;  %v11735_v48 = vand.u32 4294901760, %v8882_v47 }
 0x125   : > { %7211 = vmatprep.subr.bf16.mxu0 %v7210_v26 }
 0x126   : > { %v7218_v60 = vpack.c.bf16 %v11706_v12, %v11704_v45  ;;  %v2422_v45 = vmul.f32 %v11736_v13, %v11736_v13  ;;  %v11737_v12 = vld [vmem:[#allocation17_spill] sm:$0xff] }
 0x127   : > { %6396 = vmatmul.mubr.f32.gmra.mrb[6].mxu0 %v11693_v20  ;;  %v11715_v20 = vand.u32 4294901760, %v11663_v16  ;;  %v11724_v16 = vand.u32 4294901760, %v11669_v28  ;;  %v11730_v28 = vand.u32 4294901760, %v8822_v44  ;;  %v7883_v44 = vld [vmem:[%s8149_s9] sm:$0xff] }
 0x128   : > { %6398 = vmatprep.mubr.f32.mxu0 %v11694_v52  ;;  %v11720_v52 = vand.u32 4294901760, %v11719_v23  ;;  %v2460_v22 = vsel %vm11336_vm0, %v2422_v45, 0.0 }
 0x12a   : > { %v7226_v50 = vpack.c.bf16 %v11722_v0, %v11720_v52  ;;  %v2430_v0 = vmul.f32 %v11743_v33, %v11743_v33 }
 0x12b   : > { %6399 = vmatmul.mubr.f32.gmra.mrb[8].mxu0 %v11699_v32 }
 0x12c   : > { %7213 = vmatpush3.bf16.xpose.msra.mxu0 %v7210_v26  ;;  %6401 = vmatprep.mubr.f32.mxu0 %v11700_v14  ;;  %v11713_v26 = vld [vmem:[#allocation53_spill] sm:$0xff]  ;;  %v2419_v14 = vmul.f32 %v7883_v44, %v7883_v44 }
 0x12d   : > { %7215 = vmatprep.subr.bf16.mxu0 %v7214_v21  ;;  %v11714_v4 = vand.u32 4294901760, %v11713_v26  ;;  %v11740_v26 = vld [vmem:[#allocation20_spill] sm:$0xff] }
 0x12e   : > { %v2451_v37 = vsel %vm11336_vm0, %v2419_v14, 0.0  ;;  %v11750_v14 = vld [vmem:[#allocation49_spill] sm:$0xff] }
 0x12f   : > { %6402 = vmatmul.mubr.f32.gmra.mrb[10].mxu0 %v11701_v46  ;;  %v7222_v42 = vpack.c.bf16 %v11714_v4, %v11712_v38  ;;  %v7884_v46 = vld [vmem:[%s8149_s9 + $0x10] sm:$0xff]  ;;  %2452 = vadd.xlane.f32.xlu0 %v2451_v37  ;;  %v2426_v38 = vmul.f32 %v11739_v53, %v11739_v53  ;;  %v2425_v4 = vmul.f32 %v11740_v26, %v11740_v26  ;;  %v11754_v37 = vld [vmem:[#allocation62_spill] sm:$0xff]  ;;  %v11761_v26 = vld [vmem:[#allocation11_spill] sm:$0xff] }
 0x130   : > { %6404 = vmatprep.mubr.f32.mxu0 %v11702_v36  ;;  %v2421_v25 = vmul.f32 %v7884_v46, %v7884_v46  ;;  %v7885_v36 = vld [vmem:[%s8149_s9 + $0x8] sm:$0xff]  ;;  %v2435_v46 = vmul.f32 %v11750_v14, %v11750_v14 }
 0x131   : > { %v2420_v24 = vmul.f32 %v7885_v36, %v7885_v36  ;;  %v11752_v36 = vld [vmem:[#allocation10_spill] sm:$0xff] }
 0x132   : > { %v2499_v45 = vsel %vm11336_vm0, %v2435_v46, 0.0  ;;  %v11777_v46 = vld [vmem:[#allocation88_spill] sm:$0xff] }
 0x133   : > { %6405 = vmatmul.mubr.f32.gmra.mrb[12].mxu0 %v11707_v61  ;;  %v2454_v47 = vsel %vm11336_vm0, %v2420_v24, 0.0  ;;  %v11738_v61 = vld [vmem:[#allocation16_spill] sm:$0xff]  ;;  %v11753_v24 = vld [vmem:[#allocation57_spill] sm:$0xff] }
 0x134   : > { %7217 = vmatpush3.bf16.xpose.msra.mxu0 %v7214_v21  ;;  %6407 = vmatprep.mubr.f32.mxu0 %v11708_v58  ;;  %v11728_v21 = vand.u32 4294901760, %v8594_v29  ;;  %v11734_v29 = vand.u32 4294901760, %v8875_v62  ;;  %v2457_v62 = vsel %vm11336_vm0, %v2421_v25, 0.0  ;;  %v2423_v58 = vmul.f32 %v11738_v61, %v11738_v61  ;;  %v11751_v25 = vld [vmem:[#allocation47_spill] sm:$0xff] }
 0x135   : > { %7219 = vmatprep.subr.bf16.mxu0 %v7218_v60  ;;  %2458 = vadd.xlane.f32.xlu1 %v2457_v62  ;;  %v2438_v62 = vmul.f32 %v11754_v37, %v11754_v37  ;;  %v11780_v37 = vld [vmem:[#allocation94_spill] sm:$0xff] }
 0x136   : > { %v7230_v32 = vpack.c.bf16 %v11728_v21, %v11727_v10  ;;  %2455 = vadd.xlane.f32.xlu0 %v2454_v47  ;;  %v11746_v10 = vld [vmem:[#allocation38_spill] sm:$0xff] }
 0x137   : > { %6408 = vmatmul.mubr.f32.gmra.mrb[14].mxu0 %v11709_v7  ;;  %v2431_v21 = vmul.f32 %v11746_v10, %v11746_v10  ;;  %v11755_v47 = vld [vmem:[#allocation58_spill] sm:$0xff]  ;;  %v11771_v10 = vld [vmem:[#allocation83_spill] sm:$0xff] }
 0x138   : > { %6410 = vmatprep.mubr.f32.mxu0 %v11710_v15  ;;  %v2463_v15 = vsel %vm11336_vm0, %v2423_v58, 0.0  ;;  %v11758_v58 = vld [vmem:[#allocation68_spill] sm:$0xff] }
 0x139   : > { %2461 = vadd.xlane.f32.xlu1 %v2460_v22  ;;  %v2437_v22 = vmul.f32 %v11755_v47, %v11755_v47 }
 0x13a   : > { %2464 = vadd.xlane.f32.xlu0 %v2463_v15  ;;  %v11759_v15 = vld [vmem:[#allocation63_spill] sm:$0xff] }
 0x13b   : > { %6411 = vmatmul.mubr.f32.gmra.mrb[16].mxu0 %v11715_v20  ;;  %v11741_v20 = vld [vmem:[#allocation26_spill] sm:$0xff]  ;;  %v2505_v61 = vsel %vm11336_vm0, %v2437_v22, 0.0  ;;  %v2439_v53 = vmul.f32 %v11759_v15, %v11759_v15  ;;  %v11781_v22 = vld [vmem:[#allocation96_spill] sm:$0xff]  ;;  %v11784_v15 = vld [vmem:[#allocation97_spill] sm:$0xff] }
 0x13c   : > { %7221 = vmatpush3.bf16.xpose.msra.mxu0 %v7218_v60  ;;  %6413 = vmatprep.mubr.f32.mxu0 %v11716_v8  ;;  %v2424_v60 = vmul.f32 %v11737_v12, %v11737_v12  ;;  %v2428_v8 = vmul.f32 %v11741_v20, %v11741_v20  ;;  %v11756_v12 = vld [vmem:[#allocation61_spill] sm:$0xff]  ;;  %v11763_v20 = vld [vmem:[#allocation74_spill] sm:$0xff] }
 0x13d   : > { %7223 = vmatprep.subr.bf16.mxu0 %v7222_v42 }
 0x13e   : > { %v2466_v7 = vsel %vm11336_vm0, %v2424_v60, 0.0  ;;  %v2478_v23 = vsel %vm11336_vm0, %v2428_v8, 0.0  ;;  %v2508_v60 = vsel %vm11336_vm0, %v2438_v62, 0.0  ;;  %v2442_v8 = vmul.f32 %v11763_v20, %v11763_v20 }
 0x13f   : > { %6414 = vmatmul.mubr.f32.gmra.mrb[18].mxu0 %v11717_v11  ;;  %2467 = vadd.xlane.f32.xlu1 %v2466_v7  ;;  %v11742_v11 = vld [vmem:[#allocation25_spill] sm:$0xff]  ;;  %v2440_v7 = vmul.f32 %v11758_v58, %v11758_v58 }
 0x140   : > { %6416 = vmatprep.mubr.f32.mxu0 %v11718_v34  ;;  %v2427_v34 = vmul.f32 %v11742_v11, %v11742_v11  ;;  %v11764_v11 = vld [vmem:[#allocation69_spill] sm:$0xff]  ;;  %v2520_v33 = vsel %vm11336_vm0, %v2442_v8, 0.0 }
 0x142   : > { %v2475_v52 = vsel %vm11336_vm0, %v2427_v34, 0.0  ;;  %v2441_v34 = vmul.f32 %v11764_v11, %v11764_v11 }
 0x143   : > { %6417 = vmatmul.mubr.f32.gmra.mrb[20].mxu0 %v11723_v30 }
 0x144   : > { %7225 = vmatpush3.bf16.xpose.msra.mxu0 %v7222_v42  ;;  %6419 = vmatprep.mubr.f32.mxu0 %v11724_v16  ;;  %v2469_v42 = vsel %vm11336_vm0, %v2425_v4, 0.0  ;;  %v11762_v4 = vld [vmem:[#allocation70_spill] sm:$0xff] }
 0x145   : > { %7227 = vmatprep.subr.bf16.mxu0 %v7226_v50  ;;  %2470 = vadd.xlane.f32.xlu0 %v2469_v42  ;;  %v2511_v42 = vsel %vm11336_vm0, %v2439_v53, 0.0 }
 0x147   : > { %6420 = vmatmul.mubr.f32.gmra.mrb[22].mxu0 %v11725_v49  ;;  %v11745_v49 = vld [vmem:[#allocation39_spill] sm:$0xff] }
 0x148   : > { %6422 = vmatprep.mubr.f32.mxu0 %v11726_v51  ;;  %v2432_v51 = vmul.f32 %v11745_v49, %v11745_v49  ;;  %v11769_v49 = vld [vmem:[#allocation78_spill] sm:$0xff] }
 0x149   : > { %2476 = vadd.xlane.f32.xlu0 %v2475_v52  ;;  %v11766_v52 = vld [vmem:[#allocation77_spill] sm:$0xff] }
 0x14b   : > { %6423 = vmatmul.mubr.f32.gmra.mrb[24].mxu0 %v11729_v19  ;;  %v2487_v19 = vsel %vm11336_vm0, %v2431_v21, 0.0 }
 0x14c   : > { %7229 = vmatpush3.bf16.xpose.msra.mxu0 %v7226_v50  ;;  %6425 = vmatprep.mubr.f32.mxu0 %v11730_v28  ;;  %v11744_v50 = vld [vmem:[#allocation32_spill] sm:$0xff]  ;;  %v11747_v28 = vld [vmem:[#allocation45_spill] sm:$0xff] }
 0x14d   : > { %7231 = vmatprep.subr.bf16.mxu0 %v7230_v32  ;;  %v2429_v30 = vmul.f32 %v11744_v50, %v11744_v50  ;;  %v11767_v50 = vld [vmem:[#allocation80_spill] sm:$0xff] }
 0x14f   : > { %6426 = vmatmul.mubr.f32.gmra.mrb[26].mxu0 %v11731_v63  ;;  %v2481_v16 = vsel %vm11336_vm0, %v2429_v30, 0.0  ;;  %v2434_v63 = vmul.f32 %v11747_v28, %v11747_v28  ;;  %v2444_v30 = vmul.f32 %v11767_v50, %v11767_v50 }
 0x150   : > { %6428 = vmatprep.mubr.f32.mxu0 %v11732_v59  ;;  %2482 = vadd.xlane.f32.xlu0 %v2481_v16  ;;  %v11748_v59 = vld [vmem:[#allocation42_spill] sm:$0xff] }
 0x151   : > { %v2526_v21 = vsel %vm11336_vm0, %v2444_v30, 0.0 }
 0x153   : > { %6429 = vmatmul.mubr.f32.gmra.mrb[28].mxu0 %v11733_v35  ;;  %v2433_v35 = vmul.f32 %v11748_v59, %v11748_v59 }
 0x154   : > { %7233 = vmatpush3.bf16.xpose.msra.mxu0 %v7230_v32  ;;  %6431 = vmatprep.mubr.f32.mxu0 %v11734_v29  ;;  %v2490_v32 = vsel %vm11336_vm0, %v2432_v51, 0.0  ;;  %v11770_v51 = vld [vmem:[#allocation14_spill] sm:$0xff] }
 0x155   : > { %7235 = vmatprep.subr.bf16.mxu0 %v11641_v40  ;;  %2488 = vadd.xlane.f32.xlu0 %v2487_v19  ;;  %v2493_v29 = vsel %vm11336_vm0, %v2433_v35, 0.0  ;;  %v11772_v19 = vld [vmem:[#allocation86_spill] sm:$0xff]  ;;  %v11774_v35 = vld [vmem:[#allocation85_spill] sm:$0xff] }
 0x156   : > { %v2446_v28 = vmul.f32 %v11772_v19, %v11772_v19 }
 0x157   : > { %6432 = vmatmul.mubr.f32.gmra.mrb[30].mxu0 %v11735_v48  ;;  %v11749_v48 = vld [vmem:[#allocation56_spill] sm:$0xff] }
 0x158   : > { %6466 = vmatprep.mubr.f32.mxu0 %v8165_v27  ;;  %v2436_v44 = vmul.f32 %v11749_v48, %v11749_v48 }
 0x159   : > { %2494 = vadd.xlane.f32.xlu0 %v2493_v29  ;;  %v2532_v29 = vsel %vm11336_vm0, %v2446_v28, 0.0 }
 0x15a   : > { %v2502_v13 = vsel %vm11336_vm0, %v2436_v44, 0.0  ;;  %v11776_v44 = vld [vmem:[#allocation92_spill] sm:$0xff] }
 0x15b   : > { %6467 = vmatmul.mubr.f32.vlgmr.msra.gmra.mrb[0].mxu0 %v8276_v2  ;;  %v2448_v14 = vmul.f32 %v11776_v44, %v11776_v44 }
 0x15c   : > { %7237 = vmatpush3.bf16.xpose.msra.mxu0 %v11641_v40  ;;  %6469 = vmatprep.mubr.f32.mxu0 %v8278_v3  ;;  %v2472_v40 = vsel %vm11336_vm0, %v2426_v38, 0.0  ;;  %v11760_v38 = vld [vmem:[#allocation67_spill] sm:$0xff] }
 0x15d   : > { %7239 = vmatprep.subr.bf16.mxu0 %v11645_v1  ;;  %2473 = vadd.xlane.f32.xlu1 %v2472_v40  ;;  %v2514_v40 = vsel %vm11336_vm0, %v2440_v7, 0.0  ;;  %v2538_v62 = vsel %vm11336_vm0, %v2448_v14, 0.0  ;;  %v11783_v7 = vld [vmem:[#allocation95_spill] sm:$0xff] }
 0x15e   : > { %2500 = vadd.xlane.f32.xlu0 %v2499_v45  ;;  %v11779_v45 = vld [vmem:[#allocation23_spill] sm:$0xff] }
 0x15f   : > { %6470 = vmatmul.mubr.f32.gmra.mrb[2].mxu0 %v8335_v54 }
 0x160   : > { %6472 = vmatprep.mubr.f32.mxu0 %v8337_v57 }
 0x161   : > { %2479 = vadd.xlane.f32.xlu1 %v2478_v23  ;;  %v11765_v23 = vld [vmem:[#allocation72_spill] sm:$0xff] }
 0x162   : > { %2506 = vadd.xlane.f32.xlu0 %v2505_v61  ;;  %v11782_v61 = vld [vmem:[#allocation93_spill] sm:$0xff] }
 0x163   : > { %6473 = vmatmul.mubr.f32.gmra.mrb[4].mxu0 %v8351_v9  ;;  %v2449_v58 = vmul.f32 %v11782_v61, %v11782_v61 }
 0x164   : > { %7241 = vmatpush3.bf16.xpose.msra.mxu0 %v11645_v1  ;;  %6475 = vmatprep.mubr.f32.mxu0 %v8365_v56  ;;  %v2484_v1 = vsel %vm11336_vm0, %v2430_v0, 0.0  ;;  %v2517_v0 = vsel %vm11336_vm0, %v2441_v34, 0.0 }
 0x165   : > { %7243 = vmatprep.subr.bf16.mxu0 %v11650_v43  ;;  %2485 = vadd.xlane.f32.xlu1 %v2484_v1  ;;  %v11768_v1 = vld [vmem:[#allocation75_spill] sm:$0xff] }
 0x166   : > { %2512 = vadd.xlane.f32.xlu0 %v2511_v42  ;;  %v2443_v16 = vmul.f32 %v11768_v1, %v11768_v1  ;;  %v11786_v42 = vld [vmem:[#allocation99_spill] sm:$0xff] }
 0x167   : > { %6476 = vmatmul.mubr.f32.gmra.mrb[6].mxu0 %v8367_v55 }
 0x168   : > { %6478 = vmatprep.mubr.f32.mxu0 %v8398_v31 }
 0x169   : > { %2491 = vadd.xlane.f32.xlu1 %v2490_v32  ;;  %v2523_v32 = vsel %vm11336_vm0, %v2443_v16, 0.0 }
 0x16a   : > { %2518 = vadd.xlane.f32.xlu0 %v2517_v0 }
 0x16b   : > { %6479 = vmatmul.mubr.f32.gmra.mrb[8].mxu0 %v8400_v39 }
 0x16c   : > { %7245 = vmatpush3.bf16.xpose.msra.mxu0 %v11650_v43  ;;  %6481 = vmatprep.mubr.f32.mxu0 %v8442_v6  ;;  %v2496_v43 = vsel %vm11336_vm0, %v2434_v63, 0.0  ;;  %v11773_v63 = vld [vmem:[#allocation84_spill] sm:$0xff] }
 0x16d   : > { %7247 = vmatprep.subr.bf16.mxu0 %v11655_v5  ;;  %2497 = vadd.xlane.f32.xlu1 %v2496_v43  ;;  %v2445_v59 = vmul.f32 %v11773_v63, %v11773_v63  ;;  %v11775_v43 = vld [vmem:[#allocation90_spill] sm:$0xff] }
 0x16e   : > { %2524 = vadd.xlane.f32.xlu0 %v2523_v32 }
 0x16f   : > { %6482 = vmatmul.mubr.f32.gmra.mrb[10].mxu0 %v8453_v41  ;;  %v2529_v48 = vsel %vm11336_vm0, %v2445_v59, 0.0 }
 0x170   : > { %6484 = vmatprep.mubr.f32.mxu0 %v8493_v18 }
 0x171   : > { %2503 = vadd.xlane.f32.xlu1 %v2502_v13  ;;  %v11778_v13 = vld [vmem:[#allocation91_spill] sm:$0xff] }
 0x172   : > { %2530 = vadd.xlane.f32.xlu0 %v2529_v48 }
 0x173   : > { %6485 = vmatmul.mubr.f32.gmra.mrb[12].mxu0 %v8495_v17 }
 0x174   : > { %7249 = vmatpush3.bf16.xpose.msra.mxu0 %v11655_v5  ;;  %6487 = vmatprep.mubr.f32.mxu0 %v11751_v25  ;;  %v11757_v5 = vld [vmem:[#allocation65_spill] sm:$0xff] }
 0x175   : > { %7251 = vmatprep.subr.bf16.mxu0 %v11752_v36  ;;  %2509 = vadd.xlane.f32.xlu1 %v2508_v60  ;;  %v2450_v60 = vmul.f32 %v11781_v22, %v11781_v22 }
 0x177   : > { %6488 = vmatmul.mubr.f32.gmra.mrb[14].mxu0 %v11753_v24  ;;  %v2544_v53 = vsel %vm11336_vm0, %v2450_v60, 0.0 }
 0x178   : > { %6490 = vmatprep.mubr.f32.mxu0 %v11756_v12 }
 0x179   : > { %2515 = vadd.xlane.f32.xlu1 %v2514_v40  ;;  %v11785_v40 = vld [vmem:[#allocation98_spill] sm:$0xff] }
 0x17b   : > { %6491 = vmatmul.mubr.f32.gmra.mrb[16].mxu0 %v11757_v5 }
 0x17c   : > { %7253 = vmatpush3.bf16.xpose.msra.mxu0 %v11752_v36  ;;  %6493 = vmatprep.mubr.f32.mxu0 %v11760_v38  ;;  %v2447_v36 = vmul.f32 %v11777_v46, %v11777_v46 }
 0x17d   : > { %7255 = vmatprep.subr.bf16.mxu0 %v11761_v26  ;;  %2521 = vadd.xlane.f32.xlu1 %v2520_v33 }
 0x17e   : > { %v2535_v47 = vsel %vm11336_vm0, %v2447_v36, 0.0 }
 0x17f   : > { %6494 = vmatmul.mubr.f32.gmra.mrb[18].mxu0 %v11762_v4  ;;  %2536 = vadd.xlane.f32.xlu0 %v2535_v47 }
 0x180   : > { %6496 = vmatprep.mubr.f32.mxu0 %v11765_v23 }
 0x181   : > { %2527 = vadd.xlane.f32.xlu1 %v2526_v21 }
 0x183   : > { %6497 = vmatmul.mubr.f32.gmra.mrb[20].mxu0 %v11766_v52 }
 0x184   : > { %7257 = vmatpush3.bf16.xpose.msra.mxu0 %v11761_v26  ;;  %6499 = vmatprep.mubr.f32.mxu0 %v11769_v49  ;;  %v2541_v26 = vsel %vm11336_vm0, %v2449_v58, 0.0 }
 0x185   : > { %7259 = vmatprep.subr.bf16.mxu0 %v11770_v51  ;;  %2533 = vadd.xlane.f32.xlu1 %v2532_v29 }
 0x186   : > { %2542 = vadd.xlane.f32.xlu0 %v2541_v26 }
 0x187   : > { %6500 = vmatmul.mubr.f32.gmra.mrb[22].mxu0 %v11771_v10 }
 0x188   : > { %6502 = vmatprep.mubr.f32.mxu0 %v11774_v35 }
 0x189   : > { %2539 = vadd.xlane.f32.xlu1 %v2538_v62 }
 0x18b   : > { %6503 = vmatmul.mubr.f32.gmra.mrb[24].mxu0 %v11775_v43 }
 0x18c   : > { %7261 = vmatpush3.bf16.xpose.msra.mxu0 %v11770_v51  ;;  %6505 = vmatprep.mubr.f32.mxu0 %v11778_v13 }
 0x18d   : > { %7263 = vmatprep.subr.bf16.mxu0 %v11779_v45  ;;  %2545 = vadd.xlane.f32.xlu1 %v2544_v53 }
 0x18f   : > { %6506 = vmatmul.mubr.f32.gmra.mrb[26].mxu0 %v11780_v37 }
 0x190   : > { %6508 = vmatprep.mubr.f32.mxu0 %v11783_v7 }
 0x193   : > { %6509 = vmatmul.mubr.f32.gmra.mrb[28].mxu0 %v11784_v15 }
 0x194   : > { %7265 = vmatpush3.bf16.xpose.msra.mxu0 %v11779_v45  ;;  %6511 = vmatprep.mubr.f32.mxu0 %v11785_v40 }
 0x197   : > { %6512 = vmatmul.mubr.f32.gmra.mrb[30].mxu0 %v11786_v42 }
 0x198   : > { %6546 = vmatprep.mubr.f32.mxu0 %v8165_v27 }
 0x19b   : > { %6547 = vmatmul.mubr.f32.vlgmr.msra.gmra.mrb[0].mxu0 %v8276_v2 }
 0x19c   : > { %6549 = vmatprep.mubr.f32.mxu0 %v8278_v3 }
 0x19f   : > { %6550 = vmatmul.mubr.f32.gmra.mrb[2].mxu0 %v8335_v54 }
 0x1a0   : > { %6552 = vmatprep.mubr.f32.mxu0 %v8337_v57 }
 0x1a3   : > { %6553 = vmatmul.mubr.f32.gmra.mrb[4].mxu0 %v8351_v9 }
 0x1a4   : > { %6555 = vmatprep.mubr.f32.mxu0 %v8365_v56 }
 0x1a7   : > { %6556 = vmatmul.mubr.f32.gmra.mrb[6].mxu0 %v8367_v55 }
 0x1a8   : > { %6558 = vmatprep.mubr.f32.mxu0 %v8398_v31 }
 0x1ab   : > { %6559 = vmatmul.mubr.f32.gmra.mrb[8].mxu0 %v8400_v39 }
 0x1ac   : > { %6561 = vmatprep.mubr.f32.mxu0 %v8442_v6 }
 0x1af   : > { %6562 = vmatmul.mubr.f32.gmra.mrb[10].mxu0 %v8453_v41 }
 0x1b0   : > { %6564 = vmatprep.mubr.f32.mxu0 %v8493_v18 }
 0x1b3   : > { %6565 = vmatmul.mubr.f32.gmra.mrb[12].mxu0 %v8495_v17 }
 0x1b4   : > { %6567 = vmatprep.mubr.f32.mxu0 %v11751_v25 }
 0x1b7   : > { %6568 = vmatmul.mubr.f32.gmra.mrb[14].mxu0 %v11753_v24 }
 0x1b8   : > { %6570 = vmatprep.mubr.f32.mxu0 %v11756_v12  ;;  %v9270_v12 = vld [vmem:[%s11121_s2] ss:$0 sm:$0xff] }
 0x1bb   : > { %6571 = vmatmul.mubr.f32.gmra.mrb[16].mxu0 %v11757_v5 }
 0x1bc   : > { %6573 = vmatprep.mubr.f32.mxu0 %v11760_v38  ;;  %v2453_v39 = vpop.xlane.xlu0 %2452 }
 0x1bf   : > { %6574 = vmatmul.mubr.f32.gmra.mrb[18].mxu0 %v11762_v4 }
 0x1c0   : > { %6576 = vmatprep.mubr.f32.mxu0 %v11765_v23 }
 0x1c2   : > { %v2459_v27 = vpop.xlane.xlu1 %2458 }
 0x1c3   : > { %6577 = vmatmul.mubr.f32.gmra.mrb[20].mxu0 %v11766_v52  ;;  %v2456_v56 = vpop.xlane.xlu0 %2455 }
 0x1c4   : > { %6579 = vmatprep.mubr.f32.mxu0 %v11769_v49 }
 0x1c6   : > { %v2462_v55 = vpop.xlane.xlu1 %2461 }
 0x1c7   : > { %6580 = vmatmul.mubr.f32.gmra.mrb[22].mxu0 %v11771_v10  ;;  %v2465_v3 = vpop.xlane.xlu0 %2464 }
 0x1c8   : > { %6582 = vmatprep.mubr.f32.mxu0 %v11774_v35 }
 0x1cb   : > { %6583 = vmatmul.mubr.f32.gmra.mrb[24].mxu0 %v11775_v43 }
 0x1cc   : > { %6585 = vmatprep.mubr.f32.mxu0 %v11778_v13  ;;  %v2468_v2 = vpop.xlane.xlu1 %2467 }
 0x1cf   : > { %6586 = vmatmul.mubr.f32.gmra.mrb[26].mxu0 %v11780_v37 }
 0x1d0   : > { %6588 = vmatprep.mubr.f32.mxu0 %v11783_v7 }
 0x1d2   : > { %v2471_v57 = vpop.xlane.xlu0 %2470 }
 0x1d3   : > { %6589 = vmatmul.mubr.f32.gmra.mrb[28].mxu0 %v11784_v15 }
 0x1d4   : > { %6591 = vmatprep.mubr.f32.mxu0 %v11785_v40 }
 0x1d6   : > { %v2477_v17 = vpop.xlane.xlu0 %2476 }
 0x1d7   : > { %6592 = vmatmul.mubr.f32.gmra.mrb[30].mxu0 %v11786_v42 }
 0x1dd   : > { %v9265_v25 = vpop.xlane.xlu0 %2482 }
 0x1e2   : > { %v9281_v0 = vpop.xlane.xlu0 %2488 }
 0x1e6   : > { %v2495_v43 = vpop.xlane.xlu0 %2494 }
 0x1ea   : > { %v2474_v54 = vpop.xlane.xlu1 %2473 }
 0x1eb   : > { %v2501_v60 = vpop.xlane.xlu0 %2500 }
 0x1ee   : > { %v2480_v9 = vpop.xlane.xlu1 %2479 }
 0x1f2   : > { %v9263_v6 = vpop.xlane.xlu1 %2485 }
 0x1f6   : > { %v9278_v52 = vpop.xlane.xlu1 %2491 }
 0x1fa   : > { %v2498_v28 = vpop.xlane.xlu1 %2497 }
 0x1fe   : > { %v2504_v47 = vpop.xlane.xlu1 %2503 }
 0x26e   : > { %v6548_v31 = vpop.f32.mrb[0].mxu0 }
 0x26f   : > { %v2548_v41 = vmul.f32 2.0, %v6548_v31  ;;  %v2229_v18 = vpop.f32.mrb[1].mxu0 }
 0x270   : > { %v2547_v24 = vmul.f32 2.0, %v2229_v18 }
 0x271   : > { %v2580_v5 = vsub.f32 %v2456_v56, %v2548_v41 }
 0x272   : > { %v2579_v38 = vsub.f32 %v2453_v39, %v2547_v24  ;;  %v6551_v4 = vpop.f32.mrb[2].mxu0 }
 0x273   : > { %v2550_v20 = vmul.f32 2.0, %v6551_v4  ;;  %v2241_v8 = vpop.f32.mrb[3].mxu0  ;;  %v9273_v11 = vadd.f32 %v9270_v12, %v2580_v5 }
 0x274   : > { %v2549_v34 = vmul.f32 2.0, %v2241_v8  ;;  %v9276_v23 = vadd.f32 %v9270_v12, %v2579_v38 }
 0x275   : > { %v2582_v33 = vsub.f32 %v2462_v55, %v2550_v20  ;;  %2655 = vmin.xlane.f32.xlu1 %v9273_v11  ;;  %v2510_v55 = vpop.xlane.xlu1 %2509 }
 0x276   : > { %v2581_v50 = vsub.f32 %v2459_v27, %v2549_v34  ;;  %2653 = vmin.xlane.f32.xlu0 %v9276_v23  ;;  %v6554_v30 = vpop.f32.mrb[4].mxu0 }
 0x277   : > { %v2552_v1 = vmul.f32 2.0, %v6554_v30  ;;  %v2253_v16 = vpop.f32.mrb[5].mxu0  ;;  %v9285_v49 = vadd.f32 %v9270_v12, %v2582_v33 }
 0x278   : > { %v2551_v51 = vmul.f32 2.0, %v2253_v16  ;;  %v9288_v10 = vadd.f32 %v9270_v12, %v2581_v50 }
 0x279   : > { %v2584_v21 = vsub.f32 %v2468_v2, %v2552_v1  ;;  %2659 = vmin.xlane.f32.xlu1 %v9285_v49  ;;  %v2516_v38 = vpop.xlane.xlu1 %2515 }
 0x27a   : > { %v2583_v32 = vsub.f32 %v2465_v3, %v2551_v51  ;;  %2657 = vmin.xlane.f32.xlu0 %v9288_v10  ;;  %v6557_v19 = vpop.f32.mrb[6].mxu0 }
 0x27b   : > { %v2554_v63 = vmul.f32 2.0, %v6557_v19  ;;  %v2265_v59 = vpop.f32.mrb[7].mxu0  ;;  %v9293_v35 = vadd.f32 %v9270_v12, %v2584_v21 }
 0x27c   : > { %v2553_v29 = vmul.f32 2.0, %v2265_v59  ;;  %v9296_v48 = vadd.f32 %v9270_v12, %v2583_v32 }
 0x27d   : > { %v2586_v44 = vsub.f32 %v2474_v54, %v2554_v63  ;;  %2663 = vmin.xlane.f32.xlu1 %v9293_v35  ;;  %v2507_v54 = vpop.xlane.xlu0 %2506  ;;  %v2522_v21 = vpop.xlane.xlu1 %2521 }
 0x27e   : > { %v2585_v14 = vsub.f32 %v2471_v57, %v2553_v29  ;;  %2661 = vmin.xlane.f32.xlu0 %v9296_v48  ;;  %v6560_v46 = vpop.f32.mrb[8].mxu0 }
 0x27f   : > { %v2556_v36 = vmul.f32 2.0, %v6560_v46  ;;  %v2277_v13 = vpop.f32.mrb[9].mxu0  ;;  %v9301_v45 = vadd.f32 %v9270_v12, %v2586_v44 }
 0x280   : > { %v2555_v37 = vmul.f32 2.0, %v2277_v13  ;;  %v9304_v62 = vadd.f32 %v9270_v12, %v2585_v14 }
 0x281   : > { %v2588_v22 = vsub.f32 %v2480_v9, %v2556_v36  ;;  %2667 = vmin.xlane.f32.xlu1 %v9301_v45  ;;  %v2513_v20 = vpop.xlane.xlu0 %2512 }
 0x282   : > { %v2587_v61 = vsub.f32 %v2477_v17, %v2555_v37  ;;  %2665 = vmin.xlane.f32.xlu0 %v9304_v62  ;;  %v6563_v58 = vpop.f32.mrb[10].mxu0 }
 0x283   : > { %v2558_v7 = vmul.f32 2.0, %v6563_v58  ;;  %v2289_v15 = vpop.f32.mrb[11].mxu0  ;;  %v9309_v53 = vadd.f32 %v9270_v12, %v2588_v22  ;;  %v2528_v22 = vpop.xlane.xlu1 %2527 }
 0x284   : > { %v2557_v26 = vmul.f32 2.0, %v2289_v15  ;;  %v9312_v40 = vadd.f32 %v9270_v12, %v2587_v61 }
 0x285   : > { %v2590_v42 = vsub.f32 %v9263_v6, %v2558_v7  ;;  %2671 = vmin.xlane.f32.xlu1 %v9309_v53  ;;  %v2519_v63 = vpop.xlane.xlu0 %2518 }
 0x286   : > { %v2589_v27 = vsub.f32 %v9265_v25, %v2557_v26  ;;  %2669 = vmin.xlane.f32.xlu0 %v9312_v40  ;;  %v6566_v39 = vpop.f32.mrb[12].mxu0 }
 0x287   : > { %v2560_v56 = vmul.f32 2.0, %v6566_v39  ;;  %v2301_v2 = vpop.f32.mrb[13].mxu0  ;;  %v9319_v3 = vadd.f32 %v9270_v12, %v2590_v42 }
 0x288   : > { %v2559_v57 = vmul.f32 2.0, %v2301_v2  ;;  %v9322_v9 = vadd.f32 %v9270_v12, %v2589_v27 }
 0x289   : > { %v2592_v17 = vsub.f32 %v9278_v52, %v2560_v56  ;;  %2675 = vmin.xlane.f32.xlu1 %v9319_v3  ;;  %v2525_v61 = vpop.xlane.xlu0 %2524 }
 0x28a   : > { %v2591_v31 = vsub.f32 %v9281_v0, %v2559_v57  ;;  %2673 = vmin.xlane.f32.xlu0 %v9322_v9  ;;  %v6569_v6 = vpop.f32.mrb[14].mxu0 }
 0x28b   : > { %v2562_v41 = vmul.f32 2.0, %v6569_v6  ;;  %v2313_v18 = vpop.f32.mrb[15].mxu0  ;;  %v9329_v25 = vadd.f32 %v9270_v12, %v2592_v17 }
 0x28c   : > { %v2561_v24 = vmul.f32 2.0, %v2313_v18  ;;  %v9332_v5 = vadd.f32 %v9270_v12, %v2591_v31 }
 0x28d   : > { %v2594_v4 = vsub.f32 %v2498_v28, %v2562_v41  ;;  %2679 = vmin.xlane.f32.xlu1 %v9329_v25  ;;  %v2531_v6 = vpop.xlane.xlu0 %2530 }
 0x28e   : > { %v2593_v8 = vsub.f32 %v2495_v43, %v2561_v24  ;;  %2677 = vmin.xlane.f32.xlu0 %v9332_v5  ;;  %v6572_v34 = vpop.f32.mrb[16].mxu0 }
 0x28f   : > { %v2564_v52 = vmul.f32 2.0, %v6572_v34  ;;  %v2325_v33 = vpop.f32.mrb[17].mxu0  ;;  %v9337_v0 = vadd.f32 %v9270_v12, %v2594_v4 }
 0x290   : > { %v2563_v50 = vmul.f32 2.0, %v2325_v33  ;;  %v9340_v30 = vadd.f32 %v9270_v12, %v2593_v8 }
 0x291   : > { %v2596_v1 = vsub.f32 %v2504_v47, %v2564_v52  ;;  %2683 = vmin.xlane.f32.xlu1 %v9337_v0 }
 0x292   : > { %v2595_v16 = vsub.f32 %v2501_v60, %v2563_v50  ;;  %2681 = vmin.xlane.f32.xlu0 %v9340_v30  ;;  %v6575_v51 = vpop.f32.mrb[18].mxu0 }
 0x293   : > { %v2566_v32 = vmul.f32 2.0, %v6575_v51  ;;  %v2337_v19 = vpop.f32.mrb[19].mxu0  ;;  %v9345_v28 = vadd.f32 %v9270_v12, %v2596_v1 }
 0x294   : > { %v2565_v59 = vmul.f32 2.0, %v2337_v19  ;;  %v9348_v43 = vadd.f32 %v9270_v12, %v2595_v16  ;;  %v2537_v16 = vpop.xlane.xlu0 %2536 }
 0x295   : > { %v2598_v29 = vsub.f32 %v2510_v55, %v2566_v32  ;;  %2687 = vmin.xlane.f32.xlu1 %v9345_v28 }
 0x296   : > { %v2597_v44 = vsub.f32 %v2507_v54, %v2565_v59  ;;  %2685 = vmin.xlane.f32.xlu0 %v9348_v43  ;;  %v6578_v14 = vpop.f32.mrb[20].mxu0  ;;  %v2534_v54 = vpop.xlane.xlu1 %2533 }
 0x297   : > { %v2568_v46 = vmul.f32 2.0, %v6578_v14  ;;  %v2349_v36 = vpop.f32.mrb[21].mxu0  ;;  %v9353_v13 = vadd.f32 %v9270_v12, %v2598_v29 }
 0x298   : > { %v2567_v37 = vmul.f32 2.0, %v2349_v36  ;;  %v9356_v47 = vadd.f32 %v9270_v12, %v2597_v44 }
 0x299   : > { %v2600_v60 = vsub.f32 %v2516_v38, %v2568_v46  ;;  %2691 = vmin.xlane.f32.xlu1 %v9353_v13 }
 0x29a   : > { %v2599_v58 = vsub.f32 %v2513_v20, %v2567_v37  ;;  %2689 = vmin.xlane.f32.xlu0 %v9356_v47  ;;  %v6581_v7 = vpop.f32.mrb[22].mxu0  ;;  %v2540_v50 = vpop.xlane.xlu1 %2539 }
 0x29b   : > { %v2570_v15 = vmul.f32 2.0, %v6581_v7  ;;  %v2361_v26 = vpop.f32.mrb[23].mxu0  ;;  %v9361_v42 = vadd.f32 %v9270_v12, %v2600_v60  ;;  %v2543_v60 = vpop.xlane.xlu0 %2542 }
 0x29c   : > { %v2569_v27 = vmul.f32 2.0, %v2361_v26  ;;  %v9364_v39 = vadd.f32 %v9270_v12, %v2599_v58 }
 0x29d   : > { %v2602_v55 = vsub.f32 %v2522_v21, %v2570_v15  ;;  %2695 = vmin.xlane.f32.xlu1 %v9361_v42 }
 0x29e   : > { %v2601_v56 = vsub.f32 %v2519_v63, %v2569_v27  ;;  %2693 = vmin.xlane.f32.xlu0 %v9364_v39  ;;  %v6584_v2 = vpop.f32.mrb[24].mxu0  ;;  %v2546_v36 = vpop.xlane.xlu1 %2545 }
 0x29f   : > { %v2572_v57 = vmul.f32 2.0, %v6584_v2  ;;  %v2373_v17 = vpop.f32.mrb[25].mxu0  ;;  %v9369_v31 = vadd.f32 %v9270_v12, %v2602_v55 }
 0x2a0   : > { %v2571_v41 = vmul.f32 2.0, %v2373_v17  ;;  %v9372_v18 = vadd.f32 %v9270_v12, %v2601_v56  ;;  %v9411_v56 = vld [vmem:[%s11120_s1] sm:$0xff] }
 0x2a1   : > { %v2604_v24 = vsub.f32 %v2528_v22, %v2572_v57  ;;  %2699 = vmin.xlane.f32.xlu1 %v9369_v31  ;;  %v2942_v2 = vand.u32 4294901760, %v9411_v56 }
 0x2a2   : > { %v2603_v38 = vsub.f32 %v2525_v61, %v2571_v41  ;;  %2697 = vmin.xlane.f32.xlu0 %v9372_v18  ;;  %v6587_v4 = vpop.f32.mrb[26].mxu0 }
 0x2a3   : > { %v2574_v20 = vmul.f32 2.0, %v6587_v4  ;;  %v2385_v8 = vpop.f32.mrb[27].mxu0  ;;  %v9377_v34 = vadd.f32 %v9270_v12, %v2604_v24  ;;  %v9447_v4 = vld [vmem:[%s11120_s1 + $0x20] sm:$0xff] }
 0x2a4   : > { %v2573_v52 = vmul.f32 2.0, %v2385_v8  ;;  %v9380_v33 = vadd.f32 %v9270_v12, %v2603_v38  ;;  %v9453_v8 = vld [vmem:[%s11120_s1 + $0x28] sm:$0xff] }
 0x2a5   : > { %v2606_v1 = vsub.f32 %v2534_v54, %v2574_v20  ;;  %2703 = vmin.xlane.f32.xlu1 %v9377_v34  ;;  %v9417_v54 = vld [vmem:[%s11120_s1 + $0x8] sm:$0xff]  ;;  %v2954_v20 = vand.u32 4294901760, %v9447_v4 }
 0x2a6   : > { %v2605_v51 = vsub.f32 %v2531_v6, %v2573_v52  ;;  %2701 = vmin.xlane.f32.xlu0 %v9380_v33  ;;  %v6590_v21 = vpop.f32.mrb[28].mxu0  ;;  %v2945_v57 = vand.u32 4294901760, %v9417_v54  ;;  %v9429_v6 = vld [vmem:[%s11120_s1 + $0x18] sm:$0xff]  ;;  %v2957_v52 = vand.u32 4294901760, %v9453_v8 }
 0x2a7   : > { %v2576_v32 = vmul.f32 2.0, %v6590_v21  ;;  %v2397_v19 = vpop.f32.mrb[29].mxu0  ;;  %v9385_v63 = vadd.f32 %v9270_v12, %v2606_v1  ;;  %v2951_v41 = vand.u32 4294901760, %v9429_v6  ;;  %v9468_v1 = vld [vmem:[%s11120_s1 + $0x30] sm:$0xff] }
 0x2a8   : > { %v2575_v59 = vmul.f32 2.0, %v2397_v19  ;;  %v9388_v29 = vadd.f32 %v9270_v12, %v2605_v51  ;;  %v9436_v24 = vpack.c.bf16 %v2945_v57, %v2942_v2  ;;  %v9474_v51 = vld [vmem:[%s11120_s1 + $0x38] sm:$0xff]  ;;  %v9488_v19 = vld [vmem:[%s11120_s1 + $0x40] sm:$0xff] }
 0x2a9   : > { %v2608_v44 = vsub.f32 %v2540_v50, %v2576_v32  ;;  %2707 = vmin.xlane.f32.xlu1 %v9385_v63  ;;  %v9463_v50 = vpack.c.bf16 %v2957_v52, %v2954_v20  ;;  %v2963_v21 = vand.u32 4294901760, %v9474_v51 }
 0x2aa   : > { %v2607_v14 = vsub.f32 %v2537_v16, %v2575_v59  ;;  %2705 = vmin.xlane.f32.xlu0 %v9388_v29  ;;  %v6593_v46 = vpop.f32.mrb[30].mxu0  ;;  %7267 = vmatprep.subr.bf16.mxu1 %v9436_v24  ;;  %v2960_v16 = vand.u32 4294901760, %v9468_v1  ;;  %v11296_v59 = vand.u32 4294901760, %v9488_v19 }
 0x2ab   : > { %v2578_v37 = vmul.f32 2.0, %v6593_v46  ;;  %v2409_v22 = vpop.f32.mrb[31].mxu0  ;;  %v9393_v61 = vadd.f32 %v9270_v12, %v2608_v44  ;;  %7269 = vmatpush3.bf16.msra.mxu1 %v9436_v24  ;;  %11788 = vst [vmem:[#allocation5_spill] sm:$0xff] %v9463_v50  ;;  %v9494_v44 = vld [vmem:[%s11120_s1 + $0x48] sm:$0xff] }
 0x2ac   : > { %v2577_v58 = vmul.f32 2.0, %v2409_v22  ;;  %v9396_v7 = vadd.f32 %v9270_v12, %v2607_v14  ;;  %v9483_v32 = vpack.c.bf16 %v2963_v21, %v2960_v16  ;;  %v11295_v14 = vand.u32 4294901760, %v9494_v44 }
 0x2ad   : > { %v2610_v15 = vsub.f32 %v2546_v36, %v2578_v37  ;;  %2711 = vmin.xlane.f32.xlu1 %v9393_v61  ;;  %v11297_v36 = vlaneseq }
 0x2ae   : > { %v2609_v26 = vsub.f32 %v2543_v60, %v2577_v58  ;;  %2709 = vmin.xlane.f32.xlu0 %v9396_v7  ;;  %11789 = vst [vmem:[#allocation8_spill] sm:$0xff] %v9483_v32  ;;  %v9503_v46 = vpack.c.bf16 %v11295_v14, %v11296_v59 }
 0x2af   : > { %v9401_v27 = vadd.f32 %v9270_v12, %v2610_v15  ;;  %v2651_v37 = vand.u32 127, %v11297_v36 }
 0x2b0   : > { %v9404_v55 = vadd.f32 %v9270_v12, %v2609_v26  ;;  %v9423_v12 = vld [vmem:[%s11120_s1 + $0x10] sm:$0xff]  ;;  %11790 = vst [vmem:[#allocation18_spill] sm:$0xff] %v9503_v46 }
 0x2b1   : > { %2715 = vmin.xlane.f32.xlu1 %v9401_v27  ;;  %v2948_v17 = vand.u32 4294901760, %v9423_v12  ;;  %v9509_v22 = vcvt.s32.f32 %v2651_v37 }
 0x2b2   : > { %2713 = vmin.xlane.f32.xlu0 %v9404_v55 }
 0x2b3   : > { %v9442_v38 = vpack.c.bf16 %v2951_v41, %v2948_v17 }
 0x2b5   : > { %11787 = vst [vmem:[#allocation59_spill] sm:$0xff] %v9442_v38  ;;  %7271 = vmatprep.subr.bf16.mxu1 %v9442_v38 }
 0x2b6   : > { %7273 = vmatpush3.bf16.msra.mxu1 %v9442_v38 }
 0x2b7   : > { %7275 = vmatprep.subr.bf16.mxu1 %v9463_v50 }
 0x2ba   : > { %7277 = vmatpush3.bf16.msra.mxu1 %v9463_v50 }
 0x2bb   : > { %7279 = vmatprep.subr.bf16.mxu1 %v9483_v32 }
 0x2be   : > { %7281 = vmatpush3.bf16.msra.mxu1 %v9483_v32 }
 0x2bf   : > { %7283 = vmatprep.subr.bf16.mxu1 %v9503_v46 }
 0x2c2   : > { %7285 = vmatpush3.bf16.msra.mxu1 %v9503_v46 }
 0x302   : > { %v2656_v60 = vpop.xlane.xlu1 %2655 }
 0x303   : > { %vm2718_vm1 = vcmp.eq.f32.partialorder %v9273_v11, %v2656_v60  ;;  %v2654_v58 = vpop.xlane.xlu0 %2653 }
 0x304   : > { %vm2717_vm2 = vcmp.eq.f32.partialorder %v9276_v23, %v2654_v58  ;;  %v2750_v15 = vsel %vm2718_vm1, %v9509_v22, 128.0 }
 0x305   : > { %2783 = vmin.xlane.f32.xlu1 %v2750_v15  ;;  %v2749_v26 = vsel %vm2717_vm2, %v9509_v22, 128.0 }
 0x306   : > { %v2660_v14 = vpop.xlane.xlu1 %2659  ;;  %2781 = vmin.xlane.f32.xlu0 %v2749_v26 }
 0x307   : > { %vm2720_vm3 = vcmp.eq.f32.partialorder %v9285_v49, %v2660_v14  ;;  %v2658_v59 = vpop.xlane.xlu0 %2657 }
 0x308   : > { %vm2719_vm4 = vcmp.eq.f32.partialorder %v9288_v10, %v2658_v59  ;;  %v2752_v37 = vsel %vm2720_vm3, %v9509_v22, 128.0  ;;  %v9527_v59 = vld [vmem:[%s11120_s1 + $0x50] sm:$0xff] }
 0x309   : > { %2787 = vmin.xlane.f32.xlu1 %v2752_v37  ;;  %v2751_v11 = vsel %vm2719_vm4, %v9509_v22, 128.0 }
 0x30a   : > { %v2664_v60 = vpop.xlane.xlu1 %2663  ;;  %2785 = vmin.xlane.f32.xlu0 %v2751_v11 }
 0x30b   : > { %vm2722_vm5 = vcmp.eq.f32.partialorder %v9293_v35, %v2664_v60  ;;  %v2662_v23 = vpop.xlane.xlu0 %2661  ;;  %v2972_v35 = vand.u32 4294901760, %v9527_v59 }
 0x30c   : > { %vm2721_vm6 = vcmp.eq.f32.partialorder %v9296_v48, %v2662_v23  ;;  %v2754_v58 = vsel %vm2722_vm5, %v9509_v22, 128.0  ;;  %v9533_v48 = vld [vmem:[%s11120_s1 + $0x58] sm:$0xff] }
 0x30d   : > { %2791 = vmin.xlane.f32.xlu1 %v2754_v58  ;;  %v2753_v49 = vsel %vm2721_vm6, %v9509_v22, 128.0  ;;  %v2975_v15 = vand.u32 4294901760, %v9533_v48  ;;  %v9556_v58 = vld [vmem:[%s11120_s1 + $0x68] sm:$0xff] }
 0x30e   : > { %v2668_v14 = vpop.xlane.xlu1 %2667  ;;  %2789 = vmin.xlane.f32.xlu0 %v2753_v49  ;;  %v11298_v49 = vand.u32 4294901760, %v9556_v58 }
 0x30f   : > { %vm2724_vm7 = vcmp.eq.f32.partialorder %v9301_v45, %v2668_v14  ;;  %v2666_v10 = vpop.xlane.xlu0 %2665  ;;  %v9543_v37 = vpack.c.bf16 %v2975_v15, %v2972_v35 }
 0x310   : > { %vm2723_vm8 = vcmp.eq.f32.partialorder %v9304_v62, %v2666_v10  ;;  %v2756_v26 = vsel %vm2724_vm7, %v9509_v22, 128.0  ;;  %v9550_v62 = vld [vmem:[%s11120_s1 + $0x60] sm:$0xff] }
 0x311   : > { %2795 = vmin.xlane.f32.xlu1 %v2756_v26  ;;  %v2755_v45 = vsel %vm2723_vm8, %v9509_v22, 128.0  ;;  %11791 = vst [vmem:[#allocation19_spill] sm:$0xff] %v9543_v37  ;;  %7287 = vmatprep.subr.bf16.mxu1 %v9543_v37  ;;  %v2978_v23 = vand.u32 4294901760, %v9550_v62 }
 0x312   : > { %v2672_v11 = vpop.xlane.xlu1 %2671  ;;  %2793 = vmin.xlane.f32.xlu0 %v2755_v45  ;;  %7289 = vmatpush3.bf16.msra.mxu1 %v9543_v37 }
 0x313   : > { %vm2726_vm9 = vcmp.eq.f32.partialorder %v9309_v53, %v2672_v11  ;;  %v2670_v60 = vpop.xlane.xlu0 %2669  ;;  %v9567_v10 = vpack.c.bf16 %v11298_v49, %v2978_v23 }
 0x314   : > { %vm2725_vm10 = vcmp.eq.f32.partialorder %v9312_v40, %v2670_v60  ;;  %v2758_v53 = vsel %vm2726_vm9, %v9509_v22, 128.0  ;;  %v9574_v40 = vld [vmem:[%s11120_s1 + $0x70] sm:$0xff]  ;;  %v9580_v60 = vld [vmem:[%s11120_s1 + $0x78] sm:$0xff] }
 0x315   : > { %2799 = vmin.xlane.f32.xlu1 %v2758_v53  ;;  %v2757_v14 = vsel %vm2725_vm10, %v9509_v22, 128.0  ;;  %11792 = vst [vmem:[#allocation6_spill] sm:$0xff] %v9567_v10  ;;  %7291 = vmatprep.subr.bf16.mxu1 %v9567_v10  ;;  %v2984_v11 = vand.u32 4294901760, %v9574_v40  ;;  %v11299_v53 = vand.u32 4294901760, %v9580_v60 }
 0x316   : > { %v2676_v26 = vpop.xlane.xlu1 %2675  ;;  %2797 = vmin.xlane.f32.xlu0 %v2757_v14  ;;  %7293 = vmatpush3.bf16.msra.mxu1 %v9567_v10 }
 0x317   : > { %vm2728_vm11 = vcmp.eq.f32.partialorder %v9319_v3, %v2676_v26  ;;  %v2674_v45 = vpop.xlane.xlu0 %2673  ;;  %v9591_v26 = vpack.c.bf16 %v11299_v53, %v2984_v11 }
 0x318   : > { %vm2727_vm12 = vcmp.eq.f32.partialorder %v9322_v9, %v2674_v45  ;;  %v2760_v3 = vsel %vm2728_vm11, %v9509_v22, 128.0 }
 0x319   : > { %2803 = vmin.xlane.f32.xlu1 %v2760_v3  ;;  %v2759_v14 = vsel %vm2727_vm12, %v9509_v22, 128.0  ;;  %11793 = vst [vmem:[#allocation29_spill] sm:$0xff] %v9591_v26  ;;  %7295 = vmatprep.subr.bf16.mxu1 %v9591_v26 }
 0x31a   : > { %v2680_v36 = vpop.xlane.xlu1 %2679  ;;  %2801 = vmin.xlane.f32.xlu0 %v2759_v14  ;;  %7297 = vmatpush3.bf16.msra.mxu1 %v9591_v26  ;;  %v9607_v14 = vsub.f32 %v9411_v56, %v2942_v2 }
 0x31b   : > { %vm2730_vm13 = vcmp.eq.f32.partialorder %v9329_v25, %v2680_v36  ;;  %v2678_v49 = vpop.xlane.xlu0 %2677 }
 0x31c   : > { %vm2729_vm14 = vcmp.eq.f32.partialorder %v9332_v5, %v2678_v49  ;;  %v2762_v9 = vsel %vm2730_vm13, %v9509_v22, 128.0  ;;  %11794 = vst [vmem:[#allocation30_spill] sm:$0xff] %v9607_v14 }
 0x31d   : > { %2807 = vmin.xlane.f32.xlu1 %v2762_v9  ;;  %v2761_v45 = vsel %vm2729_vm14, %v9509_v22, 128.0 }
 0x31e   : > { %v2684_v3 = vpop.xlane.xlu1 %2683  ;;  %2805 = vmin.xlane.f32.xlu0 %v2761_v45 }
 0x31f   : > { %vm2732_vm15 = vcmp.eq.f32.partialorder %v9337_v0, %v2684_v3  ;;  %v2682_v53 = vpop.xlane.xlu0 %2681  ;;  %v9612_v0 = vsub.f32 %v9417_v54, %v2945_v57 }
 0x320   : > { %vm2731_vm1 = vcmp.eq.f32.partialorder %v9340_v30, %v2682_v53  ;;  %v2764_v25 = vsel %vm2732_vm15, %v9509_v22, 128.0 }
 0x321   : > { %2811 = vmin.xlane.f32.xlu1 %v2764_v25  ;;  %v2763_v36 = vsel %vm2731_vm1, %v9509_v22, 128.0  ;;  %11795 = vst [vmem:[#allocation31_spill] sm:$0xff] %v9612_v0  ;;  %v11316_v9 = vand.u32 4294901760, %v9612_v0 }
 0x322   : > { %v2688_v5 = vpop.xlane.xlu1 %2687  ;;  %2809 = vmin.xlane.f32.xlu0 %v2763_v36 }
 0x323   : > { %vm2734_vm2 = vcmp.eq.f32.partialorder %v9345_v28, %v2688_v5  ;;  %v2686_v49 = vpop.xlane.xlu0 %2685  ;;  %v11317_v28 = vand.u32 4294901760, %v9607_v14 }
 0x324   : > { %vm2733_vm3 = vcmp.eq.f32.partialorder %v9348_v43, %v2686_v49  ;;  %v2766_v30 = vsel %vm2734_vm2, %v9509_v22, 128.0  ;;  %v3353_v43 = vsub.f32 %v9612_v0, %v11316_v9 }
 0x325   : > { %2815 = vmin.xlane.f32.xlu1 %v2766_v30  ;;  %v2765_v53 = vsel %vm2733_vm3, %v9509_v22, 128.0  ;;  %v3346_v2 = vsub.f32 %v9607_v14, %v11317_v28  ;;  %vm5011_vm3 = vcmask 7168  }
 0x326   : > { %v2692_v45 = vpop.xlane.xlu1 %2691  ;;  %2813 = vmin.xlane.f32.xlu0 %v2765_v53  ;;  %v3354_v25 = vand.u32 4294901760, %v3353_v43 }
 0x327   : > { %vm2736_vm4 = vcmp.eq.f32.partialorder %v9353_v13, %v2692_v45  ;;  %v2690_v56 = vpop.xlane.xlu0 %2689  ;;  %v3347_v3 = vand.u32 4294901760, %v3346_v2 }
 0x328   : > { %vm2735_vm5 = vcmp.eq.f32.partialorder %v9356_v47, %v2690_v56  ;;  %v2768_v54 = vsel %vm2736_vm4, %v9509_v22, 128.0 }
 0x329   : > { %2819 = vmin.xlane.f32.xlu1 %v2768_v54  ;;  %v2767_v57 = vsel %vm2735_vm5, %v9509_v22, 128.0  ;;  %v9630_v5 = vpack.c.bf16 %v3354_v25, %v3347_v3 }
 0x32a   : > { %v2696_v36 = vpop.xlane.xlu1 %2695  ;;  %2817 = vmin.xlane.f32.xlu0 %v2767_v57 }
 0x32b   : > { %vm2738_vm6 = vcmp.eq.f32.partialorder %v9361_v42, %v2696_v36  ;;  %v2694_v13 = vpop.xlane.xlu0 %2693  ;;  %7299 = vmatprep.subr.bf16.mxu1 %v9630_v5 }
 0x32c   : > { %vm2737_vm7 = vcmp.eq.f32.partialorder %v9364_v39, %v2694_v13  ;;  %v2770_v49 = vsel %vm2738_vm6, %v9509_v22, 128.0  ;;  %v9664_v13 = vsub.f32 %v9429_v6, %v2951_v41  ;;  %v11796_v6 = vand.u32 4294901760, %v9488_v19 }
 0x32d   : > { %2823 = vmin.xlane.f32.xlu1 %v2770_v49  ;;  %v2769_v47 = vsel %vm2737_vm7, %v9509_v22, 128.0 }
 0x32e   : > { %v2700_v30 = vpop.xlane.xlu1 %2699  ;;  %2821 = vmin.xlane.f32.xlu0 %v2769_v47  ;;  %v9689_v41 = vsub.f32 %v9488_v19, %v11796_v6  ;;  %v9713_v19 = vsub.f32 %v9550_v62, %v2978_v23 }
 0x32f   : > { %vm2740_vm8 = vcmp.eq.f32.partialorder %v9369_v31, %v2700_v30  ;;  %v2698_v53 = vpop.xlane.xlu0 %2697 }
 0x330   : > { %vm2739_vm9 = vcmp.eq.f32.partialorder %v9372_v18, %v2698_v53  ;;  %v2772_v42 = vsel %vm2740_vm8, %v9509_v22, 128.0  ;;  %11797 = vst [vmem:[#allocation34_spill] sm:$0xff] %v9689_v41  ;;  %v11307_v62 = vand.u32 4294901760, %v9689_v41 }
 0x331   : > { %2827 = vmin.xlane.f32.xlu1 %v2772_v42  ;;  %v2771_v45 = vsel %vm2739_vm9, %v9509_v22, 128.0  ;;  %v11300_v42 = vand.u32 4294901760, %v9713_v19 }
 0x332   : > { %v2704_v39 = vpop.xlane.xlu1 %2703  ;;  %2825 = vmin.xlane.f32.xlu0 %v2771_v45 }
 0x333   : > { %vm2742_vm10 = vcmp.eq.f32.partialorder %v9377_v34, %v2704_v39  ;;  %v2702_v56 = vpop.xlane.xlu0 %2701 }
 0x334   : > { %vm2741_vm11 = vcmp.eq.f32.partialorder %v9380_v33, %v2702_v56  ;;  %v2774_v2 = vsel %vm2742_vm10, %v9509_v22, 128.0 }
 0x335   : > { %2831 = vmin.xlane.f32.xlu1 %v2774_v2  ;;  %v2773_v31 = vsel %vm2741_vm11, %v9509_v22, 128.0 }
 0x336   : > { %v2708_v43 = vpop.xlane.xlu1 %2707  ;;  %2829 = vmin.xlane.f32.xlu0 %v2773_v31 }
 0x337   : > { %vm2744_vm12 = vcmp.eq.f32.partialorder %v9385_v63, %v2708_v43  ;;  %v2706_v18 = vpop.xlane.xlu0 %2705  ;;  %v3402_v43 = vsub.f32 %v9689_v41, %v11307_v62 }
 0x338   : > { %vm2743_vm13 = vcmp.eq.f32.partialorder %v9388_v29, %v2706_v18  ;;  %v2776_v54 = vsel %vm2744_vm12, %v9509_v22, 128.0 }
 0x339   : > { %2835 = vmin.xlane.f32.xlu1 %v2776_v54  ;;  %v2775_v34 = vsel %vm2743_vm13, %v9509_v22, 128.0 }
 0x33a   : > { %v2712_v57 = vpop.xlane.xlu1 %2711  ;;  %2833 = vmin.xlane.f32.xlu0 %v2775_v34 }
 0x33b   : > { %vm2746_vm14 = vcmp.eq.f32.partialorder %v9393_v61, %v2712_v57  ;;  %v2710_v33 = vpop.xlane.xlu0 %2709 }
 0x33c   : > { %vm2745_vm15 = vcmp.eq.f32.partialorder %v9396_v7, %v2710_v33  ;;  %v2778_v3 = vsel %vm2746_vm14, %v9509_v22, 128.0  ;;  %v9659_v7 = vsub.f32 %v9423_v12, %v2948_v17  ;;  %v9679_v12 = vsub.f32 %v9468_v1, %v2960_v16 }
 0x33d   : > { %2839 = vmin.xlane.f32.xlu1 %v2778_v3  ;;  %v2777_v63 = vsel %vm2745_vm15, %v9509_v22, 128.0  ;;  %v9684_v17 = vsub.f32 %v9474_v51, %v2963_v21  ;;  %v9701_v1 = vsub.f32 %v9527_v59, %v2972_v35  ;;  %v9706_v16 = vsub.f32 %v9533_v48, %v2975_v15 }
 0x33e   : > { %v2716_v25 = vpop.xlane.xlu1 %2715  ;;  %2837 = vmin.xlane.f32.xlu0 %v2777_v63  ;;  %v11309_v59 = vand.u32 4294901760, %v9679_v12  ;;  %v9725_v48 = vsub.f32 %v9574_v40, %v2984_v11  ;;  %v11803_v15 = vand.u32 4294901760, %v9580_v60 }
 0x33f   : > { %vm2748_vm1 = vcmp.eq.f32.partialorder %v9401_v27, %v2716_v25  ;;  %v2714_v29 = vpop.xlane.xlu0 %2713  ;;  %v9669_v27 = vsub.f32 %v9447_v4, %v2954_v20  ;;  %v11798_v4 = vand.u32 4294901760, %v9494_v44  ;;  %11800 = vst [vmem:[#allocation35_spill] sm:$0xff] %v9701_v1  ;;  %11801 = vst [vmem:[#allocation36_spill] sm:$0xff] %v9706_v16  ;;  %v11308_v35 = vand.u32 4294901760, %v9684_v17 }
 0x340   : > { %vm2747_vm2 = vcmp.eq.f32.partialorder %v9404_v55, %v2714_v29  ;;  %v2780_v36 = vsel %vm2748_vm1, %v9509_v22, 128.0  ;;  %v9674_v55 = vsub.f32 %v9453_v8, %v2957_v52  ;;  %v11314_v8 = vand.u32 4294901760, %v9659_v7 }
 0x341   : > { %2843 = vmin.xlane.f32.xlu1 %v2780_v36  ;;  %v2779_v61 = vsel %vm2747_vm2, %v9509_v22, 128.0  ;;  %v9694_v20 = vsub.f32 %v9494_v44, %v11798_v4  ;;  %v11313_v52 = vand.u32 4294901760, %v9664_v13  ;;  %v11311_v51 = vand.u32 4294901760, %v9669_v27 }
 0x342   : > { %2841 = vmin.xlane.f32.xlu0 %v2779_v61  ;;  %v11310_v21 = vand.u32 4294901760, %v9674_v55  ;;  %v11802_v44 = vand.u32 4294901760, %v9556_v58  ;;  %v9730_v47 = vsub.f32 %v9580_v60, %v11803_v15  ;;  %v11304_v40 = vand.u32 4294901760, %v9701_v1 }
 0x343   : > { %11799 = vst [vmem:[#allocation7_spill] sm:$0xff] %v9694_v20  ;;  %v11306_v23 = vand.u32 4294901760, %v9694_v20  ;;  %v3367_v30 = vsub.f32 %v9664_v13, %v11313_v52  ;;  %v11302_v11 = vand.u32 4294901760, %v9706_v16  ;;  %v3374_v60 = vsub.f32 %v9669_v27, %v11311_v51 }
 0x344   : > { %v9718_v49 = vsub.f32 %v9556_v58, %v11802_v44  ;;  %v3360_v58 = vsub.f32 %v9659_v7, %v11314_v8  ;;  %v3381_v53 = vsub.f32 %v9674_v55, %v11310_v21  ;;  %v3388_v39 = vsub.f32 %v9679_v12, %v11309_v59 }
 0x345   : > { %v3395_v56 = vsub.f32 %v9684_v17, %v11308_v35  ;;  %v11303_v2 = vand.u32 4294901760, %v9725_v48  ;;  %v11305_v31 = vand.u32 4294901760, %v9730_v47  ;;  %v3409_v18 = vsub.f32 %v9694_v20, %v11306_v23 }
 0x346   : > { %v11301_v45 = vand.u32 4294901760, %v9718_v49  ;;  %v9766_v54 = vpack.c.bf16 %v9694_v20, %v9689_v41  ;;  %v3361_v34 = vand.u32 4294901760, %v3360_v58  ;;  %v3368_v57 = vand.u32 4294901760, %v3367_v30 }
 0x347   : > { %v3416_v33 = vsub.f32 %v9701_v1, %v11304_v40  ;;  %v3423_v3 = vsub.f32 %v9706_v16, %v11302_v11  ;;  %v3375_v63 = vand.u32 4294901760, %v3374_v60  ;;  %v3382_v25 = vand.u32 4294901760, %v3381_v53 }
 0x348   : > { %v3430_v29 = vsub.f32 %v9713_v19, %v11300_v42  ;;  %v3437_v36 = vsub.f32 %v9718_v49, %v11301_v45  ;;  %v3389_v61 = vand.u32 4294901760, %v3388_v39  ;;  %v3396_v6 = vand.u32 4294901760, %v3395_v56 }
 0x349   : > { %v3444_v4 = vsub.f32 %v9725_v48, %v11303_v2  ;;  %v3451_v44 = vsub.f32 %v9730_v47, %v11305_v31  ;;  %v3403_v15 = vand.u32 4294901760, %v3402_v43  ;;  %v3410_v58 = vand.u32 4294901760, %v3409_v18 }
 0x34a   : > { %v3417_v30 = vand.u32 4294901760, %v3416_v33  ;;  %v3424_v60 = vand.u32 4294901760, %v3423_v3  ;;  %v9786_v53 = vpack.c.bf16 %v3368_v57, %v3361_v34  ;;  %v3431_v42 = vand.u32 4294901760, %v3430_v29 }
 0x34b   : > { %v3438_v45 = vand.u32 4294901760, %v3437_v36  ;;  %v9790_v56 = vpack.c.bf16 %v3382_v25, %v3375_v63  ;;  %v9792_v11 = vpack.c.bf16 %v3396_v6, %v3389_v61  ;;  %v3445_v2 = vand.u32 4294901760, %v3444_v4 }
 0x34c   : > { %v3452_v40 = vand.u32 4294901760, %v3451_v44  ;;  %v9799_v33 = vpack.c.bf16 %v3410_v58, %v3403_v15  ;;  %v9803_v34 = vpack.c.bf16 %v9706_v16, %v9701_v1  ;;  %v11321_v57 = vmov 0.0  }
 0x34d   : > { %v9818_v25 = vpack.c.bf16 %v3424_v60, %v3417_v30  ;;  %v9826_v6 = vpack.c.bf16 %v3438_v45, %v3431_v42  ;;  %v9844_v45 = vpack.c.bf16 %v9612_v0, %v9607_v14 }
 0x34e   : > { %v9832_v31 = vpack.c.bf16 %v3452_v40, %v3445_v2 }
 0x392   : > { %v9788_v39 = vpop.xlane.xlu1 %2783 }
 0x393   : > { %vm2846_vm4 = vcmp.eq.f32.partialorder %v9509_v22, %v9788_v39  ;;  %v7780_v43 = vtrunc.f32 %v9788_v39  ;;  %v9797_v18 = vpop.xlane.xlu0 %2781 }
 0x394   : > { %v5407_v3 = vsel %vm2846_vm4, 1.0, %v11321_v57  ;;  %vm2845_vm5 = vcmp.eq.f32.partialorder %v9509_v22, %v9797_v18  ;;  %v7778_v63 = vtrunc.f32 %v9797_v18  ;;  %v7903_v18 = vld [vmem:[%s8149_s9] sm:$0xff] }
 0x395   : > { %v9820_v29 = vsub.f32 %v5407_v3, %v5407_v3  ;;  %v7781_v36 = vcvt.f32.s32 %v7780_v43  ;;  %v5406_v61 = vsel %vm2845_vm5, 1.0, %v11321_v57 }
 0x396   : > { %v7779_v4 = vcvt.f32.s32 %v7778_v63  ;;  %v5174_v44 = vadd.f32 %v5407_v3, %v5406_v61  ;;  %v9828_v15 = vpop.xlane.xlu1 %2787  ;;  %v9830_v58 = vsub.f32 %v5406_v61, %v5406_v61 }
 0x397   : > { %11804 = vst [vmem:[#allocation37_spill] sm:$0xff] %v9820_v29  ;;  %5013 = vst.msk [vmem:[%s9809_s26 + $0x8] sm:$0xff] %vm5011_vm3, %v7781_v36  ;;  %vm2848_vm6 = vcmp.eq.f32.partialorder %v9509_v22, %v9828_v15  ;;  %v7784_v30 = vtrunc.f32 %v9828_v15  ;;  %v9839_v60 = vpop.xlane.xlu0 %2785  ;;  %v11312_v42 = vand.u32 4294901760, %v9820_v29 }
 0x398   : > { %11805 = vst [vmem:[#allocation43_spill] sm:$0xff] %v9830_v58  ;;  %5012 = vst.msk [vmem:[%s9809_s26] sm:$0xff] %vm5011_vm3, %v7779_v4  ;;  %v5409_v40 = vsel %vm2848_vm6, 1.0, %v11321_v57  ;;  %vm2847_vm7 = vcmp.eq.f32.partialorder %v9509_v22, %v9839_v60  ;;  %v7782_v2 = vtrunc.f32 %v9839_v60  ;;  %v11315_v43 = vand.u32 4294901760, %v9830_v58 }
 0x399   : > { %v9856_v3 = vsub.f32 %v5409_v40, %v5409_v40  ;;  %v7785_v63 = vcvt.f32.s32 %v7784_v30  ;;  %v5408_v36 = vsel %vm2847_vm7, 1.0, %v11321_v57  ;;  %v3035_v61 = vsub.f32 %v9820_v29, %v11312_v42 }
 0x39a   : > { %v9865_v4 = vsub.f32 %v5408_v36, %v5408_v36  ;;  %v7783_v23 = vcvt.f32.s32 %v7782_v2  ;;  %v5175_v62 = vadd.f32 %v5408_v36, %v5174_v44  ;;  %v9867_v35 = vpop.xlane.xlu1 %2791  ;;  %v3025_v59 = vsub.f32 %v9830_v58, %v11315_v43 }
 0x39b   : > { %11806 = vst [vmem:[#allocation9_spill] sm:$0xff] %v9856_v3  ;;  %5015 = vst.msk [vmem:[%s9809_s26 + $0x18] sm:$0xff] %vm5011_vm3, %v7785_v63  ;;  %vm2850_vm8 = vcmp.eq.f32.partialorder %v9509_v22, %v9867_v35  ;;  %v7788_v30 = vtrunc.f32 %v9867_v35  ;;  %v9877_v21 = vpop.xlane.xlu0 %2789  ;;  %v3036_v51 = vand.u32 4294901760, %v3035_v61  ;;  %v11318_v2 = vand.u32 4294901760, %v9856_v3 }
 0x39c   : > { %11807 = vst [vmem:[#allocation44_spill] sm:$0xff] %v9865_v4  ;;  %5014 = vst.msk [vmem:[%s9809_s26 + $0x10] sm:$0xff] %vm5011_vm3, %v7783_v23  ;;  %v5411_v44 = vsel %vm2850_vm8, 1.0, %v11321_v57  ;;  %v5176_v36 = vadd.f32 %v5409_v40, %v5175_v62  ;;  %vm2849_vm9 = vcmp.eq.f32.partialorder %v9509_v22, %v9877_v21  ;;  %v7786_v63 = vtrunc.f32 %v9877_v21  ;;  %v7902_v21 = vld [vmem:[%s8149_s9 + $0x8] sm:$0xff] }
 0x39d   : > { %v9889_v42 = vsub.f32 %v5411_v44, %v5411_v44  ;;  %v7789_v61 = vcvt.f32.s32 %v7788_v30  ;;  %v5410_v23 = vsel %vm2849_vm9, 1.0, %v11321_v57  ;;  %v3026_v52 = vand.u32 4294901760, %v3025_v59 }
 0x39e   : > { %v9895_v8 = vsub.f32 %v5410_v23, %v5410_v23  ;;  %v7787_v43 = vcvt.f32.s32 %v7786_v63  ;;  %v5177_v9 = vadd.f32 %v5410_v23, %v5176_v36  ;;  %v9897_v62 = vpop.xlane.xlu1 %2795  ;;  %v11323_v40 = vand.u32 4294901760, %v9865_v4 }
 0x39f   : > { %11808 = vst [vmem:[#allocation46_spill] sm:$0xff] %v9889_v42  ;;  %11810 = vst [vmem:[#allocation60_spill] sm:$0xff] %v9897_v62  ;;  %vm2852_vm10 = vcmp.eq.f32.partialorder %v9509_v22, %v9897_v62  ;;  %v7792_v30 = vtrunc.f32 %v9897_v62  ;;  %6626 = vmatprep.mubr.f32.mxu1 %v3026_v52  ;;  %v9905_v28 = vpop.xlane.xlu0 %2793  ;;  %v3055_v59 = vsub.f32 %v9856_v3, %v11318_v2 }
 0x3a0   : > { %11809 = vst [vmem:[#allocation48_spill] sm:$0xff] %v9895_v8  ;;  %5017 = vst.msk [vmem:[%s9809_s26 + $0x28] sm:$0xff] %vm5011_vm3, %v7789_v61  ;;  %v5413_v63 = vsel %vm2852_vm10, 1.0, %v11321_v57  ;;  %6627 = vmatmul.mubr.f32.vlgmr.msra.gmra.mrb[0].mxu1 %v3036_v51  ;;  %v5178_v61 = vadd.f32 %v5411_v44, %v5177_v9  ;;  %vm2851_vm11 = vcmp.eq.f32.partialorder %v9509_v22, %v9905_v28  ;;  %v7790_v52 = vtrunc.f32 %v9905_v28 }
 0x3a1   : > { %5016 = vst.msk [vmem:[%s9809_s26 + $0x20] sm:$0xff] %vm5011_vm3, %v7787_v43  ;;  %v9920_v23 = vsub.f32 %v5413_v63, %v5413_v63  ;;  %v7793_v2 = vcvt.f32.s32 %v7792_v30  ;;  %v5412_v43 = vsel %vm2851_vm11, 1.0, %v11321_v57  ;;  %7301 = vmatpush3.bf16.msra.mxu1 %v9630_v5  ;;  %v3045_v9 = vsub.f32 %v9865_v4, %v11323_v40 }
 0x3a2   : > { %v9930_v51 = vsub.f32 %v5412_v43, %v5412_v43  ;;  %v7791_v44 = vcvt.f32.s32 %v7790_v52  ;;  %v5179_v36 = vadd.f32 %v5412_v43, %v5178_v61  ;;  %v9932_v16 = vpop.xlane.xlu1 %2799  ;;  %v3056_v1 = vand.u32 4294901760, %v3055_v59  ;;  %7303 = vmatprep.subr.bf16.mxu1 %v9786_v53 }
 0x3a3   : > { %11811 = vst [vmem:[#allocation64_spill] sm:$0xff] %v9920_v23  ;;  %11813 = vst [vmem:[#allocation71_spill] sm:$0xff] %v9932_v16  ;;  %vm11445_vm12 = vcmp.eq.f32.partialorder %v9509_v22, %v9932_v16  ;;  %v7796_v5 = vtrunc.f32 %v9932_v16  ;;  %v3046_v30 = vand.u32 4294901760, %v3045_v9  ;;  %v9940_v57 = vpop.xlane.xlu0 %2797  ;;  %v11327_v40 = vand.u32 4294901760, %v9895_v8 }
 0x3a4   : > { %11812 = vst [vmem:[#allocation66_spill] sm:$0xff] %v9930_v51  ;;  %5019 = vst.msk [vmem:[%s9809_s26 + $0x38] sm:$0xff] %vm5011_vm3, %v7793_v2  ;;  %v11815_v61 = vmov 0.0   ;;  %v5180_v52 = vadd.f32 %v5413_v63, %v5179_v36  ;;  %vm2853_vm13 = vcmp.eq.f32.partialorder %v9509_v22, %v9940_v57  ;;  %v7794_v2 = vtrunc.f32 %v9940_v57 }
 0x3a5   : > { %11814 = vst [vmem:[#allocation73_spill] sm:$0xff] %v9940_v57  ;;  %5018 = vst.msk [vmem:[%s9809_s26 + $0x30] sm:$0xff] %vm5011_vm3, %v7791_v44  ;;  %v5415_v59 = vsel %vm11445_vm12, 1.0, %v11815_v61  ;;  %v7797_v9 = vcvt.f32.s32 %v7796_v5  ;;  %6629 = vmatprep.mubr.f32.mxu1 %v3046_v30  ;;  %v5414_v44 = vsel %vm2853_vm13, 1.0, %v11815_v61  ;;  %v3065_v36 = vsub.f32 %v9895_v8, %v11327_v40  ;;  %7305 = vmatpush3.bf16.msra.mxu1 %v9786_v53 }
 0x3a6   : > { %v9952_v43 = vsub.f32 %v5415_v59, %v5415_v59  ;;  %6630 = vmatmul.mubr.f32.gmra.mrb[2].mxu1 %v3056_v1  ;;  %v9962_v63 = vsub.f32 %v5414_v44, %v5414_v44  ;;  %v7795_v20 = vcvt.f32.s32 %v7794_v2  ;;  %v5181_v41 = vadd.f32 %v5414_v44, %v5180_v52  ;;  %v9964_v0 = vpop.xlane.xlu1 %2803  ;;  %7307 = vmatprep.subr.bf16.mxu1 %v9790_v56 }
 0x3a7   : > { %11818 = vst [vmem:[#allocation81_spill] sm:$0xff] %v9964_v0  ;;  %v11819_v5 = vand.u32 4294901760, %v9889_v42  ;;  %5021 = vst.msk [vmem:[%s9809_s26 + $0x48] sm:$0xff] %vm5011_vm3, %v7797_v9  ;;  %vm11442_vm14 = vcmp.eq.f32.partialorder %v9509_v22, %v9964_v0  ;;  %v7800_v53 = vtrunc.f32 %v9964_v0  ;;  %v3066_v1 = vand.u32 4294901760, %v3065_v36  ;;  %v9975_v40 = vpop.xlane.xlu0 %2801 }
 0x3a8   : > { %11816 = vst [vmem:[#allocation76_spill] sm:$0xff] %v9952_v43  ;;  %11817 = vst [vmem:[#allocation79_spill] sm:$0xff] %v9962_v63  ;;  %v5417_v2 = vsel %vm11442_vm14, 1.0, %v11815_v61  ;;  %v5182_v9 = vadd.f32 %v5415_v59, %v5181_v41  ;;  %vm11444_vm15 = vcmp.eq.f32.partialorder %v9509_v22, %v9975_v40  ;;  %v7798_v52 = vtrunc.f32 %v9975_v40 }
 0x3a9   : > { %v3075_v30 = vsub.f32 %v9889_v42, %v11819_v5  ;;  %11820 = vst [vmem:[#allocation82_spill] sm:$0xff] %v9975_v40  ;;  %5020 = vst.msk [vmem:[%s9809_s26 + $0x40] sm:$0xff] %vm5011_vm3, %v7795_v20  ;;  %v9986_v5 = vsub.f32 %v5417_v2, %v5417_v2  ;;  %v7801_v36 = vcvt.f32.s32 %v7800_v53  ;;  %6632 = vmatprep.mubr.f32.mxu1 %v3066_v1  ;;  %v5416_v20 = vsel %vm11444_vm15, 1.0, %v11815_v61 }
 0x3aa   : > { %7309 = vmatpush3.bf16.msra.mxu1 %v9790_v56  ;;  %v5183_v41 = vadd.f32 %v5416_v20, %v5182_v9  ;;  %v9996_v59 = vpop.xlane.xlu1 %2807  ;;  %v11824_v14 = vand.u32 4294901760, %v9930_v51  ;;  %v11335_v1 = vand.u32 4294901760, %v9920_v23  ;;  %v7799_v26 = vcvt.f32.s32 %v7798_v52 }
 0x3ab   : > { %v3076_v44 = vand.u32 4294901760, %v3075_v30  ;;  %11821 = vst [vmem:[#allocation87_spill] sm:$0xff] %v9986_v5  ;;  %v9994_v30 = vsub.f32 %v5416_v20, %v5416_v20  ;;  %11823 = vst [vmem:[#allocation12_spill] sm:$0xff] %v9996_v59  ;;  %7311 = vmatprep.subr.bf16.mxu1 %v9792_v11  ;;  %vm11343_vm1 = vcmp.eq.f32.partialorder %v9509_v22, %v9996_v59  ;;  %v7804_v56 = vtrunc.f32 %v9996_v59 }
 0x3ac   : > { %v3085_v53 = vsub.f32 %v9930_v51, %v11824_v14  ;;  %5023 = vst.msk [vmem:[%s9809_s26 + $0x58] sm:$0xff] %vm5011_vm3, %v7801_v36  ;;  %v5419_v14 = vsel %vm11343_vm1, 1.0, %v11815_v61  ;;  %v3095_v52 = vsub.f32 %v9920_v23, %v11335_v1  ;;  %v5184_v36 = vadd.f32 %v5417_v2, %v5183_v41  ;;  %5022 = vst.msk [vmem:[%s9809_s26 + $0x50] sm:$0xff] %vm5011_vm3, %v7799_v26 }
 0x3ad   : > { %6633 = vmatmul.mubr.f32.gmra.mrb[4].mxu1 %v3076_v44  ;;  %11822 = vst [vmem:[#allocation89_spill] sm:$0xff] %v9994_v30  ;;  %v10008_v44 = vpop.xlane.xlu0 %2805  ;;  %v10020_v10 = vsub.f32 %v5419_v14, %v5419_v14  ;;  %v7805_v37 = vcvt.f32.s32 %v7804_v56  ;;  %v11828_v26 = vand.u32 4294901760, %v9962_v63  ;;  %v11923_v0 = vand.u32 4294901760, %v9664_v13 }
 0x3ae   : > { %11825 = vst [vmem:[#allocation13_spill] sm:$0xff] %v10008_v44  ;;  %v3086_v20 = vand.u32 4294901760, %v3085_v53  ;;  %vm11443_vm2 = vcmp.eq.f32.partialorder %v9509_v22, %v10008_v44  ;;  %v7802_v9 = vtrunc.f32 %v10008_v44  ;;  %7313 = vmatpush3.bf16.msra.mxu1 %v9792_v11  ;;  %v3096_v53 = vand.u32 4294901760, %v3095_v52  ;;  %v10030_v2 = vpop.xlane.xlu1 %2811 }
 0x3af   : > { %11826 = vst [vmem:[#allocation22_spill] sm:$0xff] %v10020_v10  ;;  %v5418_v1 = vsel %vm11443_vm2, 1.0, %v11815_v61  ;;  %11827 = vst [vmem:[#allocation24_spill] sm:$0xff] %v10030_v2  ;;  %v3105_v41 = vsub.f32 %v9962_v63, %v11828_v26  ;;  %7315 = vmatprep.subr.bf16.mxu1 %v9799_v33  ;;  %vm11348_vm0 = vcmp.eq.f32.partialorder %v9509_v22, %v10030_v2  ;;  %v7808_v56 = vtrunc.f32 %v10030_v2 }
 0x3b0   : > { %6635 = vmatprep.mubr.f32.mxu1 %v3086_v20  ;;  %5025 = vst.msk [vmem:[%s9809_s26 + $0x68] sm:$0xff] %vm5011_vm3, %v7805_v37  ;;  %v10039_v11 = vsub.f32 %v5418_v1, %v5418_v1  ;;  %v7803_v20 = vcvt.f32.s32 %v7802_v9  ;;  %v5185_v52 = vadd.f32 %v5418_v1, %v5184_v36  ;;  %v5421_v26 = vsel %vm11348_vm0, 1.0, %v11815_v61 }
 0x3b1   : > { %v10043_v46 = vpop.xlane.xlu0 %2809  ;;  %6636 = vmatmul.mubr.f32.gmra.mrb[6].mxu1 %v3096_v53  ;;  %v3106_v63 = vand.u32 4294901760, %v3105_v41  ;;  %v11831_v37 = vand.u32 4294901760, %v9952_v43  ;;  %v10055_v1 = vsub.f32 %v5421_v26, %v5421_v26  ;;  %v7809_v53 = vcvt.f32.s32 %v7808_v56 }
 0x3b2   : > { %11829 = vst [vmem:[#allocation27_spill] sm:$0xff] %v10039_v11  ;;  %11830 = vst [vmem:[#allocation28_spill] sm:$0xff] %v10043_v46  ;;  %v5186_v9 = vadd.f32 %v5419_v14, %v5185_v52  ;;  %vm11349_vm1 = vcmp.eq.f32.partialorder %v9509_v22, %v10043_v46  ;;  %v7806_v36 = vtrunc.f32 %v10043_v46  ;;  %7317 = vmatpush3.bf16.msra.mxu1 %v9799_v33  ;;  %v11352_v14 = vand.u32 4294901760, %v9994_v30 }
 0x3b3   : > { %v3115_v23 = vsub.f32 %v9952_v43, %v11831_v37  ;;  %5024 = vst.msk [vmem:[%s9809_s26 + $0x60] sm:$0xff] %vm5011_vm3, %v7803_v20  ;;  %11832 = vst [vmem:[#allocation40_spill] sm:$0xff] %v10055_v1  ;;  %6638 = vmatprep.mubr.f32.mxu1 %v3106_v63  ;;  %v5420_v20 = vsel %vm11349_vm1, 1.0, %v11815_v61  ;;  %v10065_v37 = vpop.xlane.xlu1 %2815  ;;  %7319 = vmatprep.subr.bf16.mxu1 %v9818_v25  ;;  %v11363_v42 = vand.u32 4294901760, %v10039_v11  ;;  %v11927_v57 = vand.u32 4294901760, %v9674_v55 }
 0x3b4   : > { %11833 = vst [vmem:[#allocation41_spill] sm:$0xff] %v10065_v37  ;;  %v10069_v52 = vsub.f32 %v5420_v20, %v5420_v20  ;;  %v7807_v43 = vcvt.f32.s32 %v7806_v36  ;;  %v5187_v32 = vadd.f32 %v5420_v20, %v5186_v9  ;;  %vm11355_vm0 = vcmp.eq.f32.partialorder %v9509_v22, %v10065_v37  ;;  %5027 = vst.msk [vmem:[%s9809_s26 + $0x78] sm:$0xff] %vm5011_vm3, %v7809_v53 }
 0x3b5   : > { %v3116_v41 = vand.u32 4294901760, %v3115_v23  ;;  %v10073_v33 = vpop.xlane.xlu0 %2813  ;;  %v5423_v23 = vsel %vm11355_vm0, 1.0, %v11815_v61  ;;  %v7812_v63 = vtrunc.f32 %v10065_v37  ;;  %v3125_v56 = vsub.f32 %v9994_v30, %v11352_v14 }
 0x3b6   : > { %11834 = vst [vmem:[#allocation50_spill] sm:$0xff] %v10069_v52  ;;  %11835 = vst [vmem:[#allocation51_spill] sm:$0xff] %v10073_v33  ;;  %v11356_v9 = vand.u32 4294901760, %v9986_v5  ;;  %v10088_v36 = vsub.f32 %v5423_v23, %v5423_v23  ;;  %v5188_v53 = vadd.f32 %v5421_v26, %v5187_v32  ;;  %vm11361_vm1 = vcmp.eq.f32.partialorder %v9509_v22, %v10073_v33 }
 0x3b7   : > { %6639 = vmatmul.mubr.f32.gmra.mrb[8].mxu1 %v3116_v41  ;;  %5026 = vst.msk [vmem:[%s9809_s26 + $0x70] sm:$0xff] %vm5011_vm3, %v7807_v43  ;;  %v7810_v41 = vtrunc.f32 %v10073_v33  ;;  %v7813_v20 = vcvt.f32.s32 %v7812_v63  ;;  %v3126_v51 = vand.u32 4294901760, %v3125_v56  ;;  %v5422_v43 = vsel %vm11361_vm1, 1.0, %v11815_v61  ;;  %v10101_v32 = vpop.xlane.xlu1 %2819 }
 0x3b8   : > { %11836 = vst [vmem:[#allocation52_spill] sm:$0xff] %v10088_v36  ;;  %7321 = vmatpush3.bf16.msra.mxu1 %v9818_v25  ;;  %v3135_v14 = vsub.f32 %v9986_v5, %v11356_v9  ;;  %11837 = vst [vmem:[#allocation53_spill] sm:$0xff] %v10101_v32  ;;  %v10104_v26 = vsub.f32 %v5422_v43, %v5422_v43  ;;  %v5189_v25 = vadd.f32 %v5422_v43, %v5188_v53 }
 0x3b9   : > { %7323 = vmatprep.subr.bf16.mxu1 %v9826_v6  ;;  %v7811_v30 = vcvt.f32.s32 %v7810_v41  ;;  %vm11362_vm0 = vcmp.eq.f32.partialorder %v9509_v22, %v10101_v32  ;;  %v10108_v63 = vpop.xlane.xlu0 %2817  ;;  %5029 = vst.msk [vmem:[%s9809_s26 + $0x88] sm:$0xff] %vm5011_vm3, %v7813_v20  ;;  %6641 = vmatprep.mubr.f32.mxu1 %v3126_v51  ;;  %v7816_v5 = vtrunc.f32 %v10101_v32 }
 0x3ba   : > { %11838 = vst [vmem:[#allocation54_spill] sm:$0xff] %v10104_v26  ;;  %11839 = vst [vmem:[#allocation55_spill] sm:$0xff] %v10108_v63  ;;  %v3136_v56 = vand.u32 4294901760, %v3135_v14  ;;  %v5425_v9 = vsel %vm11362_vm0, 1.0, %v11815_v61  ;;  %v5190_v43 = vadd.f32 %v5423_v23, %v5189_v25  ;;  %vm11373_vm1 = vcmp.eq.f32.partialorder %v9509_v22, %v10108_v63 }
 0x3bb   : > { %5028 = vst.msk [vmem:[%s9809_s26 + $0x80] sm:$0xff] %vm5011_vm3, %v7811_v30  ;;  %v10120_v53 = vsub.f32 %v5425_v9, %v5425_v9  ;;  %v7817_v51 = vcvt.f32.s32 %v7816_v5  ;;  %v3145_v14 = vsub.f32 %v10039_v11, %v11363_v42  ;;  %v5424_v30 = vsel %vm11373_vm1, 1.0, %v11815_v61  ;;  %v10134_v41 = vpop.xlane.xlu1 %2823 }
 0x3bc   : > { %7325 = vmatpush3.bf16.msra.mxu1 %v9826_v6  ;;  %v7814_v20 = vtrunc.f32 %v10108_v63  ;;  %11841 = vst [vmem:[#allocation17_spill] sm:$0xff] %v10134_v41  ;;  %v11842_v23 = vand.u32 4294901760, %v10020_v10  ;;  %v10140_v5 = vsub.f32 %v5424_v30, %v5424_v30  ;;  %v5191_v25 = vadd.f32 %v5424_v30, %v5190_v43 }
 0x3bd   : > { %11840 = vst [vmem:[#allocation15_spill] sm:$0xff] %v10120_v53  ;;  %6642 = vmatmul.mubr.f32.gmra.mrb[10].mxu1 %v3136_v56  ;;  %7327 = vmatprep.subr.bf16.mxu1 %v9832_v31  ;;  %vm11372_vm0 = vcmp.eq.f32.partialorder %v9509_v22, %v10134_v41  ;;  %v10144_v56 = vpop.xlane.xlu0 %2821  ;;  %5031 = vst.msk [vmem:[%s9809_s26 + $0x98] sm:$0xff] %vm5011_vm3, %v7817_v51  ;;  %v3146_v42 = vand.u32 4294901760, %v3145_v14  ;;  %v11375_v43 = vand.u32 4294901760, %v10069_v52  ;;  %v11374_v30 = vand.u32 4294901760, %v10055_v1 }
 0x3be   : > { %v3155_v6 = vsub.f32 %v10020_v10, %v11842_v23  ;;  %11843 = vst [vmem:[#allocation16_spill] sm:$0xff] %v10140_v5  ;;  %11844 = vst [vmem:[#allocation21_spill] sm:$0xff] %v10144_v56  ;;  %v7815_v11 = vcvt.f32.s32 %v7814_v20  ;;  %v5427_v50 = vsel %vm11372_vm0, 1.0, %v11815_v61  ;;  %v7820_v23 = vtrunc.f32 %v10134_v41 }
 0x3bf   : > { %v10153_v8 = vsub.f32 %v5427_v50, %v5427_v50  ;;  %6644 = vmatprep.mubr.f32.mxu1 %v3146_v42  ;;  %v5192_v14 = vadd.f32 %v5425_v9, %v5191_v25  ;;  %vm11384_vm0 = vcmp.eq.f32.partialorder %v9509_v22, %v10144_v56  ;;  %v7818_v20 = vtrunc.f32 %v10144_v56 }
 0x3c0   : > { %v3156_v10 = vand.u32 4294901760, %v3155_v6  ;;  %7329 = vmatpush3.bf16.msra.mxu1 %v9832_v31  ;;  %5030 = vst.msk [vmem:[%s9809_s26 + $0x90] sm:$0xff] %vm5011_vm3, %v7815_v11  ;;  %v7821_v51 = vcvt.f32.s32 %v7820_v23  ;;  %v10163_v6 = vpop.xlane.xlu1 %2827  ;;  %v3165_v31 = vsub.f32 %v10069_v52, %v11375_v43  ;;  %v3175_v42 = vsub.f32 %v10055_v1, %v11374_v30 }
 0x3c1   : > { %11845 = vst [vmem:[#allocation20_spill] sm:$0xff] %v10153_v8  ;;  %11846 = vst [vmem:[#allocation26_spill] sm:$0xff] %v10163_v6  ;;  %7331 = vmatprep.subr.bf16.mxu1 %v9844_v45  ;;  %v5426_v11 = vsel %vm11384_vm0, 1.0, %v11815_v61  ;;  %vm11385_vm1 = vcmp.eq.f32.partialorder %v9509_v22, %v10163_v6  ;;  %v10178_v9 = vpop.xlane.xlu0 %2825  ;;  %v7819_v25 = vcvt.f32.s32 %v7818_v20  ;;  %v7824_v3 = vtrunc.f32 %v10163_v6 }
 0x3c2   : > { %6645 = vmatmul.mubr.f32.gmra.mrb[12].mxu1 %v3156_v10  ;;  %11847 = vst [vmem:[#allocation25_spill] sm:$0xff] %v10178_v9  ;;  %5033 = vst.msk [vmem:[%s9809_s26 + $0xa8] sm:$0xff] %vm5011_vm3, %v7821_v51  ;;  %v10182_v10 = vsub.f32 %v5426_v11, %v5426_v11  ;;  %v5193_v23 = vadd.f32 %v5426_v11, %v5192_v14  ;;  %v5429_v30 = vsel %vm11385_vm1, 1.0, %v11815_v61  ;;  %v3166_v43 = vand.u32 4294901760, %v3165_v31 }
 0x3c3   : > { %v3176_v1 = vand.u32 4294901760, %v3175_v42  ;;  %v10188_v52 = vsub.f32 %v5429_v30, %v5429_v30  ;;  %5032 = vst.msk [vmem:[%s9809_s26 + $0xa0] sm:$0xff] %vm5011_vm3, %v7819_v25  ;;  %v11392_v38 = vand.u32 4294901760, %v10104_v26  ;;  %v11397_v51 = vand.u32 4294901760, %v10088_v36 }
 0x3c4   : > { %11848 = vst [vmem:[#allocation33_spill] sm:$0xff] %v10182_v10  ;;  %v5194_v20 = vadd.f32 %v5427_v50, %v5193_v23  ;;  %vm11399_vm0 = vcmp.eq.f32.partialorder %v9509_v22, %v10178_v9  ;;  %v10197_v14 = vpop.xlane.xlu1 %2831  ;;  %6647 = vmatprep.mubr.f32.mxu1 %v3166_v43  ;;  %v7825_v31 = vcvt.f32.s32 %v7824_v3  ;;  %v7822_v11 = vtrunc.f32 %v10178_v9 }
 0x3c5   : > { %11849 = vst [vmem:[#allocation32_spill] sm:$0xff] %v10188_v52  ;;  %11850 = vst [vmem:[#allocation39_spill] sm:$0xff] %v10197_v14  ;;  %v5428_v42 = vsel %vm11399_vm0, 1.0, %v11815_v61  ;;  %vm11398_vm1 = vcmp.eq.f32.partialorder %v9509_v22, %v10197_v14  ;;  %v10206_v25 = vpop.xlane.xlu0 %2829  ;;  %v3185_v50 = vsub.f32 %v10104_v26, %v11392_v38  ;;  %v3195_v3 = vsub.f32 %v10088_v36, %v11397_v51 }
 0x3c6   : > { %11851 = vst [vmem:[#allocation38_spill] sm:$0xff] %v10206_v25  ;;  %6648 = vmatmul.mubr.f32.gmra.mrb[14].mxu1 %v3176_v1  ;;  %v10214_v43 = vsub.f32 %v5428_v42, %v5428_v42  ;;  %v5195_v23 = vadd.f32 %v5428_v42, %v5194_v20  ;;  %5035 = vst.msk [vmem:[%s9809_s26 + $0xb8] sm:$0xff] %vm5011_vm3, %v7825_v31  ;;  %v7823_v4 = vcvt.f32.s32 %v7822_v11  ;;  %v5431_v29 = vsel %vm11398_vm1, 1.0, %v11815_v61 }
 0x3c7   : > { %v7828_v1 = vtrunc.f32 %v10197_v14  ;;  %v11401_v58 = vand.u32 4294901760, %v10140_v5  ;;  %v3186_v38 = vand.u32 4294901760, %v3185_v50  ;;  %v3196_v26 = vand.u32 4294901760, %v3195_v3 }
 0x3c8   : > { %11852 = vst [vmem:[#allocation45_spill] sm:$0xff] %v10214_v43  ;;  %v10224_v6 = vsub.f32 %v5431_v29, %v5431_v29  ;;  %v11400_v51 = vand.u32 4294901760, %v10120_v53  ;;  %v10227_v20 = vpop.xlane.xlu1 %2835  ;;  %5034 = vst.msk [vmem:[%s9809_s26 + $0xb0] sm:$0xff] %vm5011_vm3, %v7823_v4  ;;  %v5196_v11 = vadd.f32 %v5429_v30, %v5195_v23  ;;  %vm11410_vm1 = vcmp.eq.f32.partialorder %v9509_v22, %v10206_v25  ;;  %v11917_v44 = vld [vmem:[#allocation20_spill] sm:$0xff] }
 0x3c9   : > { %11853 = vst [vmem:[#allocation42_spill] sm:$0xff] %v10227_v20  ;;  %v7829_v31 = vcvt.f32.s32 %v7828_v1  ;;  %v3205_v42 = vsub.f32 %v10140_v5, %v11401_v58  ;;  %v10236_v50 = vpop.xlane.xlu0 %2833  ;;  %6650 = vmatprep.mubr.f32.mxu1 %v3186_v38  ;;  %v5430_v4 = vsel %vm11410_vm1, 1.0, %v11815_v61  ;;  %v7826_v1 = vtrunc.f32 %v10206_v25 }
 0x3ca   : > { %11854 = vst [vmem:[#allocation56_spill] sm:$0xff] %v10236_v50  ;;  %v3215_v3 = vsub.f32 %v10120_v53, %v11400_v51  ;;  %vm11411_vm0 = vcmp.eq.f32.partialorder %v9509_v22, %v10227_v20  ;;  %6651 = vmatmul.mubr.f32.gmra.mrb[16].mxu1 %v3196_v26  ;;  %v10250_v38 = vsub.f32 %v5430_v4, %v5430_v4  ;;  %v7832_v36 = vtrunc.f32 %v10227_v20 }
 0x3cb   : > { %5037 = vst.msk [vmem:[%s9809_s26 + $0xc8] sm:$0xff] %vm5011_vm3, %v7829_v31  ;;  %v3206_v30 = vand.u32 4294901760, %v3205_v42  ;;  %v5197_v23 = vadd.f32 %v5430_v4, %v5196_v11  ;;  %v5433_v51 = vsel %vm11411_vm0, 1.0, %v11815_v61  ;;  %v7827_v53 = vcvt.f32.s32 %v7826_v1 }
 0x3cc   : > { %11855 = vst [vmem:[#allocation49_spill] sm:$0xff] %v10250_v38  ;;  %v3216_v58 = vand.u32 4294901760, %v3215_v3  ;;  %v10256_v5 = vsub.f32 %v5433_v51, %v5433_v51  ;;  %v10259_v14 = vpop.xlane.xlu1 %2839  ;;  %v11416_v26 = vand.u32 4294901760, %v10182_v10  ;;  %v11419_v31 = vand.u32 4294901760, %v10153_v8 }
 0x3cd   : > { %11856 = vst [vmem:[#allocation47_spill] sm:$0xff] %v10259_v14  ;;  %6653 = vmatprep.mubr.f32.mxu1 %v3206_v30  ;;  %v5198_v42 = vadd.f32 %v5431_v29, %v5197_v23  ;;  %vm11423_vm1 = vcmp.eq.f32.partialorder %v9509_v22, %v10236_v50  ;;  %v10265_v11 = vpop.xlane.xlu0 %2837  ;;  %5036 = vst.msk [vmem:[%s9809_s26 + $0xc0] sm:$0xff] %vm5011_vm3, %v7827_v53  ;;  %v7833_v3 = vcvt.f32.s32 %v7832_v36  ;;  %v7830_v1 = vtrunc.f32 %v10236_v50 }
 0x3ce   : > { %11857 = vst [vmem:[#allocation10_spill] sm:$0xff] %v10265_v11  ;;  %v5432_v4 = vsel %vm11423_vm1, 1.0, %v11815_v61  ;;  %vm11422_vm0 = vcmp.eq.f32.partialorder %v9509_v22, %v10259_v14  ;;  %6654 = vmatmul.mubr.f32.gmra.mrb[18].mxu1 %v3216_v58  ;;  %v3225_v29 = vsub.f32 %v10182_v10, %v11416_v26  ;;  %v3235_v36 = vsub.f32 %v10153_v8, %v11419_v31 }
 0x3cf   : > { %v10282_v53 = vsub.f32 %v5432_v4, %v5432_v4  ;;  %v5199_v30 = vadd.f32 %v5432_v4, %v5198_v42  ;;  %5039 = vst.msk [vmem:[%s9809_s26 + $0xd8] sm:$0xff] %vm5011_vm3, %v7833_v3  ;;  %v7831_v23 = vcvt.f32.s32 %v7830_v1  ;;  %v5435_v20 = vsel %vm11422_vm0, 1.0, %v11815_v61 }
 0x3d0   : > { %v7836_v58 = vtrunc.f32 %v10259_v14  ;;  %v11425_v50 = vand.u32 4294901760, %v10214_v43  ;;  %v10292_v26 = vpop.xlane.xlu1 %2843  ;;  %v3226_v10 = vand.u32 4294901760, %v3225_v29  ;;  %v3236_v31 = vand.u32 4294901760, %v3235_v36 }
 0x3d1   : > { %11858 = vst [vmem:[#allocation57_spill] sm:$0xff] %v10292_v26  ;;  %v10294_v8 = vsub.f32 %v5435_v20, %v5435_v20  ;;  %v11424_v42 = vand.u32 4294901760, %v10188_v52  ;;  %5038 = vst.msk [vmem:[%s9809_s26 + $0xd0] sm:$0xff] %vm5011_vm3, %v7831_v23  ;;  %v5200_v1 = vadd.f32 %v5433_v51, %v5199_v30  ;;  %vm11432_vm0 = vcmp.eq.f32.partialorder %v9509_v22, %v10265_v11 }
 0x3d2   : > { %v7837_v3 = vcvt.f32.s32 %v7836_v58  ;;  %v3245_v4 = vsub.f32 %v10214_v43, %v11425_v50  ;;  %6656 = vmatprep.mubr.f32.mxu1 %v3226_v10  ;;  %v5434_v36 = vsel %vm11432_vm0, 1.0, %v11815_v61  ;;  %v7834_v23 = vtrunc.f32 %v10265_v11  ;;  %v10314_v58 = vpop.xlane.xlu0 %2841 }
 0x3d3   : > { %v3255_v29 = vsub.f32 %v10188_v52, %v11424_v42  ;;  %vm2876_vm1 = vcmp.eq.f32.partialorder %v9509_v22, %v10292_v26  ;;  %11859 = vst [vmem:[#allocation62_spill] sm:$0xff] %v10314_v58  ;;  %6657 = vmatmul.mubr.f32.gmra.mrb[20].mxu1 %v3236_v31  ;;  %v10318_v51 = vsub.f32 %v5434_v36, %v5434_v36  ;;  %v7840_v14 = vtrunc.f32 %v10292_v26 }
 0x3d4   : > { %5041 = vst.msk [vmem:[%s9809_s26 + $0xe8] sm:$0xff] %vm5011_vm3, %v7837_v3  ;;  %v3246_v10 = vand.u32 4294901760, %v3245_v4  ;;  %v5201_v30 = vadd.f32 %v5434_v36, %v5200_v1  ;;  %v5437_v42 = vsel %vm2876_vm1, 1.0, %v11815_v61  ;;  %v7835_v52 = vcvt.f32.s32 %v7834_v23 }
 0x3d5   : > { %v3256_v50 = vand.u32 4294901760, %v3255_v29  ;;  %v10324_v43 = vsub.f32 %v5437_v42, %v5437_v42  ;;  %v11437_v31 = vand.u32 4294901760, %v10250_v38  ;;  %v11440_v3 = vand.u32 4294901760, %v10224_v6 }
 0x3d6   : > { %6659 = vmatprep.mubr.f32.mxu1 %v3246_v10  ;;  %v5202_v4 = vadd.f32 %v5435_v20, %v5201_v30  ;;  %vm2875_vm0 = vcmp.eq.f32.partialorder %v9509_v22, %v10314_v58  ;;  %5040 = vst.msk [vmem:[%s9809_s26 + $0xe0] sm:$0xff] %vm5011_vm3, %v7835_v52  ;;  %v7841_v1 = vcvt.f32.s32 %v7840_v14  ;;  %v7838_v36 = vtrunc.f32 %v10314_v58 }
 0x3d7   : > { %v5436_v29 = vsel %vm2875_vm0, 1.0, %v11815_v61  ;;  %v11452_v23 = vand.u32 4294901760, %v10282_v53  ;;  %6660 = vmatmul.mubr.f32.gmra.mrb[22].mxu1 %v3256_v50  ;;  %v3265_v20 = vsub.f32 %v10250_v38, %v11437_v31  ;;  %v3275_v52 = vsub.f32 %v10224_v6, %v11440_v3 }
 0x3d8   : > { %v10345_v14 = vsub.f32 %v5436_v29, %v5436_v29  ;;  %v5203_v10 = vadd.f32 %v5436_v29, %v5202_v4  ;;  %5043 = vst.msk [vmem:[%s9809_s26 + $0xf8] sm:$0xff] %vm5011_vm3, %v7841_v1  ;;  %v7839_v61 = vcvt.f32.s32 %v7838_v36  ;;  %v11451_v50 = vand.u32 4294901760, %v10256_v5 }
 0x3d9   : > { %v3285_v30 = vsub.f32 %v10282_v53, %v11452_v23  ;;  %v11441_v26 = vand.u32 4294901760, %v10318_v51  ;;  %v3266_v58 = vand.u32 4294901760, %v3265_v20  ;;  %v3276_v31 = vand.u32 4294901760, %v3275_v52  ;;  %v11896_v23 = vld [vmem:[#allocation79_spill] sm:$0xff] }
 0x3da   : > { %v10354_v38 = vadd.f32 %v5437_v42, %v5203_v10  ;;  %v11450_v3 = vand.u32 4294901760, %v10294_v8  ;;  %5042 = vst.msk [vmem:[%s9809_s26 + $0xf0] sm:$0xff] %vm5011_vm3, %v7839_v61  ;;  %v3295_v1 = vsub.f32 %v10256_v5, %v11451_v50  ;;  %v11447_v36 = vand.u32 4294901760, %v10345_v14  ;;  %v11895_v50 = vld [vmem:[#allocation64_spill] sm:$0xff] }
 0x3db   : > { %v3286_v4 = vand.u32 4294901760, %v3285_v30  ;;  %v3305_v29 = vsub.f32 %v10318_v51, %v11441_v26  ;;  %6662 = vmatprep.mubr.f32.mxu1 %v3266_v58  ;;  %v11446_v61 = vand.u32 4294901760, %v10324_v43  ;;  %vm11861_vm3 = vcmp.eq.f32.partialorder %v9509_v22, %v9996_v59  ;;  %v11915_v59 = vld [vmem:[#allocation15_spill] sm:$0xff] }
 0x3dc   : > { %11860 = vst [vmem:[#allocation58_spill] sm:$0xff] %v10354_v38  ;;  %6663 = vmatmul.mubr.f32.gmra.mrb[24].mxu1 %v3276_v31  ;;  %v3325_v20 = vsub.f32 %v10345_v14, %v11447_v36  ;;  %v3296_v52 = vand.u32 4294901760, %v3295_v1  ;;  %v3315_v10 = vsub.f32 %v10294_v8, %v11450_v3  ;;  %v7334_v1 = vpack.c.bf16 %v9664_v13, %v9659_v7  ;;  %v11892_v36 = vld [vmem:[#allocation46_spill] sm:$0xff]  ;;  %v11894_v3 = vld [vmem:[#allocation8_spill] sm:$0xff] }
 0x3dd   : > { %6665 = vmatprep.mubr.f32.mxu1 %v3286_v4  ;;  %v3306_v42 = vand.u32 4294901760, %v3305_v29  ;;  %v3335_v58 = vsub.f32 %v10324_v43, %v11446_v61  ;;  %v11448_v4 = vmov 1.0   ;;  %v7342_v29 = vpack.c.bf16 %v9684_v17, %v9679_v12  ;;  %v11891_v61 = vld [vmem:[#allocation5_spill] sm:$0xff]  ;;  %v11897_v38 = vld [vmem:[#allocation18_spill] sm:$0xff] }
 0x3de   : > { %v3326_v30 = vand.u32 4294901760, %v3325_v20  ;;  %v3316_v26 = vand.u32 4294901760, %v3315_v10  ;;  %v11876_v20 = vld [vmem:[#allocation56_spill] sm:$0xff]  ;;  %v11881_v10 = vld [vmem:[#allocation47_spill] sm:$0xff]  ;;  %v11931_v13 = vand.u32 4294901760, %v9684_v17 }
 0x3df   : > { %v3336_v31 = vand.u32 4294901760, %v3335_v58  ;;  %v11898_v58 = vld [vmem:[#allocation76_spill] sm:$0xff]  ;;  %v11940_v17 = vld [vmem:[#allocation35_spill] sm:$0xff] }
 0x3e0   : > { %6666 = vmatmul.mubr.f32.gmra.mrb[26].mxu1 %v3296_v52  ;;  %v11878_v52 = vld [vmem:[#allocation42_spill] sm:$0xff] }
 0x3e1   : > { %6668 = vmatprep.mubr.f32.mxu1 %v3306_v42  ;;  %v11874_v42 = vld [vmem:[#allocation39_spill] sm:$0xff] }
 0x3e4   : > { %6669 = vmatmul.mubr.f32.gmra.mrb[28].mxu1 %v3316_v26  ;;  %v7338_v26 = vpack.c.bf16 %v9674_v55, %v9669_v27  ;;  %v11934_v55 = vld [vmem:[#allocation34_spill] sm:$0xff] }
 0x3e5   : > { %6671 = vmatprep.mubr.f32.mxu1 %v3326_v30  ;;  %v11899_v30 = vld [vmem:[#allocation89_spill] sm:$0xff] }
 0x3e8   : > { %6672 = vmatmul.mubr.f32.gmra.mrb[30].mxu1 %v3336_v31  ;;  %v11885_v31 = vld [vmem:[#allocation43_spill] sm:$0xff] }
 0x3e9   : > { %6706 = vmatprep.mubr.msk.f32.mxu1 %vm2845_vm5, %v11448_v4 }
 0x3ec   : > { %6707 = vmatmul.mubr.msk.f32.vlgmr.msra.gmra.mrb[0].mxu1 %vm2846_vm4, %v11448_v4 }
 0x3ed   : > { %6709 = vmatprep.mubr.msk.f32.mxu1 %vm2847_vm7, %v11448_v4  ;;  %7333 = vmatpush3.bf16.msra.mxu1 %v9844_v45  ;;  %v7354_v45 = vpack.c.bf16 %v9718_v49, %v9713_v19 }
 0x3ee   : > { %7335 = vmatprep.subr.bf16.mxu1 %v7334_v1 }
 0x3f0   : > { %6710 = vmatmul.mubr.msk.f32.gmra.mrb[2].mxu1 %vm2848_vm6, %v11448_v4 }
 0x3f1   : > { %6712 = vmatprep.mubr.msk.f32.mxu1 %vm2849_vm9, %v11448_v4  ;;  %7337 = vmatpush3.bf16.msra.mxu1 %v7334_v1  ;;  %v11886_v1 = vld [vmem:[#allocation37_spill] sm:$0xff] }
 0x3f2   : > { %7339 = vmatprep.subr.bf16.mxu1 %v7338_v26  ;;  %v11924_v40 = vand.u32 4294901760, %v11886_v1 }
 0x3f4   : > { %6713 = vmatmul.mubr.msk.f32.gmra.mrb[4].mxu1 %vm2850_vm8, %v11448_v4 }
 0x3f5   : > { %6715 = vmatprep.mubr.msk.f32.mxu1 %vm2851_vm11, %v11448_v4  ;;  %7341 = vmatpush3.bf16.msra.mxu1 %v7338_v26  ;;  %v11887_v26 = vld [vmem:[#allocation44_spill] sm:$0xff] }
 0x3f6   : > { %7343 = vmatprep.subr.bf16.mxu1 %v7342_v29  ;;  %v11925_v16 = vand.u32 4294901760, %v11887_v26 }
 0x3f8   : > { %6716 = vmatmul.mubr.msk.f32.gmra.mrb[6].mxu1 %vm2852_vm10, %v11448_v4 }
 0x3f9   : > { %6718 = vmatprep.mubr.msk.f32.mxu1 %vm2853_vm13, %v11448_v4  ;;  %7345 = vmatpush3.bf16.msra.mxu1 %v7342_v29  ;;  %v11888_v29 = vld [vmem:[#allocation59_spill] sm:$0xff] }
 0x3fa   : > { %7347 = vmatprep.subr.bf16.mxu1 %v9766_v54 }
 0x3fc   : > { %6719 = vmatmul.mubr.msk.f32.gmra.mrb[8].mxu1 %vm11445_vm12, %v11448_v4  ;;  %vm11869_vm12 = vcmp.eq.f32.partialorder %v9509_v22, %v10134_v41 }
 0x3fd   : > { %6721 = vmatprep.mubr.msk.f32.mxu1 %vm11444_vm15, %v11448_v4  ;;  %7349 = vmatpush3.bf16.msra.mxu1 %v9766_v54  ;;  %v7358_v54 = vpack.c.bf16 %v9730_v47, %v9725_v48  ;;  %vm11864_vm15 = vcmp.eq.f32.partialorder %v9509_v22, %v10073_v33  ;;  %v11912_v33 = vld [vmem:[#allocation54_spill] sm:$0xff] }
 0x3fe   : > { %7351 = vmatprep.subr.bf16.mxu1 %v9803_v34 }
 0x400   : > { %6722 = vmatmul.mubr.msk.f32.gmra.mrb[10].mxu1 %vm11442_vm14, %v11448_v4  ;;  %vm11862_vm14 = vcmp.eq.f32.partialorder %v9509_v22, %v10043_v46  ;;  %v11914_v46 = vld [vmem:[#allocation16_spill] sm:$0xff] }
 0x401   : > { %6724 = vmatprep.mubr.msk.f32.mxu1 %vm11443_vm2, %v11448_v4  ;;  %7353 = vmatpush3.bf16.msra.mxu1 %v9803_v34  ;;  %vm11863_vm2 = vcmp.eq.f32.partialorder %v9509_v22, %v10030_v2  ;;  %v11871_v34 = vld [vmem:[#allocation26_spill] sm:$0xff]  ;;  %v11913_v2 = vld [vmem:[#allocation52_spill] sm:$0xff] }
 0x402   : > { %7355 = vmatprep.subr.bf16.mxu1 %v7354_v45 }
 0x404   : > { %6725 = vmatmul.mubr.msk.f32.gmra.mrb[12].mxu1 %vm11861_vm3, %v11448_v4  ;;  %vm11865_vm3 = vcmp.eq.f32.partialorder %v9509_v22, %v10065_v37  ;;  %v11911_v37 = vld [vmem:[#allocation40_spill] sm:$0xff] }
 0x405   : > { %6727 = vmatprep.mubr.msk.f32.mxu1 %vm11862_vm14, %v11448_v4  ;;  %7357 = vmatpush3.bf16.msra.mxu1 %v7354_v45  ;;  %vm11866_vm14 = vcmp.eq.f32.partialorder %v9509_v22, %v10108_v63  ;;  %v11889_v45 = vld [vmem:[#allocation9_spill] sm:$0xff] }
 0x406   : > { %7359 = vmatprep.subr.bf16.mxu1 %v7358_v54 }
 0x408   : > { %6728 = vmatmul.mubr.msk.f32.gmra.mrb[14].mxu1 %vm11863_vm2, %v11448_v4  ;;  %vm11867_vm2 = vcmp.eq.f32.partialorder %v9509_v22, %v10101_v32 }
 0x409   : > { %6730 = vmatprep.mubr.msk.f32.mxu1 %vm11864_vm15, %v11448_v4  ;;  %7361 = vmatpush3.bf16.msra.mxu1 %v7358_v54  ;;  %vm11868_vm15 = vcmp.eq.f32.partialorder %v9509_v22, %v10144_v56  ;;  %v11890_v54 = vld [vmem:[#allocation48_spill] sm:$0xff]  ;;  %v11909_v56 = vld [vmem:[#allocation31_spill] sm:$0xff] }
 0x40a   : > { %7363 = vmatprep.subr.bf16.mxu1 %v9436_v24  ;;  %v11910_v32 = vand.u32 4294901760, %v11909_v56  ;;  %v11921_v56 = vand.u32 4294901760, %v11885_v31 }
 0x40c   : > { %6731 = vmatmul.mubr.msk.f32.gmra.mrb[16].mxu1 %vm11865_vm3, %v11448_v4  ;;  %vm11870_vm3 = vcmp.eq.f32.partialorder %v9509_v22, %v10178_v9  ;;  %v11907_v9 = vld [vmem:[#allocation30_spill] sm:$0xff] }
 0x40d   : > { %6733 = vmatprep.mubr.msk.f32.mxu1 %vm11866_vm14, %v11448_v4  ;;  %vm11872_vm14 = vcmp.eq.f32.partialorder %v9509_v22, %v11871_v34  ;;  %v11906_v34 = vld [vmem:[#allocation29_spill] sm:$0xff]  ;;  %v11908_v41 = vand.u32 4294901760, %v11907_v9 }
 0x40e   : > { %v11918_v9 = vld [vmem:[#allocation45_spill] sm:$0xff] }
 0x40f   : > { %v7394_v63 = vpack.c.bf16 %v11910_v32, %v11908_v41  ;;  %v11919_v32 = vld [vmem:[#allocation32_spill] sm:$0xff]  ;;  %v11920_v41 = vld [vmem:[#allocation49_spill] sm:$0xff] }
 0x410   : > { %6734 = vmatmul.mubr.msk.f32.gmra.mrb[18].mxu1 %vm11867_vm2, %v11448_v4  ;;  %vm11873_vm2 = vcmp.eq.f32.partialorder %v9509_v22, %v10206_v25  ;;  %v11905_v25 = vld [vmem:[#allocation50_spill] sm:$0xff] }
 0x411   : > { %6736 = vmatprep.mubr.msk.f32.mxu1 %vm11868_vm15, %v11448_v4  ;;  %vm11875_vm15 = vcmp.eq.f32.partialorder %v9509_v22, %v11874_v42  ;;  %v11904_v42 = vld [vmem:[#allocation22_spill] sm:$0xff] }
 0x414   : > { %6737 = vmatmul.mubr.msk.f32.gmra.mrb[20].mxu1 %vm11869_vm12, %v11448_v4  ;;  %vm11877_vm12 = vcmp.eq.f32.partialorder %v9509_v22, %v11876_v20  ;;  %v11903_v20 = vld [vmem:[#allocation6_spill] sm:$0xff] }
 0x415   : > { %6739 = vmatprep.mubr.msk.f32.mxu1 %vm11870_vm3, %v11448_v4  ;;  %vm11879_vm3 = vcmp.eq.f32.partialorder %v9509_v22, %v11878_v52  ;;  %v11902_v52 = vld [vmem:[#allocation27_spill] sm:$0xff] }
 0x418   : > { %6740 = vmatmul.mubr.msk.f32.gmra.mrb[22].mxu1 %vm11872_vm14, %v11448_v4  ;;  %vm11880_vm14 = vcmp.eq.f32.partialorder %v9509_v22, %v10265_v11  ;;  %v11901_v11 = vld [vmem:[#allocation87_spill] sm:$0xff] }
 0x419   : > { %6742 = vmatprep.mubr.msk.f32.mxu1 %vm11873_vm2, %v11448_v4  ;;  %vm11882_vm2 = vcmp.eq.f32.partialorder %v9509_v22, %v11881_v10  ;;  %v11900_v10 = vld [vmem:[#allocation19_spill] sm:$0xff] }
 0x41c   : > { %6743 = vmatmul.mubr.msk.f32.gmra.mrb[24].mxu1 %vm11875_vm15, %v11448_v4 }
 0x41d   : > { %6745 = vmatprep.mubr.msk.f32.mxu1 %vm11877_vm12, %v11448_v4 }
 0x420   : > { %6746 = vmatmul.mubr.msk.f32.gmra.mrb[26].mxu1 %vm11879_vm3, %v11448_v4 }
 0x421   : > { %6748 = vmatprep.mubr.msk.f32.mxu1 %vm11880_vm14, %v11448_v4 }
 0x424   : > { %6749 = vmatmul.mubr.msk.f32.gmra.mrb[28].mxu1 %vm11882_vm2, %v11448_v4 }
 0x425   : > { %6751 = vmatprep.mubr.msk.f32.mxu1 %vm2875_vm0, %v11448_v4 }
 0x428   : > { %6752 = vmatmul.mubr.msk.f32.gmra.mrb[30].mxu1 %vm2876_vm1, %v11448_v4  ;;  %v11893_v4 = vld [vmem:[#allocation66_spill] sm:$0xff] }
 0x429   : > { %6786 = vmatprep.mubr.f32.mxu1 %v11885_v31  ;;  %v11928_v31 = vand.u32 4294901760, %v11889_v45 }
 0x42c   : > { %6787 = vmatmul.mubr.f32.vlgmr.msra.gmra.mrb[0].mxu1 %v11886_v1  ;;  %v11942_v1 = vld [vmem:[#allocation36_spill] sm:$0xff] }
 0x42d   : > { %6789 = vmatprep.mubr.f32.mxu1 %v11887_v26  ;;  %7365 = vmatpush3.bf16.msra.mxu1 %v9436_v24 }
 0x42e   : > { %7367 = vmatprep.subr.bf16.mxu1 %v11888_v29 }
 0x430   : > { %6790 = vmatmul.mubr.f32.gmra.mrb[2].mxu1 %v11889_v45  ;;  %v11945_v45 = vand.u32 4294901760, %v11899_v30 }
 0x431   : > { %6792 = vmatprep.mubr.f32.mxu1 %v11890_v54  ;;  %7369 = vmatpush3.bf16.msra.mxu1 %v11888_v29 }
 0x432   : > { %7371 = vmatprep.subr.bf16.mxu1 %v11891_v61 }
 0x434   : > { %6793 = vmatmul.mubr.f32.gmra.mrb[4].mxu1 %v11892_v36 }
 0x435   : > { %6795 = vmatprep.mubr.f32.mxu1 %v11893_v4  ;;  %7373 = vmatpush3.bf16.msra.mxu1 %v11891_v61 }
 0x436   : > { %7375 = vmatprep.subr.bf16.mxu1 %v11894_v3 }
 0x438   : > { %6796 = vmatmul.mubr.f32.gmra.mrb[6].mxu1 %v11895_v50 }
 0x439   : > { %6798 = vmatprep.mubr.f32.mxu1 %v11896_v23  ;;  %7377 = vmatpush3.bf16.msra.mxu1 %v11894_v3 }
 0x43a   : > { %7379 = vmatprep.subr.bf16.mxu1 %v11897_v38 }
 0x43c   : > { %6799 = vmatmul.mubr.f32.gmra.mrb[8].mxu1 %v11898_v58 }
 0x43d   : > { %6801 = vmatprep.mubr.f32.mxu1 %v11899_v30  ;;  %7381 = vmatpush3.bf16.msra.mxu1 %v11897_v38  ;;  %v11926_v38 = vand.u32 4294901760, %v9669_v27  ;;  %v11933_v27 = vand.u32 4294901760, %v11893_v4  ;;  %v11943_v4 = vand.u32 4294901760, %v11942_v1  ;;  %v11951_v30 = vand.u32 4294901760, %v9730_v47  ;;  %v12012_v1 = vld [vmem:[#allocation56_spill] sm:$0xff] }
 0x43e   : > { %7383 = vmatprep.subr.bf16.mxu1 %v11900_v10  ;;  %v11957_v47 = vand.u32 4294901760, %v11914_v46 }
 0x43f   : > { %v7402_v62 = vpack.c.bf16 %v11927_v57, %v11926_v38  ;;  %v11935_v57 = vand.u32 4294901760, %v11934_v55  ;;  %v11994_v55 = vld [vmem:[#allocation41_spill] sm:$0xff] }
 0x440   : > { %6802 = vmatmul.mubr.f32.gmra.mrb[10].mxu1 %v11901_v11 }
 0x441   : > { %6804 = vmatprep.mubr.f32.mxu1 %v11902_v52  ;;  %7385 = vmatpush3.bf16.msra.mxu1 %v11900_v10 }
 0x442   : > { %7387 = vmatprep.subr.bf16.mxu1 %v11903_v20 }
 0x444   : > { %6805 = vmatmul.mubr.f32.gmra.mrb[12].mxu1 %v11904_v42 }
 0x445   : > { %6807 = vmatprep.mubr.f32.mxu1 %v11905_v25  ;;  %7389 = vmatpush3.bf16.msra.mxu1 %v11903_v20  ;;  %v11916_v20 = vld [vmem:[#allocation33_spill] sm:$0xff] }
 0x446   : > { %7391 = vmatprep.subr.bf16.mxu1 %v11906_v34 }
 0x448   : > { %6808 = vmatmul.mubr.f32.gmra.mrb[14].mxu1 %v11911_v37 }
 0x449   : > { %6810 = vmatprep.mubr.f32.mxu1 %v11912_v33  ;;  %7393 = vmatpush3.bf16.msra.mxu1 %v11906_v34  ;;  %v11922_v34 = vand.u32 4294901760, %v9659_v7  ;;  %v11929_v7 = vand.u32 4294901760, %v11890_v54 }
 0x44a   : > { %7395 = vmatprep.subr.bf16.mxu1 %v7394_v63 }
 0x44b   : > { %v7398_v10 = vpack.c.bf16 %v11923_v0, %v11922_v34  ;;  %v11930_v0 = vand.u32 4294901760, %v9679_v12  ;;  %v11939_v12 = vand.u32 4294901760, %v11896_v23  ;;  %v11947_v23 = vand.u32 4294901760, %v9718_v49 }
 0x44c   : > { %6811 = vmatmul.mubr.f32.gmra.mrb[16].mxu1 %v11913_v2  ;;  %v11954_v49 = vand.u32 4294901760, %v11911_v37  ;;  %v11960_v37 = vand.u32 4294901760, %v11917_v44 }
 0x44d   : > { %6813 = vmatprep.mubr.f32.mxu1 %v11914_v46  ;;  %v11964_v46 = vand.u32 4294901760, %v10224_v6 }
 0x450   : > { %6814 = vmatmul.mubr.f32.gmra.mrb[18].mxu1 %v11915_v59 }
 0x451   : > { %6816 = vmatprep.mubr.f32.mxu1 %v11916_v20 }
 0x454   : > { %6817 = vmatmul.mubr.f32.gmra.mrb[20].mxu1 %v11917_v44  ;;  %v11967_v44 = vand.u32 4294901760, %v10318_v51 }
 0x455   : > { %6819 = vmatprep.mubr.f32.mxu1 %v11918_v9 }
 0x458   : > { %6820 = vmatmul.mubr.f32.gmra.mrb[22].mxu1 %v11919_v32 }
 0x459   : > { %6822 = vmatprep.mubr.f32.mxu1 %v11920_v41 }
 0x45c   : > { %6823 = vmatmul.mubr.f32.gmra.mrb[24].mxu1 %v10224_v6  ;;  %v11971_v6 = vmov 1.0  }
 0x45d   : > { %6825 = vmatprep.mubr.f32.mxu1 %v10282_v53 }
 0x460   : > { %6826 = vmatmul.mubr.f32.gmra.mrb[26].mxu1 %v10256_v5 }
 0x461   : > { %6828 = vmatprep.mubr.f32.mxu1 %v10318_v51  ;;  %v11979_v51 = vld [vmem:[#allocation19_spill] sm:$0xff] }
 0x464   : > { %6829 = vmatmul.mubr.f32.gmra.mrb[28].mxu1 %v10294_v8 }
 0x465   : > { %6831 = vmatprep.mubr.f32.mxu1 %v10345_v14 }
 0x468   : > { %6832 = vmatmul.mubr.f32.gmra.mrb[30].mxu1 %v10324_v43 }
 0x469   : > { %6866 = vmatprep.mubr.f32.mxu1 %v11921_v56  ;;  %v11948_v56 = vand.u32 4294901760, %v11901_v11  ;;  %v11955_v11 = vand.u32 4294901760, %v11912_v33  ;;  %v11961_v33 = vand.u32 4294901760, %v11918_v9  ;;  %v11968_v9 = vand.u32 4294901760, %v10294_v8 }
 0x46c   : > { %6867 = vmatmul.mubr.f32.vlgmr.msra.gmra.mrb[0].mxu1 %v11924_v40  ;;  %v11932_v40 = vand.u32 4294901760, %v11892_v36  ;;  %v11941_v36 = vand.u32 4294901760, %v11940_v17  ;;  %v12008_v17 = vld [vmem:[#allocation38_spill] sm:$0xff] }
 0x46d   : > { %6869 = vmatprep.mubr.f32.mxu1 %v11925_v16  ;;  %7397 = vmatpush3.bf16.msra.mxu1 %v7394_v63  ;;  %v7406_v16 = vpack.c.bf16 %v11931_v13, %v11930_v0  ;;  %v11936_v63 = vld [vmem:[#allocation7_spill] sm:$0xff]  ;;  %v11952_v0 = vand.u32 4294901760, %v11904_v42  ;;  %v11959_v42 = vand.u32 4294901760, %v11916_v20  ;;  %v11966_v20 = vand.u32 4294901760, %v10256_v5  ;;  %v11974_v5 = vld [vmem:[#allocation18_spill] sm:$0xff]  ;;  %v11987_v13 = vld [vmem:[#allocation28_spill] sm:$0xff] }
 0x46e   : > { %7399 = vmatprep.subr.bf16.mxu1 %v7398_v10  ;;  %v11937_v38 = vand.u32 4294901760, %v11936_v63  ;;  %v7414_v26 = vpack.c.bf16 %v11943_v4, %v11941_v36  ;;  %v11998_v63 = vld [vmem:[#allocation53_spill] sm:$0xff]  ;;  %v12010_v36 = vld [vmem:[#allocation39_spill] sm:$0xff]  ;;  %v12014_v4 = vld [vmem:[#allocation42_spill] sm:$0xff] }
 0x470   : > { %6870 = vmatmul.mubr.f32.gmra.mrb[2].mxu1 %v11928_v31  ;;  %v7410_v34 = vpack.c.bf16 %v11937_v38, %v11935_v57  ;;  %v11949_v31 = vand.u32 4294901760, %v11902_v52  ;;  %v11962_v52 = vand.u32 4294901760, %v11919_v32  ;;  %v11969_v32 = vand.u32 4294901760, %v10345_v14  ;;  %v11980_v14 = vld [vmem:[#allocation81_spill] sm:$0xff]  ;;  %v11996_v57 = vld [vmem:[#allocation55_spill] sm:$0xff] }
 0x471   : > { %6872 = vmatprep.mubr.f32.mxu1 %v11929_v7  ;;  %7401 = vmatpush3.bf16.msra.mxu1 %v7398_v10  ;;  %v11938_v10 = vand.u32 4294901760, %v11895_v50  ;;  %v11946_v50 = vand.u32 4294901760, %v9713_v19  ;;  %v11953_v19 = vand.u32 4294901760, %v11905_v25  ;;  %v11958_v25 = vand.u32 4294901760, %v11915_v59  ;;  %v12000_v38 = vld [vmem:[#allocation21_spill] sm:$0xff] }
 0x472   : > { %7403 = vmatprep.subr.bf16.mxu1 %v7402_v62  ;;  %v11965_v59 = vand.u32 4294901760, %v10282_v53  ;;  %v11977_v53 = vld [vmem:[#allocation82_spill] sm:$0xff]  ;;  %vm11981_vm3 = vcmp.eq.f32.partialorder %v9509_v22, %v11980_v14 }
 0x473   : > { %v7418_v54 = vpack.c.bf16 %v11947_v23, %v11946_v50  ;;  %vm11978_vm12 = vcmp.eq.f32.partialorder %v9509_v22, %v11977_v53  ;;  %v7915_v50 = vld [vmem:[%s8149_s9 + $0x60] sm:$0xff] }
 0x474   : > { %6873 = vmatmul.mubr.f32.gmra.mrb[4].mxu1 %v11932_v40  ;;  %v11990_v40 = vld [vmem:[#allocation24_spill] sm:$0xff] }
 0x475   : > { %6875 = vmatprep.mubr.f32.mxu1 %v11933_v27  ;;  %7405 = vmatpush3.bf16.msra.mxu1 %v7402_v62  ;;  %v11944_v62 = vand.u32 4294901760, %v11898_v58  ;;  %v11950_v58 = vand.u32 4294901760, %v9725_v48  ;;  %v11956_v48 = vand.u32 4294901760, %v11913_v2  ;;  %v11963_v2 = vand.u32 4294901760, %v11920_v41  ;;  %v11992_v27 = vld [vmem:[#allocation51_spill] sm:$0xff] }
 0x476   : > { %7407 = vmatprep.subr.bf16.mxu1 %v7406_v16  ;;  %v11970_v41 = vand.u32 4294901760, %v10324_v43  ;;  %v11975_v43 = vld [vmem:[#allocation71_spill] sm:$0xff] }
 0x477   : > { %v7422_v7 = vpack.c.bf16 %v11951_v30, %v11950_v58  ;;  %vm11976_vm15 = vcmp.eq.f32.partialorder %v9509_v22, %v11975_v43  ;;  %v7905_v30 = vld [vmem:[%s8149_s9 + $0x10] sm:$0xff] }
 0x478   : > { %6876 = vmatmul.mubr.f32.gmra.mrb[6].mxu1 %v11938_v10  ;;  %v12004_v10 = vld [vmem:[#allocation25_spill] sm:$0xff] }
 0x479   : > { %6878 = vmatprep.mubr.f32.mxu1 %v11939_v12  ;;  %7409 = vmatpush3.bf16.msra.mxu1 %v7406_v16  ;;  %v11989_v16 = vld [vmem:[#allocation29_spill] sm:$0xff]  ;;  %v12006_v12 = vld [vmem:[#allocation26_spill] sm:$0xff] }
 0x47a   : > { %7411 = vmatprep.subr.bf16.mxu1 %v7410_v34 }
 0x47c   : > { %6879 = vmatmul.mubr.f32.gmra.mrb[8].mxu1 %v11944_v62  ;;  %v12018_v62 = vld [vmem:[#allocation47_spill] sm:$0xff] }
 0x47d   : > { %6881 = vmatprep.mubr.f32.mxu1 %v11945_v45  ;;  %7413 = vmatpush3.bf16.msra.mxu1 %v7410_v34  ;;  %v12002_v34 = vld [vmem:[#allocation17_spill] sm:$0xff] }
 0x47e   : > { %7415 = vmatprep.subr.bf16.mxu1 %v7414_v26 }
 0x480   : > { %6882 = vmatmul.mubr.f32.gmra.mrb[10].mxu1 %v11948_v56 }
 0x481   : > { %6884 = vmatprep.mubr.f32.mxu1 %v11949_v31  ;;  %7417 = vmatpush3.bf16.msra.mxu1 %v7414_v26  ;;  %v12016_v26 = vld [vmem:[#allocation10_spill] sm:$0xff] }
 0x482   : > { %7419 = vmatprep.subr.bf16.mxu1 %v7418_v54 }
 0x484   : > { %6885 = vmatmul.mubr.f32.gmra.mrb[12].mxu1 %v11952_v0 }
 0x485   : > { %6887 = vmatprep.mubr.f32.mxu1 %v11953_v19  ;;  %7421 = vmatpush3.bf16.msra.mxu1 %v7418_v54  ;;  %v7904_v54 = vld [vmem:[%s8149_s9 + $0x18] sm:$0xff] }
 0x486   : > { %7423 = vmatprep.subr.bf16.mxu1 %v7422_v7 }
 0x488   : > { %6888 = vmatmul.mubr.f32.gmra.mrb[14].mxu1 %v11954_v49 }
 0x489   : > { %6890 = vmatprep.mubr.f32.mxu1 %v11955_v11  ;;  %7425 = vmatpush3.bf16.msra.mxu1 %v7422_v7 }
 0x48a   : > { %7427 = vmatprep.subr.bf16.mxu1 %v9436_v24 }
 0x48c   : > { %6891 = vmatmul.mubr.f32.gmra.mrb[16].mxu1 %v11956_v48  ;;  %v7906_v48 = vld [vmem:[%s8149_s9 + $0x28] sm:$0xff] }
 0x48d   : > { %6893 = vmatprep.mubr.f32.mxu1 %v11957_v47 }
 0x490   : > { %6894 = vmatmul.mubr.f32.gmra.mrb[18].mxu1 %v11958_v25 }
 0x491   : > { %6896 = vmatprep.mubr.f32.mxu1 %v11959_v42 }
 0x494   : > { %6897 = vmatmul.mubr.f32.gmra.mrb[20].mxu1 %v11960_v37  ;;  %v7907_v37 = vld [vmem:[%s8149_s9 + $0x20] sm:$0xff] }
 0x495   : > { %6899 = vmatprep.mubr.f32.mxu1 %v11961_v33 }
 0x498   : > { %6900 = vmatmul.mubr.f32.gmra.mrb[22].mxu1 %v11962_v52 }
 0x499   : > { %6902 = vmatprep.mubr.f32.mxu1 %v11963_v2 }
 0x49c   : > { %6903 = vmatmul.mubr.f32.gmra.mrb[24].mxu1 %v11964_v46 }
 0x49d   : > { %6905 = vmatprep.mubr.f32.mxu1 %v11965_v59 }
 0x4a0   : > { %6906 = vmatmul.mubr.f32.gmra.mrb[26].mxu1 %v11966_v20  ;;  %v7908_v20 = vld [vmem:[%s8149_s9 + $0x38] sm:$0xff] }
 0x4a1   : > { %6908 = vmatprep.mubr.f32.mxu1 %v11967_v44 }
 0x4a4   : > { %6909 = vmatmul.mubr.f32.gmra.mrb[28].mxu1 %v11968_v9 }
 0x4a5   : > { %6911 = vmatprep.mubr.f32.mxu1 %v11969_v32 }
 0x4a8   : > { %6912 = vmatmul.mubr.f32.gmra.mrb[30].mxu1 %v11970_v41  ;;  %v7909_v41 = vld [vmem:[%s8149_s9 + $0x30] sm:$0xff] }
 0x4a9   : > { %6946 = vmatprep.mubr.msk.f32.mxu1 %vm2845_vm5, %v11971_v6 }
 0x4ac   : > { %6947 = vmatmul.mubr.msk.f32.vlgmr.msra.gmra.mrb[0].mxu1 %vm2846_vm4, %v11971_v6 }
 0x4ad   : > { %6949 = vmatprep.mubr.msk.f32.mxu1 %vm2847_vm7, %v11971_v6  ;;  %7429 = vmatpush3.bf16.msra.mxu1 %v9436_v24 }
 0x4ae   : > { %7431 = vmatprep.subr.bf16.mxu1 %v11888_v29 }
 0x4b0   : > { %6950 = vmatmul.mubr.msk.f32.gmra.mrb[2].mxu1 %vm2848_vm6, %v11971_v6 }
 0x4b1   : > { %6952 = vmatprep.mubr.msk.f32.mxu1 %vm2849_vm9, %v11971_v6  ;;  %7433 = vmatpush3.bf16.msra.mxu1 %v11888_v29  ;;  %v11985_v29 = vld [vmem:[#allocation12_spill] sm:$0xff] }
 0x4b2   : > { %7435 = vmatprep.subr.bf16.mxu1 %v11891_v61  ;;  %vm11986_vm2 = vcmp.eq.f32.partialorder %v9509_v22, %v11985_v29 }
 0x4b4   : > { %6953 = vmatmul.mubr.msk.f32.gmra.mrb[4].mxu1 %vm2850_vm8, %v11971_v6 }
 0x4b5   : > { %6955 = vmatprep.mubr.msk.f32.mxu1 %vm2851_vm11, %v11971_v6  ;;  %7437 = vmatpush3.bf16.msra.mxu1 %v11891_v61  ;;  %v11984_v61 = vld [vmem:[#allocation6_spill] sm:$0xff] }
 0x4b6   : > { %7439 = vmatprep.subr.bf16.mxu1 %v11894_v3 }
 0x4b8   : > { %6956 = vmatmul.mubr.msk.f32.gmra.mrb[6].mxu1 %vm2852_vm10, %v11971_v6 }
 0x4b9   : > { %6958 = vmatprep.mubr.msk.f32.mxu1 %vm2853_vm13, %v11971_v6  ;;  %7441 = vmatpush3.bf16.msra.mxu1 %v11894_v3  ;;  %v11982_v3 = vld [vmem:[#allocation13_spill] sm:$0xff] }
 0x4ba   : > { %7443 = vmatprep.subr.bf16.mxu1 %v11974_v5  ;;  %vm11983_vm14 = vcmp.eq.f32.partialorder %v9509_v22, %v11982_v3 }
 0x4bc   : > { %6959 = vmatmul.mubr.msk.f32.gmra.mrb[8].mxu1 %vm11976_vm15, %v11971_v6  ;;  %vm11988_vm15 = vcmp.eq.f32.partialorder %v9509_v22, %v11987_v13 }
 0x4bd   : > { %6961 = vmatprep.mubr.msk.f32.mxu1 %vm11978_vm12, %v11971_v6  ;;  %7445 = vmatpush3.bf16.msra.mxu1 %v11974_v5  ;;  %vm11991_vm12 = vcmp.eq.f32.partialorder %v9509_v22, %v11990_v40 }
 0x4be   : > { %7447 = vmatprep.subr.bf16.mxu1 %v11979_v51 }
 0x4c0   : > { %6962 = vmatmul.mubr.msk.f32.gmra.mrb[10].mxu1 %vm11981_vm3, %v11971_v6  ;;  %vm11993_vm3 = vcmp.eq.f32.partialorder %v9509_v22, %v11992_v27 }
 0x4c1   : > { %6964 = vmatprep.mubr.msk.f32.mxu1 %vm11983_vm14, %v11971_v6  ;;  %7449 = vmatpush3.bf16.msra.mxu1 %v11979_v51  ;;  %vm11995_vm14 = vcmp.eq.f32.partialorder %v9509_v22, %v11994_v55 }
 0x4c2   : > { %7451 = vmatprep.subr.bf16.mxu1 %v11984_v61 }
 0x4c4   : > { %6965 = vmatmul.mubr.msk.f32.gmra.mrb[12].mxu1 %vm11986_vm2, %v11971_v6  ;;  %vm11997_vm2 = vcmp.eq.f32.partialorder %v9509_v22, %v11996_v57 }
 0x4c5   : > { %6967 = vmatprep.mubr.msk.f32.mxu1 %vm11988_vm15, %v11971_v6  ;;  %7453 = vmatpush3.bf16.msra.mxu1 %v11984_v61  ;;  %vm11999_vm15 = vcmp.eq.f32.partialorder %v9509_v22, %v11998_v63  ;;  %v7911_v61 = vld [vmem:[%s8149_s9 + $0x40] sm:$0xff] }
 0x4c6   : > { %7455 = vmatprep.subr.bf16.mxu1 %v11989_v16 }
 0x4c8   : > { %6968 = vmatmul.mubr.msk.f32.gmra.mrb[14].mxu1 %vm11991_vm12, %v11971_v6  ;;  %vm12001_vm12 = vcmp.eq.f32.partialorder %v9509_v22, %v12000_v38 }
 0x4c9   : > { %6970 = vmatprep.mubr.msk.f32.mxu1 %vm11993_vm3, %v11971_v6  ;;  %7457 = vmatpush3.bf16.msra.mxu1 %v11989_v16  ;;  %vm12003_vm3 = vcmp.eq.f32.partialorder %v9509_v22, %v12002_v34 }
 0x4cc   : > { %6971 = vmatmul.mubr.msk.f32.gmra.mrb[16].mxu1 %vm11995_vm14, %v11971_v6  ;;  %vm12005_vm14 = vcmp.eq.f32.partialorder %v9509_v22, %v12004_v10 }
 0x4cd   : > { %6973 = vmatprep.mubr.msk.f32.mxu1 %vm11997_vm2, %v11971_v6  ;;  %vm12007_vm2 = vcmp.eq.f32.partialorder %v9509_v22, %v12006_v12 }
 0x4d0   : > { %6974 = vmatmul.mubr.msk.f32.gmra.mrb[18].mxu1 %vm11999_vm15, %v11971_v6  ;;  %vm12009_vm15 = vcmp.eq.f32.partialorder %v9509_v22, %v12008_v17 }
 0x4d1   : > { %6976 = vmatprep.mubr.msk.f32.mxu1 %vm12001_vm12, %v11971_v6  ;;  %vm12011_vm12 = vcmp.eq.f32.partialorder %v9509_v22, %v12010_v36 }
 0x4d4   : > { %6977 = vmatmul.mubr.msk.f32.gmra.mrb[20].mxu1 %vm12003_vm3, %v11971_v6  ;;  %vm12013_vm3 = vcmp.eq.f32.partialorder %v9509_v22, %v12012_v1 }
 0x4d5   : > { %6979 = vmatprep.mubr.msk.f32.mxu1 %vm12005_vm14, %v11971_v6  ;;  %vm12015_vm14 = vcmp.eq.f32.partialorder %v9509_v22, %v12014_v4 }
 0x4d8   : > { %6980 = vmatmul.mubr.msk.f32.gmra.mrb[22].mxu1 %vm12007_vm2, %v11971_v6  ;;  %vm12017_vm2 = vcmp.eq.f32.partialorder %v9509_v22, %v12016_v26 }
 0x4d9   : > { %6982 = vmatprep.mubr.msk.f32.mxu1 %vm12009_vm15, %v11971_v6  ;;  %vm12019_vm15 = vcmp.eq.f32.partialorder %v9509_v22, %v12018_v62 }
 0x4dc   : > { %6983 = vmatmul.mubr.msk.f32.gmra.mrb[24].mxu1 %vm12011_vm12, %v11971_v6  ;;  %vm12031_vm12 = vcmp.eq.f32.partialorder %v9509_v22, %v11996_v57 }
 0x4dd   : > { %6985 = vmatprep.mubr.msk.f32.mxu1 %vm12013_vm3, %v11971_v6  ;;  %vm12032_vm3 = vcmp.eq.f32.partialorder %v9509_v22, %v11998_v63 }
 0x4e0   : > { %6986 = vmatmul.mubr.msk.f32.gmra.mrb[26].mxu1 %vm12015_vm14, %v11971_v6  ;;  %vm12033_vm14 = vcmp.eq.f32.partialorder %v9509_v22, %v12000_v38 }
 0x4e1   : > { %6988 = vmatprep.mubr.msk.f32.mxu1 %vm12017_vm2, %v11971_v6  ;;  %vm12034_vm2 = vcmp.eq.f32.partialorder %v9509_v22, %v12002_v34  ;;  %v7913_v34 = vld [vmem:[%s8149_s9 + $0x50] sm:$0xff] }
 0x4e4   : > { %6989 = vmatmul.mubr.msk.f32.gmra.mrb[28].mxu1 %vm12019_vm15, %v11971_v6  ;;  %vm12035_vm15 = vcmp.eq.f32.partialorder %v9509_v22, %v12004_v10 }
 0x4e5   : > { %6991 = vmatprep.mubr.msk.f32.mxu1 %vm2875_vm0, %v11971_v6 }
 0x4e8   : > { %6992 = vmatmul.mubr.msk.f32.gmra.mrb[30].mxu1 %vm2876_vm1, %v11971_v6 }
 0x4e9   : > { %7026 = vmatprep.mubr.msk.f32.mxu1 %vm2845_vm5, %v11971_v6  ;;  %vm12023_vm5 = vcmp.eq.f32.partialorder %v9509_v22, %v11977_v53  ;;  %v7910_v53 = vld [vmem:[%s8149_s9 + $0x48] sm:$0xff] }
 0x4ec   : > { %7027 = vmatmul.mubr.msk.f32.vlgmr.msra.gmra.mrb[0].mxu1 %vm2846_vm4, %v11971_v6  ;;  %vm12022_vm4 = vcmp.eq.f32.partialorder %v9509_v22, %v11975_v43 }
 0x4ed   : > { %7029 = vmatprep.mubr.msk.f32.mxu1 %vm2847_vm7, %v11971_v6  ;;  %vm12025_vm7 = vcmp.eq.f32.partialorder %v9509_v22, %v11982_v3 }
 0x4f0   : > { %7030 = vmatmul.mubr.msk.f32.gmra.mrb[2].mxu1 %vm2848_vm6, %v11971_v6  ;;  %vm12024_vm6 = vcmp.eq.f32.partialorder %v9509_v22, %v11980_v14 }
 0x4f1   : > { %7032 = vmatprep.mubr.msk.f32.mxu1 %vm2849_vm9, %v11971_v6  ;;  %vm12027_vm9 = vcmp.eq.f32.partialorder %v9509_v22, %v11987_v13 }
 0x4f4   : > { %7033 = vmatmul.mubr.msk.f32.gmra.mrb[4].mxu1 %vm2850_vm8, %v11971_v6  ;;  %vm12026_vm8 = vcmp.eq.f32.partialorder %v9509_v22, %v11985_v29 }
 0x4f5   : > { %7035 = vmatprep.mubr.msk.f32.mxu1 %vm2851_vm11, %v11971_v6  ;;  %vm12029_vm11 = vcmp.eq.f32.partialorder %v9509_v22, %v11992_v27 }
 0x4f8   : > { %7036 = vmatmul.mubr.msk.f32.gmra.mrb[6].mxu1 %vm2852_vm10, %v11971_v6  ;;  %vm12028_vm10 = vcmp.eq.f32.partialorder %v9509_v22, %v11990_v40 }
 0x4f9   : > { %7038 = vmatprep.mubr.msk.f32.mxu1 %vm2853_vm13, %v11971_v6  ;;  %vm12030_vm13 = vcmp.eq.f32.partialorder %v9509_v22, %v11994_v55  ;;  %v7912_v55 = vld [vmem:[%s8149_s9 + $0x58] sm:$0xff] }
 0x4fc   : > { %7039 = vmatmul.mubr.msk.f32.gmra.mrb[8].mxu1 %vm12022_vm4, %v11971_v6  ;;  %vm12036_vm4 = vcmp.eq.f32.partialorder %v9509_v22, %v12006_v12 }
 0x4fd   : > { %7041 = vmatprep.mubr.msk.f32.mxu1 %vm12023_vm5, %v11971_v6  ;;  %vm12037_vm5 = vcmp.eq.f32.partialorder %v9509_v22, %v12008_v17 }
 0x500   : > { %7042 = vmatmul.mubr.msk.f32.gmra.mrb[10].mxu1 %vm12024_vm6, %v11971_v6  ;;  %vm12038_vm6 = vcmp.eq.f32.partialorder %v9509_v22, %v12010_v36 }
 0x501   : > { %7044 = vmatprep.mubr.msk.f32.mxu1 %vm12025_vm7, %v11971_v6  ;;  %vm12039_vm7 = vcmp.eq.f32.partialorder %v9509_v22, %v12012_v1 }
 0x504   : > { %7045 = vmatmul.mubr.msk.f32.gmra.mrb[12].mxu1 %vm12026_vm8, %v11971_v6  ;;  %vm12040_vm8 = vcmp.eq.f32.partialorder %v9509_v22, %v12014_v4  ;;  %v7914_v4 = vld [vmem:[%s8149_s9 + $0x68] sm:$0xff] }
 0x505   : > { %7047 = vmatprep.mubr.msk.f32.mxu1 %vm12027_vm9, %v11971_v6  ;;  %vm12041_vm9 = vcmp.eq.f32.partialorder %v9509_v22, %v12016_v26 }
 0x508   : > { %7048 = vmatmul.mubr.msk.f32.gmra.mrb[14].mxu1 %vm12028_vm10, %v11971_v6  ;;  %vm12042_vm10 = vcmp.eq.f32.partialorder %v9509_v22, %v12018_v62 }
 0x509   : > { %7050 = vmatprep.mubr.msk.f32.mxu1 %vm12029_vm11, %v11971_v6  ;;  %vm12043_vm11 = vcmask 523264  }
 0x50c   : > { %7051 = vmatmul.mubr.msk.f32.gmra.mrb[16].mxu1 %vm12030_vm13, %v11971_v6 }
 0x50d   : > { %7053 = vmatprep.mubr.msk.f32.mxu1 %vm12031_vm12, %v11971_v6 }
 0x510   : > { %7054 = vmatmul.mubr.msk.f32.gmra.mrb[18].mxu1 %vm12032_vm3, %v11971_v6 }
 0x511   : > { %7056 = vmatprep.mubr.msk.f32.mxu1 %vm12033_vm14, %v11971_v6 }
 0x514   : > { %7057 = vmatmul.mubr.msk.f32.gmra.mrb[20].mxu1 %vm12034_vm2, %v11971_v6 }
 0x515   : > { %7059 = vmatprep.mubr.msk.f32.mxu1 %vm12035_vm15, %v11971_v6 }
 0x518   : > { %7060 = vmatmul.mubr.msk.f32.gmra.mrb[22].mxu1 %vm12036_vm4, %v11971_v6 }
 0x519   : > { %7062 = vmatprep.mubr.msk.f32.mxu1 %vm12037_vm5, %v11971_v6 }
 0x51c   : > { %7063 = vmatmul.mubr.msk.f32.gmra.mrb[24].mxu1 %vm12038_vm6, %v11971_v6 }
 0x51d   : > { %7065 = vmatprep.mubr.msk.f32.mxu1 %vm12039_vm7, %v11971_v6 }
 0x520   : > { %7066 = vmatmul.mubr.msk.f32.gmra.mrb[26].mxu1 %vm12040_vm8, %v11971_v6 }
 0x521   : > { %7068 = vmatprep.mubr.msk.f32.mxu1 %vm12041_vm9, %v11971_v6 }
 0x524   : > { %7069 = vmatmul.mubr.msk.f32.gmra.mrb[28].mxu1 %vm12042_vm10, %v11971_v6 }
 0x525   : > { %7071 = vmatprep.mubr.msk.f32.mxu1 %vm2875_vm0, %v11971_v6  ;;  %vm12044_vm0 = vmmov %vm12043_vm11 }
 0x526   : > { %vm12046_vm13 = vmmov %vm12044_vm0 }
 0x527   : > { %vm12047_vm12 = vmmov %vm12044_vm0 }
 0x528   : > { %7072 = vmatmul.mubr.msk.f32.gmra.mrb[30].mxu1 %vm2876_vm1, %v11971_v6  ;;  %vm12045_vm1 = vmmov %vm12044_vm0 }
 0x529   : > { %vm12048_vm3 = vmmov %vm12044_vm0 }
 0x52a   : > { %vm12049_vm14 = vmmov %vm12044_vm0 }
 0x52b   : > { %vm12050_vm2 = vmmov %vm12044_vm0 }
 0x52c   : > { %vm12051_vm15 = vmmov %vm12044_vm0 }
 0x52d   : > { %vm12052_vm4 = vmmov %vm12044_vm0 }
 0x52e   : > { %vm12053_vm5 = vmmov %vm12044_vm0 }
 0x52f   : > { %vm12054_vm6 = vmmov %vm12044_vm0 }
 0x530   : > { %vm12055_vm7 = vmmov %vm12044_vm0 }
 0x531   : > { %vm12056_vm8 = vmmov %vm12044_vm0 }
 0x532   : > { %vm12057_vm9 = vmmov %vm12044_vm0 }
 0x533   : > { %vm12058_vm10 = vmmov %vm12044_vm0 }
 0x5bf   : > { %v7028_v28 = vpop.f32.mrb[0].mxu1 }
 0x5c0   : > { %v4916_v35 = vsub.f32 %v7028_v28, %v7902_v21  ;;  %4948 = vst.msk [vmem:[%s10939_s8 + $0x8] sm:$0xff] %vm12043_vm11, %v7028_v28  ;;  %v4725_v39 = vpop.f32.mrb[1].mxu1  ;;  %vm12059_vm11 = vmmov %vm12044_vm0 }
 0x5c1   : > { %v4915_v15 = vsub.f32 %v4725_v39, %v7903_v18  ;;  %4947 = vst.msk [vmem:[%s10939_s8] sm:$0xff] %vm12044_vm0, %v4725_v39 }
 0x5c2   : > { %v5045_v22 = vmul.f32 %v4916_v35, %v4916_v35 }
 0x5c3   : > { %v5044_v60 = vmul.f32 %v4915_v15, %v4915_v15  ;;  %v7031_v23 = vpop.f32.mrb[2].mxu1  ;;  %v7916_v15 = vld [vmem:[%s8149_s9 + $0x78] sm:$0xff] }
 0x5c4   : > { %v4918_v56 = vsub.f32 %v7031_v23, %v7904_v54  ;;  %4950 = vst.msk [vmem:[%s10939_s8 + $0x18] sm:$0xff] %vm12045_vm1, %v7031_v23  ;;  %v4737_v31 = vpop.f32.mrb[3].mxu1  ;;  %v5079_v58 = vsel %vm12046_vm13, %v5045_v22, 0.0  ;;  %vm12060_vm1 = vmmov %vm12044_vm0  ;;  %v7917_v54 = vld [vmem:[%s8149_s9 + $0x70] sm:$0xff] }
 0x5c5   : > { %v4917_v7 = vsub.f32 %v4737_v31, %v7905_v30  ;;  %4949 = vst.msk [vmem:[%s10939_s8 + $0x10] sm:$0xff] %vm12047_vm12, %v4737_v31  ;;  %5080 = vadd.xlane.f32.xlu1 %v5079_v58  ;;  %v5076_v0 = vsel %vm12048_vm3, %v5044_v60, 0.0  ;;  %vm12061_vm13 = vmmov %vm12044_vm0 }
 0x5c6   : > { %v5047_v19 = vmul.f32 %v4918_v56, %v4918_v56  ;;  %5077 = vadd.xlane.f32.xlu0 %v5076_v0  ;;  %vm12062_vm12 = vmmov %vm12044_vm0  ;;  %v7918_v0 = vld [vmem:[%s8149_s9 + $0x88] sm:$0xff] }
 0x5c7   : > { %v5046_v49 = vmul.f32 %v4917_v7, %v4917_v7  ;;  %v7034_v11 = vpop.f32.mrb[4].mxu1  ;;  %vm12063_vm3 = vmmov %vm12044_vm0 }
 0x5c8   : > { %v4920_v47 = vsub.f32 %v7034_v11, %v7906_v48  ;;  %4952 = vst.msk [vmem:[%s10939_s8 + $0x28] sm:$0xff] %vm12049_vm14, %v7034_v11  ;;  %v4749_v25 = vpop.f32.mrb[5].mxu1  ;;  %v5085_v42 = vsel %vm12050_vm2, %v5047_v19, 0.0  ;;  %vm12064_vm14 = vmmov %vm12044_vm0  ;;  %v7919_v48 = vld [vmem:[%s8149_s9 + $0x80] sm:$0xff] }
 0x5c9   : > { %v4919_v33 = vsub.f32 %v4749_v25, %v7907_v37  ;;  %4951 = vst.msk [vmem:[%s10939_s8 + $0x20] sm:$0xff] %vm12051_vm15, %v4749_v25  ;;  %5086 = vadd.xlane.f32.xlu1 %v5085_v42  ;;  %v5082_v52 = vsel %vm12052_vm4, %v5046_v49, 0.0  ;;  %vm12065_vm2 = vmmov %vm12044_vm0 }
 0x5ca   : > { %v5049_v2 = vmul.f32 %v4920_v47, %v4920_v47  ;;  %5083 = vadd.xlane.f32.xlu0 %v5082_v52  ;;  %vm12066_vm15 = vmmov %vm12044_vm0  ;;  %v7920_v52 = vld [vmem:[%s8149_s9 + $0x98] sm:$0xff] }
 0x5cb   : > { %v5048_v46 = vmul.f32 %v4919_v33, %v4919_v33  ;;  %v7037_v59 = vpop.f32.mrb[6].mxu1  ;;  %vm12067_vm4 = vmmov %vm12044_vm0 }
 0x5cc   : > { %v4922_v44 = vsub.f32 %v7037_v59, %v7908_v20  ;;  %4954 = vst.msk [vmem:[%s10939_s8 + $0x38] sm:$0xff] %vm12053_vm5, %v7037_v59  ;;  %v4761_v9 = vpop.f32.mrb[7].mxu1  ;;  %v5091_v32 = vsel %vm12054_vm6, %v5049_v2, 0.0  ;;  %vm12068_vm5 = vmmov %vm12044_vm0  ;;  %v7921_v20 = vld [vmem:[%s8149_s9 + $0x90] sm:$0xff] }
 0x5cd   : > { %v4921_v6 = vsub.f32 %v4761_v9, %v7909_v41  ;;  %4953 = vst.msk [vmem:[%s10939_s8 + $0x30] sm:$0xff] %vm12055_vm7, %v4761_v9  ;;  %5092 = vadd.xlane.f32.xlu1 %v5091_v32  ;;  %v5088_v24 = vsel %vm12056_vm8, %v5048_v46, 0.0  ;;  %vm12069_vm6 = vmmov %vm12044_vm0 }
 0x5ce   : > { %v5051_v8 = vmul.f32 %v4922_v44, %v4922_v44  ;;  %5089 = vadd.xlane.f32.xlu0 %v5088_v24  ;;  %vm12070_vm7 = vmmov %vm12044_vm0  ;;  %v7922_v24 = vld [vmem:[%s8149_s9 + $0xa8] sm:$0xff] }
 0x5cf   : > { %v5050_v5 = vmul.f32 %v4921_v6, %v4921_v6  ;;  %v7040_v43 = vpop.f32.mrb[8].mxu1  ;;  %vm12071_vm8 = vmmov %vm12044_vm0 }
 0x5d0   : > { %v4924_v51 = vsub.f32 %v7040_v43, %v7910_v53  ;;  %4956 = vst.msk [vmem:[%s10939_s8 + $0x48] sm:$0xff] %vm12057_vm9, %v7040_v43  ;;  %v4773_v14 = vpop.f32.mrb[9].mxu1  ;;  %v5097_v3 = vsel %vm12058_vm10, %v5051_v8, 0.0  ;;  %vm12072_vm9 = vmmov %vm12044_vm0  ;;  %v7923_v53 = vld [vmem:[%s8149_s9 + $0xa0] sm:$0xff] }
 0x5d1   : > { %v4923_v29 = vsub.f32 %v4773_v14, %v7911_v61  ;;  %4955 = vst.msk [vmem:[%s10939_s8 + $0x40] sm:$0xff] %vm12059_vm11, %v4773_v14  ;;  %5098 = vadd.xlane.f32.xlu1 %v5097_v3  ;;  %v5094_v13 = vsel %vm12044_vm0, %v5050_v5, 0.0  ;;  %vm12073_vm10 = vmmov %vm12044_vm0 }
 0x5d2   : > { %v5053_v16 = vmul.f32 %v4924_v51, %v4924_v51  ;;  %5095 = vadd.xlane.f32.xlu0 %v5094_v13  ;;  %vm12074_vm11 = vmmov %vm12044_vm0  ;;  %v7924_v13 = vld [vmem:[%s8149_s9 + $0xb8] sm:$0xff] }
 0x5d3   : > { %v5052_v40 = vmul.f32 %v4923_v29, %v4923_v29  ;;  %v7043_v27 = vpop.f32.mrb[10].mxu1 }
 0x5d4   : > { %v4926_v57 = vsub.f32 %v7043_v27, %v7912_v55  ;;  %4958 = vst.msk [vmem:[%s10939_s8 + $0x58] sm:$0xff] %vm12060_vm1, %v7043_v27  ;;  %v4785_v63 = vpop.f32.mrb[11].mxu1  ;;  %v5103_v38 = vsel %vm12061_vm13, %v5053_v16, 0.0  ;;  %vm12075_vm1 = vmmov %vm12044_vm0  ;;  %v7925_v55 = vld [vmem:[%s8149_s9 + $0xb0] sm:$0xff] }
 0x5d5   : > { %v4925_v10 = vsub.f32 %v4785_v63, %v7913_v34  ;;  %4957 = vst.msk [vmem:[%s10939_s8 + $0x50] sm:$0xff] %vm12062_vm12, %v4785_v63  ;;  %5104 = vadd.xlane.f32.xlu1 %v5103_v38  ;;  %v5100_v12 = vsel %vm12063_vm3, %v5052_v40, 0.0  ;;  %vm12076_vm13 = vmmov %vm12044_vm0 }
 0x5d6   : > { %v5055_v17 = vmul.f32 %v4926_v57, %v4926_v57  ;;  %5101 = vadd.xlane.f32.xlu0 %v5100_v12  ;;  %vm12077_vm12 = vmmov %vm12044_vm0  ;;  %v7926_v12 = vld [vmem:[%s8149_s9 + $0xc8] sm:$0xff] }
 0x5d7   : > { %v5054_v36 = vmul.f32 %v4925_v10, %v4925_v10  ;;  %v7046_v1 = vpop.f32.mrb[12].mxu1  ;;  %vm12078_vm3 = vmmov %vm12044_vm0 }
 0x5d8   : > { %v4928_v26 = vsub.f32 %v7046_v1, %v7914_v4  ;;  %4960 = vst.msk [vmem:[%s10939_s8 + $0x68] sm:$0xff] %vm12064_vm14, %v7046_v1  ;;  %v4797_v62 = vpop.f32.mrb[13].mxu1  ;;  %v5109_v45 = vsel %vm12065_vm2, %v5055_v17, 0.0  ;;  %vm12079_vm14 = vmmov %vm12044_vm0  ;;  %v7927_v4 = vld [vmem:[%s8149_s9 + $0xc0] sm:$0xff] }
 0x5d9   : > { %v4927_v28 = vsub.f32 %v4797_v62, %v7915_v50  ;;  %4959 = vst.msk [vmem:[%s10939_s8 + $0x60] sm:$0xff] %vm12066_vm15, %v4797_v62  ;;  %5110 = vadd.xlane.f32.xlu1 %v5109_v45  ;;  %v5106_v21 = vsel %vm12067_vm4, %v5054_v36, 0.0  ;;  %vm12080_vm2 = vmmov %vm12044_vm0 }
 0x5da   : > { %v5057_v35 = vmul.f32 %v4928_v26, %v4928_v26  ;;  %5107 = vadd.xlane.f32.xlu0 %v5106_v21  ;;  %vm12081_vm15 = vmmov %vm12044_vm0  ;;  %v7928_v21 = vld [vmem:[%s8149_s9 + $0xd8] sm:$0xff] }
 0x5db   : > { %v5056_v39 = vmul.f32 %v4927_v28, %v4927_v28  ;;  %v7049_v18 = vpop.f32.mrb[14].mxu1  ;;  %vm12082_vm4 = vmmov %vm12044_vm0 }
 0x5dc   : > { %v4930_v22 = vsub.f32 %v7049_v18, %v7916_v15  ;;  %4962 = vst.msk [vmem:[%s10939_s8 + $0x78] sm:$0xff] %vm12068_vm5, %v7049_v18  ;;  %v4809_v60 = vpop.f32.mrb[15].mxu1  ;;  %v5115_v23 = vsel %vm12069_vm6, %v5057_v35, 0.0  ;;  %vm12083_vm5 = vmmov %vm12044_vm0  ;;  %v7929_v15 = vld [vmem:[%s8149_s9 + $0xd0] sm:$0xff] }
 0x5dd   : > { %v4929_v56 = vsub.f32 %v4809_v60, %v7917_v54  ;;  %4961 = vst.msk [vmem:[%s10939_s8 + $0x70] sm:$0xff] %vm12070_vm7, %v4809_v60  ;;  %5116 = vadd.xlane.f32.xlu1 %v5115_v23  ;;  %v5112_v31 = vsel %vm12071_vm8, %v5056_v39, 0.0  ;;  %vm12084_vm6 = vmmov %vm12044_vm0 }
 0x5de   : > { %v5059_v58 = vmul.f32 %v4930_v22, %v4930_v22  ;;  %5113 = vadd.xlane.f32.xlu0 %v5112_v31  ;;  %vm12085_vm7 = vmmov %vm12044_vm0  ;;  %v7930_v31 = vld [vmem:[%s8149_s9 + $0xe8] sm:$0xff] }
 0x5df   : > { %v5058_v30 = vmul.f32 %v4929_v56, %v4929_v56  ;;  %v7052_v7 = vpop.f32.mrb[16].mxu1  ;;  %vm12086_vm8 = vmmov %vm12044_vm0 }
 0x5e0   : > { %v4932_v19 = vsub.f32 %v7052_v7, %v7918_v0  ;;  %4964 = vst.msk [vmem:[%s10939_s8 + $0x88] sm:$0xff] %vm12072_vm9, %v7052_v7  ;;  %v4821_v49 = vpop.f32.mrb[17].mxu1  ;;  %v5121_v11 = vsel %vm12073_vm10, %v5059_v58, 0.0  ;;  %vm12087_vm9 = vmmov %vm12044_vm0  ;;  %v7931_v0 = vld [vmem:[%s8149_s9 + $0xe0] sm:$0xff] }
 0x5e1   : > { %v4931_v47 = vsub.f32 %v4821_v49, %v7919_v48  ;;  %4963 = vst.msk [vmem:[%s10939_s8 + $0x80] sm:$0xff] %vm12074_vm11, %v4821_v49  ;;  %5122 = vadd.xlane.f32.xlu1 %v5121_v11  ;;  %v5118_v25 = vsel %vm12044_vm0, %v5058_v30, 0.0  ;;  %vm12088_vm10 = vmmov %vm12044_vm0 }
 0x5e2   : > { %v5061_v42 = vmul.f32 %v4932_v19, %v4932_v19  ;;  %5119 = vadd.xlane.f32.xlu0 %v5118_v25  ;;  %vm12089_vm11 = vmmov %vm12044_vm0  ;;  %v7932_v25 = vld [vmem:[%s8149_s9 + $0xf8] sm:$0xff] }
 0x5e3   : > { %v5060_v37 = vmul.f32 %v4931_v47, %v4931_v47  ;;  %v7055_v33 = vpop.f32.mrb[18].mxu1 }
 0x5e4   : > { %v4934_v2 = vsub.f32 %v7055_v33, %v7920_v52  ;;  %4966 = vst.msk [vmem:[%s10939_s8 + $0x98] sm:$0xff] %vm12075_vm1, %v7055_v33  ;;  %v4833_v46 = vpop.f32.mrb[19].mxu1  ;;  %v5127_v59 = vsel %vm12076_vm13, %v5061_v42, 0.0  ;;  %vm12090_vm1 = vmmov %vm12044_vm0  ;;  %v7933_v52 = vld [vmem:[%s8149_s9 + $0xf0] sm:$0xff]  ;;  %s5398_s9 = sshll.u32 %s231_s6, 3 }
 0x5e5   : > { %v4933_v44 = vsub.f32 %v4833_v46, %v7921_v20  ;;  %4965 = vst.msk [vmem:[%s10939_s8 + $0x90] sm:$0xff] %vm12077_vm12, %v4833_v46  ;;  %5128 = vadd.xlane.f32.xlu1 %v5127_v59  ;;  %v5124_v9 = vsel %vm12078_vm3, %v5060_v37, 0.0  ;;  %vm12091_vm13 = vmmov %vm12044_vm0  ;;  %s233_s11 = scalar_lea.vmem [#allocation2], %s5398_s9 }
 0x5e6   : > { %v5063_v32 = vmul.f32 %v4934_v2, %v4934_v2  ;;  %5125 = vadd.xlane.f32.xlu0 %v5124_v9  ;;  %vm12092_vm12 = vmmov %vm12044_vm0  ;;  %s5285_s12 = sshll.u32 %s233_s11, 4  ;;  %s11079_s12 = int_to_ptr.vmem [resolvable:$true] %s5285_s12 }
 0x5e7   : > { %v5062_v41 = vmul.f32 %v4933_v44, %v4933_v44  ;;  %v7058_v6 = vpop.f32.mrb[20].mxu1  ;;  %vm12093_vm3 = vmmov %vm12044_vm0  ;;  %s7934_s22 = scalar_lea.vmem %s11079_s12, 128  ;;  %p7941_p0 = scmp.lt.s32.totalorder %s11079_s12, %s7939_s23 }
 0x5e8   : > { %v4936_v8 = vsub.f32 %v7058_v6, %v7922_v24  ;;  %4968 = vst.msk [vmem:[%s10939_s8 + $0xa8] sm:$0xff] %vm12079_vm14, %v7058_v6  ;;  %v4845_v5 = vpop.f32.mrb[21].mxu1  ;;  %v5133_v43 = vsel %vm12080_vm2, %v5063_v32, 0.0  ;;  %vm12094_vm14 = vmmov %vm12044_vm0  ;;  %p7935_p11 = scmp.ne.s32.totalorder %s11079_s12, %s7934_s22  ;;  %p7942_p1 = scmp.lt.s32.totalorder %s7940_s25, %s7934_s22 }
 0x5e9   : > { %v4935_v51 = vsub.f32 %v4845_v5, %v7923_v53  ;;  %4967 = vst.msk [vmem:[%s10939_s8 + $0xa0] sm:$0xff] %vm12081_vm15, %v4845_v5  ;;  %5134 = vadd.xlane.f32.xlu1 %v5133_v43  ;;  %v5130_v14 = vsel %vm12082_vm4, %v5062_v41, 0.0  ;;  %vm12095_vm2 = vmmov %vm12044_vm0 }
 0x5ea   : > { %v5065_v3 = vmul.f32 %v4936_v8, %v4936_v8  ;;  %5131 = vadd.xlane.f32.xlu0 %v5130_v14  ;;  %vm12096_vm15 = vmmov %vm12044_vm0  ;;  %p7936_p12 = pnand %p7935_p11, %p8069_p5  ;;  %p7943_p2 = por %p7942_p1, %p7941_p0 }
 0x5eb   : > { %v5064_v61 = vmul.f32 %v4935_v51, %v4935_v51  ;;  %v7061_v29 = vpop.f32.mrb[22].mxu1  ;;  %vm12097_vm4 = vmmov %vm12044_vm0 }
 0x5ec   : > { %v4938_v16 = vsub.f32 %v7061_v29, %v7924_v13  ;;  %4970 = vst.msk [vmem:[%s10939_s8 + $0xb8] sm:$0xff] %vm12083_vm5, %v7061_v29  ;;  %v4857_v40 = vpop.f32.mrb[23].mxu1  ;;  %v5139_v27 = vsel %vm12084_vm6, %v5065_v3, 0.0  ;;  %vm12098_vm5 = vmmov %vm12044_vm0  ;;  %p7937_p13 = pneg %p7936_p12 }
 0x5ed   : > { %v4937_v57 = vsub.f32 %v4857_v40, %v7925_v55  ;;  %4969 = vst.msk [vmem:[%s10939_s8 + $0xb0] sm:$0xff] %vm12085_vm7, %v4857_v40  ;;  %5140 = vadd.xlane.f32.xlu1 %v5139_v27  ;;  %v5136_v63 = vsel %vm12086_vm8, %v5064_v61, 0.0  ;;  %vm12099_vm6 = vmmov %vm12044_vm0 }
 0x5ee   : > { %v5067_v38 = vmul.f32 %v4938_v16, %v4938_v16  ;;  %5137 = vadd.xlane.f32.xlu0 %v5136_v63  ;;  %vm12100_vm7 = vmmov %vm12044_vm0  ;;  %p7944_p3 = pnand %p7943_p2, %p7937_p13 }
 0x5ef   : > { %v5066_v34 = vmul.f32 %v4937_v57, %v4937_v57  ;;  %v7064_v10 = vpop.f32.mrb[24].mxu1  ;;  %vm12101_vm8 = vmmov %vm12044_vm0 }
 0x5f0   : > { %v4940_v17 = vsub.f32 %v7064_v10, %v7926_v12  ;;  %4972 = vst.msk [vmem:[%s10939_s8 + $0xc8] sm:$0xff] %vm12087_vm9, %v7064_v10  ;;  %v4869_v36 = vpop.f32.mrb[25].mxu1  ;;  %v5145_v1 = vsel %vm12088_vm10, %v5067_v38, 0.0  ;;  %vm12102_vm9 = vmmov %vm12044_vm0 }
 0x5f1   : > { %v4939_v26 = vsub.f32 %v4869_v36, %v7927_v4  ;;  %4971 = vst.msk [vmem:[%s10939_s8 + $0xc0] sm:$0xff] %vm12089_vm11, %v4869_v36  ;;  %5146 = vadd.xlane.f32.xlu1 %v5145_v1  ;;  %v5142_v62 = vsel %vm12044_vm0, %v5066_v34, 0.0  ;;  %vm12103_vm10 = vmmov %vm12044_vm0 }
 0x5f2   : > { %v5069_v45 = vmul.f32 %v4940_v17, %v4940_v17  ;;  %5143 = vadd.xlane.f32.xlu0 %v5142_v62 }
 0x5f3   : > { %v5068_v50 = vmul.f32 %v4939_v26, %v4939_v26  ;;  %v7067_v28 = vpop.f32.mrb[26].mxu1 }
 0x5f4   : > { %v4942_v35 = vsub.f32 %v7067_v28, %v7928_v21  ;;  %4974 = vst.msk [vmem:[%s10939_s8 + $0xd8] sm:$0xff] %vm12090_vm1, %v7067_v28  ;;  %v4881_v39 = vpop.f32.mrb[27].mxu1  ;;  %v5151_v18 = vsel %vm12091_vm13, %v5069_v45, 0.0 }
 0x5f5   : > { %v4941_v22 = vsub.f32 %v4881_v39, %v7929_v15  ;;  %4973 = vst.msk [vmem:[%s10939_s8 + $0xd0] sm:$0xff] %vm12092_vm12, %v4881_v39  ;;  %5152 = vadd.xlane.f32.xlu1 %v5151_v18  ;;  %v5148_v60 = vsel %vm12093_vm3, %v5068_v50, 0.0 }
 0x5f6   : > { %v5071_v23 = vmul.f32 %v4942_v35, %v4942_v35  ;;  %5149 = vadd.xlane.f32.xlu0 %v5148_v60 }
 0x5f7   : > { %v5070_v54 = vmul.f32 %v4941_v22, %v4941_v22  ;;  %v7070_v56 = vpop.f32.mrb[28].mxu1 }
 0x5f8   : > { %v4944_v58 = vsub.f32 %v7070_v56, %v7930_v31  ;;  %4976 = vst.msk [vmem:[%s10939_s8 + $0xe8] sm:$0xff] %vm12094_vm14, %v7070_v56  ;;  %v4893_v30 = vpop.f32.mrb[29].mxu1  ;;  %v5157_v7 = vsel %vm12095_vm2, %v5071_v23, 0.0 }
 0x5f9   : > { %v4943_v19 = vsub.f32 %v4893_v30, %v7931_v0  ;;  %4975 = vst.msk [vmem:[%s10939_s8 + $0xe0] sm:$0xff] %vm12096_vm15, %v4893_v30  ;;  %5158 = vadd.xlane.f32.xlu1 %v5157_v7  ;;  %v5154_v49 = vsel %vm12097_vm4, %v5070_v54, 0.0 }
 0x5fa   : > { %v5073_v11 = vmul.f32 %v4944_v58, %v4944_v58  ;;  %5155 = vadd.xlane.f32.xlu0 %v5154_v49 }
 0x5fb   : > { %v5072_v48 = vmul.f32 %v4943_v19, %v4943_v19  ;;  %v7073_v47 = vpop.f32.mrb[30].mxu1 }
 0x5fc   : > { %v4946_v42 = vsub.f32 %v7073_v47, %v7932_v25  ;;  %4978 = vst.msk [vmem:[%s10939_s8 + $0xf8] sm:$0xff] %vm12098_vm5, %v7073_v47  ;;  %v4905_v37 = vpop.f32.mrb[31].mxu1  ;;  %v5163_v33 = vsel %vm12099_vm6, %v5073_v11, 0.0 }
 0x5fd   : > { %v4945_v2 = vsub.f32 %v4905_v37, %v7933_v52  ;;  %4977 = vst.msk [vmem:[%s10939_s8 + $0xf0] sm:$0xff] %vm12100_vm7, %v4905_v37  ;;  %5164 = vadd.xlane.f32.xlu1 %v5163_v33  ;;  %v5160_v46 = vsel %vm12101_vm8, %v5072_v48, 0.0  ;;  %v12104_v37 = vld [vmem:[#allocation58_spill] sm:$0xff] }
 0x5fe   : > { %v5075_v59 = vmul.f32 %v4946_v42, %v4946_v42  ;;  %5161 = vadd.xlane.f32.xlu0 %v5160_v46  ;;  %v5205_v33 = vrot.slane %v12104_v37, 4 }
 0x5ff   : > { %v5074_v20 = vmul.f32 %v4945_v2, %v4945_v2 }
 0x600   : > { %v5169_v44 = vsel %vm12102_vm9, %v5075_v59, 0.0 }
 0x601   : > { %5170 = vadd.xlane.f32.xlu1 %v5169_v44  ;;  %v5166_v9 = vsel %vm12103_vm10, %v5074_v20, 0.0  ;;  %v5206_v20 = vadd.f32 %v5205_v33, %v12104_v37 }
 0x602   : > { %5167 = vadd.xlane.f32.xlu0 %v5166_v9 }
 0x652   : > { %v5081_v32 = vpop.xlane.xlu1 %5080 }
 0x653   : > { %v5078_v41 = vpop.xlane.xlu0 %5077 }
 0x654   : > { %v5211_v6 = vadd.f32 %v5081_v32, %v5078_v41 }
 0x656   : > { %v5087_v24 = vpop.xlane.xlu1 %5086 }
 0x657   : > { %v5084_v8 = vpop.xlane.xlu0 %5083 }
 0x658   : > { %v5212_v5 = vadd.f32 %v5211_v6, %v5084_v8  ;;  %v5207_v6 = vrot.slane %v5206_v20, 2 }
 0x65a   : > { %v5093_v43 = vpop.xlane.xlu1 %5092  ;;  %v5213_v53 = vadd.f32 %v5212_v5, %v5087_v24  ;;  %v5208_v5 = vadd.f32 %v5207_v6, %v5206_v20 }
 0x65b   : > { %v5090_v51 = vpop.xlane.xlu0 %5089 }
 0x65c   : > { %v5214_v14 = vadd.f32 %v5213_v53, %v5090_v51  ;;  %v12105_v53 = vlaneseq }
 0x65e   : > { %v5099_v3 = vpop.xlane.xlu1 %5098  ;;  %v5215_v61 = vadd.f32 %v5214_v14, %v5093_v43  ;;  %v5173_v51 = vshrl.u32 %v12105_v53, 7 }
 0x65f   : > { %v5096_v29 = vpop.xlane.xlu0 %5095 }
 0x660   : > { %v5216_v13 = vadd.f32 %v5215_v61, %v5096_v29  ;;  %vm5249_vm11 = vcmp.eq.s32.totalorder %v5173_v51, 1  ;;  %vm5248_vm0 = vcmp.eq.s32.totalorder %v5173_v51, 0 }
 0x662   : > { %v5105_v16 = vpop.xlane.xlu1 %5104  ;;  %v5217_v40 = vadd.f32 %v5216_v13, %v5099_v3  ;;  %v5209_v3 = vrot.slane %v5208_v5, 1 }
 0x663   : > { %v5102_v27 = vpop.xlane.xlu0 %5101 }
 0x664   : > { %v5218_v55 = vadd.f32 %v5217_v40, %v5102_v27  ;;  %v5210_v13 = vadd.f32 %v5209_v3, %v5208_v5 }
 0x666   : > { %v5111_v57 = vpop.xlane.xlu1 %5110  ;;  %v5219_v63 = vadd.f32 %v5218_v55, %v5105_v16 }
 0x667   : > { %v5108_v38 = vpop.xlane.xlu0 %5107 }
 0x668   : > { %v5220_v34 = vadd.f32 %v5219_v63, %v5108_v38 }
 0x66a   : > { %v5117_v10 = vpop.xlane.xlu1 %5116  ;;  %v5221_v12 = vadd.f32 %v5220_v34, %v5111_v57 }
 0x66b   : > { %v5114_v17 = vpop.xlane.xlu0 %5113 }
 0x66c   : > { %v5222_v36 = vadd.f32 %v5221_v12, %v5114_v17 }
 0x66e   : > { %v5123_v1 = vpop.xlane.xlu1 %5122  ;;  %v5223_v4 = vadd.f32 %v5222_v36, %v5117_v10 }
 0x66f   : > { %v5120_v26 = vpop.xlane.xlu0 %5119 }
 0x670   : > { %v5224_v62 = vadd.f32 %v5223_v4, %v5120_v26 }
 0x672   : > { %v5129_v45 = vpop.xlane.xlu1 %5128  ;;  %v5225_v50 = vadd.f32 %v5224_v62, %v5123_v1 }
 0x673   : > { %v5126_v28 = vpop.xlane.xlu0 %5125 }
 0x674   : > { %v5226_v21 = vadd.f32 %v5225_v50, %v5126_v28 }
 0x676   : > { %v5135_v35 = vpop.xlane.xlu1 %5134  ;;  %v5227_v39 = vadd.f32 %v5226_v21, %v5129_v45 }
 0x677   : > { %v5132_v18 = vpop.xlane.xlu0 %5131 }
 0x678   : > { %v5228_v15 = vadd.f32 %v5227_v39, %v5132_v18 }
 0x67a   : > { %v5141_v22 = vpop.xlane.xlu1 %5140  ;;  %v5229_v60 = vadd.f32 %v5228_v15, %v5135_v35 }
 0x67b   : > { %v5138_v23 = vpop.xlane.xlu0 %5137 }
 0x67c   : > { %v5230_v54 = vadd.f32 %v5229_v60, %v5138_v23 }
 0x67e   : > { %v5147_v56 = vpop.xlane.xlu1 %5146  ;;  %v5231_v31 = vadd.f32 %v5230_v54, %v5141_v22 }
 0x67f   : > { %v5144_v58 = vpop.xlane.xlu0 %5143 }
 0x680   : > { %v5232_v30 = vadd.f32 %v5231_v31, %v5144_v58 }
 0x682   : > { %v5153_v7 = vpop.xlane.xlu1 %5152  ;;  %v5233_v0 = vadd.f32 %v5232_v30, %v5147_v56 }
 0x683   : > { %v5150_v19 = vpop.xlane.xlu0 %5149 }
 0x684   : > { %v5234_v49 = vadd.f32 %v5233_v0, %v5150_v19 }
 0x686   : > { %v5159_v11 = vpop.xlane.xlu1 %5158  ;;  %v5235_v48 = vadd.f32 %v5234_v49, %v5153_v7 }
 0x687   : > { %v5156_v47 = vpop.xlane.xlu0 %5155 }
 0x688   : > { %v5236_v25 = vadd.f32 %v5235_v48, %v5156_v47 }
 0x68a   : > { %v5237_v42 = vadd.f32 %v5236_v25, %v5159_v11  ;;  %v5165_v52 = vpop.xlane.xlu1 %5164 }
 0x68b   : > { %v5162_v2 = vpop.xlane.xlu0 %5161 }
 0x68c   : > { %v5238_v46 = vadd.f32 %v5237_v42, %v5162_v2 }
 0x68e   : > { %v5239_v59 = vadd.f32 %v5238_v46, %v5165_v52  ;;  %v5171_v32 = vpop.xlane.xlu1 %5170 }
 0x68f   : > { %v5168_v44 = vpop.xlane.xlu0 %5167 }
 0x690   : > { %v5240_v9 = vadd.f32 %v5239_v59, %v5168_v44 }
 0x692   : > { %v5241_v41 = vadd.f32 %v5240_v9, %v5171_v32 }
 0x694   : > { %v5242_v24 = vrot.slane %v5241_v41, 4 }
 0x696   : > { %v5243_v8 = vadd.f32 %v5242_v24, %v5241_v41 }
 0x698   : > { %v5244_v43 = vrot.slane %v5243_v8, 2 }
 0x69a   : > { %v5245_v14 = vadd.f32 %v5244_v43, %v5243_v8 }
 0x69c   : > { %v5246_v61 = vrot.slane %v5245_v14, 1 }
 0x69e   : > { %v5247_v29 = vadd.f32 %v5246_v61, %v5245_v14 }
 0x6a0   : > { %v5250_v16 = vsel %vm5249_vm11, %v5247_v29, 0.0 }
 0x6a1   : > { %v5251_v40 = vsel %vm5248_vm0, %v5210_v13, %v5250_v16 }
 0x6a2   : > { %5252 = vst [vmem:[%s233_s11] sm:$0xff] %v5251_v40 }
 0x6a3   : > { %7947 = shalt.err (!%p7944_p3)
}
 0x6a4   : > { %s7948_s26 = scalar_lea.hbm %s11077_s15, 128  ;;  %s7952_s8 = scalar_lea.hbm %s11124_s5, 256 }
 0x6a5   : > { %p7949_p4 = scmp.ne.s32.totalorder %s11077_s15, %s7948_s26  ;;  %p7953_p9 = scmp.lt.u32.totalorder %s11077_s15, %s11124_s5 }
 0x6a6   : > { %p7954_p10 = scmp.lt.u32.totalorder %s7952_s8, %s7948_s26  ;;  %p7956_p12 = scmp.lt.u32.totalorder %s7948_s26, %s11077_s15 }
 0x6a7   : > { %p7950_p7 = pnand %p7949_p4, %p8069_p5 }
 0x6a8   : > { %p7955_p11 = por %p7954_p10, %p7953_p9 }
 0x6a9   : > { %p7951_p8 = pneg %p7950_p7 }
 0x6aa   : > { %p7957_p13 = por %p7956_p12, %p7955_p11 }
 0x6ac   : > { %p7958_p0 = pnand %p7957_p13, %p7951_p8 }
 0x6ae   : > { %7961 = shalt.err (!%p7958_p0)
}
 0x6af   : > { %7842 = dma.vmem_to_hbm [thread:$0]  (%p8069_p5), %s11079_s12, 128, %s11077_s15, %s5264_s16  }
 0x6b0 PF: > { %p7848_p1 = scmp.ge.s32.totalorder %s7996_s21, 2  ;;  %s5313_s10 = sand.u32 1, %s7984_s18  }
 0x6b1   : > { %s5314_s11 = scalar_lea.sflag [#allocation3], %s5313_s10 }
 0x6b2   : > { %p7845_p2 = pnand %p7848_p1, %p8073_p6 }
 0x6b4   : > { %7979 = dma.done.wait (!%p7845_p2), %s5314_s11, 128  }
 0x6b5   : > { %7981 = vsyncadd (!%p7845_p2), %s5314_s11, 4294967168  ;;  %p16_p3 = scmp.ge.s32.totalorder %s8056_s24, 4   ;;  %s12106_s18 = smov %s7988_s19 }
 0x6b6   : > { %s12107_s19 = smov %s7992_s20  ;;  %s12108_s20 = smov %s8067_s27 }
 0x6b7   : > { %s12109_s21 = smov %s8056_s24  ;;  %18 = sbr.rel (!%p16_p3) target bundleno = 3 (0x3), region = 91 }
 0x6be   :  { %5319 = vsyncpa [#allocation3], 1 }
 0x6bf   :  { %5321 = vsyncpa [#allocation3 + $0x1], 1 }

</bundles_post_ra>
